<compile_context>
chip_gen: v7x
topology: tpu7x:2x2x1
jax: 0.10.0
libtpu: 0.0.40
codegen_flags: <defaults>
</compile_context>

<pallas_src>
import numpy as np
import jax
import jax.numpy as jnp
from jax.experimental import pallas as pl
from jax.experimental.pallas import tpu as pltpu


# ----------------------------------------------------------------------------
# Pallas kernel: one fused-contraction matmul + fused epilogue
# ----------------------------------------------------------------------------
def _make_conv_kernel(mode):
    """mode in {'linear','relu','residual','ra'}.

      linear   : out = P @ W + b
      relu     : out = relu(P @ W + b)
      residual : out = extra + (P @ W + b)
      ra       : out = extra * sigmoid(P @ W + b) + extra
    """
    with_extra = mode in ("residual", "ra")

    def epilogue(y, extra):
        if mode == "relu":
            return jnp.maximum(y, 0.0)
        if mode == "residual":
            return extra + y
        if mode == "ra":
            return extra * jax.nn.sigmoid(y) + extra   # sigmoid -> EUP slot
        return y

    if with_extra:
        def kernel(p_ref, w_ref, b_ref, e_ref, out_ref):
            y = jnp.dot(p_ref[...], w_ref[...],
                        preferred_element_type=jnp.float32)
            y = y + b_ref[...]
            y = epilogue(y, e_ref[...].astype(jnp.float32))
            out_ref[...] = y.astype(out_ref.dtype)
    else:
        def kernel(p_ref, w_ref, b_ref, out_ref):
            y = jnp.dot(p_ref[...], w_ref[...],
                        preferred_element_type=jnp.float32)
            y = y + b_ref[...]
            y = epilogue(y, None)
            out_ref[...] = y.astype(out_ref.dtype)
    return kernel


def _choose_tm(M, target=512):
    """Row-tile size: big (DMA efficiency) but keep >= 2 grid steps if we can."""
    if M >= 2 * target:
        return target
    half = (M // 2) // 8 * 8
    if half >= 8:
        return half
    return M


def conv_mm(patches, w, b, extra=None, mode="linear", out_dtype=jnp.bfloat16):
    """patches: (M, K) bf16; w: (K, Cout) bf16; b: (1, Cout) f32;
    extra: (M, Cout) bf16 or None.  Returns (M, Cout) in out_dtype."""
    M, Kdim = patches.shape
    Cout = w.shape[-1]
    tm = _choose_tm(M)
    Mp = pl.cdiv(M, tm) * tm
    if Mp != M:
        patches = jnp.pad(patches, ((0, Mp - M), (0, 0)))
        if extra is not None:
            extra = jnp.pad(extra, ((0, Mp - M), (0, 0)))

    in_specs = [
        pl.BlockSpec((tm, Kdim), lambda m: (m, 0)),      # patch tile (pipelined)
        pl.BlockSpec((Kdim, Cout), lambda m: (0, 0)),    # weights (resident)
        pl.BlockSpec((1, Cout), lambda m: (0, 0)),       # bias (f32, resident)
    ]
    args = [patches, w, b]
    aliases = {}
    if extra is not None:
        in_specs.append(pl.BlockSpec((tm, Cout), lambda m: (m, 0)))
        args.append(extra)
        aliases = {3: 0}   # write the result in place over the residual input

    # Advisory cost for XLA scheduling around the custom call.
    bytes_accessed = (Mp * Kdim * 2 + Kdim * Cout * 2 + Cout * 4 + Mp * Cout * 2
                      + (Mp * Cout * 2 if extra is not None else 0))
    cost = pl.CostEstimate(
        flops=2 * Mp * Kdim * Cout,
        transcendentals=(Mp * Cout if mode == "ra" else 0),
        bytes_accessed=bytes_accessed)

    # VMEM budget: 2x patch tile (bf16) + 2x out tile + resident weights/bias
    # (+ 2x extra tile); kept well under per-core physical VMEM on all chips.
    bytes_need = (2 * tm * Kdim * 2 + 2 * tm * Cout * 2 + Kdim * Cout * 2
                  + 8 * Cout * 4)
    if extra is not None:
        bytes_need += 2 * tm * Cout * 2
    vmem_limit = int(min(48 * 2 ** 20, max(32 * 2 ** 20, 4 * bytes_need)))

    out = pl.pallas_call(
        _make_conv_kernel(mode),
        out_shape=jax.ShapeDtypeStruct((Mp, Cout), out_dtype),
        grid_spec=pltpu.PrefetchScalarGridSpec(
            num_scalar_prefetch=0,
            grid=(Mp // tm,),
            in_specs=in_specs,
            out_specs=pl.BlockSpec((tm, Cout), lambda m: (m, 0)),
        ),
        compiler_params=pltpu.CompilerParams(
            dimension_semantics=("parallel",),
            vmem_limit_bytes=vmem_limit),
        cost_estimate=cost,
        input_output_aliases=aliases,
    )(*args)
    return out[:M] if Mp != M else out


# ----------------------------------------------------------------------------
# Glue: folded im2col (tap axis fused into the channel/contraction axis)
# ----------------------------------------------------------------------------
def _im2col_3d_folded(x, k=3, pad=1):
    """x: (N,T,H,W,C) -> (N*T*H*W, k^3*C), tap-major then channel (matches
    weight layout w[tap, cin, cout].reshape(k^3*cin, cout))."""
    N, T, H, W, C = x.shape
    xp = jnp.pad(x, ((0, 0), (pad, pad), (pad, pad), (pad, pad), (0, 0)))
    cols = [xp[:, kd:kd + T, kh:kh + H, kw:kw + W, :]
            for kd in range(k) for kh in range(k) for kw in range(k)]
    patches = jnp.concatenate(cols, axis=-1)           # (N,T,H,W, k^3*C)
    return patches.reshape(N * T * H * W, k * k * k * C)


def conv3d(x, w, b, *, mode="linear", extra=None):
    """3x3x3 'same' Conv3d.  x: (N,T,H,W,Cin) bf16; w: (27,Cin,Cout) f32."""
    N, T, H, W, Cin = x.shape
    Cout = w.shape[-1]
    patches = _im2col_3d_folded(x).astype(jnp.bfloat16)
    wf = w.reshape(-1, Cout).astype(jnp.bfloat16)
    bf = b.astype(jnp.float32).reshape(1, Cout)
    ext = extra.reshape(-1, Cout) if extra is not None else None
    out2d = conv_mm(patches, wf, bf, ext, mode)
    return out2d.reshape(N, T, H, W, Cout)


def gap_conv1d(feat, w1d, b1d):
    """AdaptiveAvgPool3d((T,1,1)) + squeeze + Conv1d(bf->1,k=3,pad=1), plain JAX.
    feat: (N,T,H,W,C) -> (N,1,T)."""
    N, T, H, W, C = feat.shape
    f = jnp.mean(feat.astype(jnp.float32), axis=(2, 3))              # (N,T,C)
    fp = jnp.pad(f, ((0, 0), (1, 1), (0, 0)))
    taps = jnp.stack([fp[:, s:s + T, :] for s in range(3)], axis=2)  # (N,T,3,C)
    out = jnp.einsum('ntsc,sco->nto', taps,
                     w1d.astype(jnp.float32)) + b1d.astype(jnp.float32)
    return jnp.transpose(out, (0, 2, 1))                             # (N,1,T)


# ----------------------------------------------------------------------------
# Expert forward
# ----------------------------------------------------------------------------
def expert_forward(x_ncdhw, p):
    # PyTorch NCDHW -> channels-last (N, T, H, W, C), bf16 feature maps.
    x = jnp.transpose(x_ncdhw, (0, 2, 3, 4, 1)).astype(jnp.bfloat16)

    # conv1: Conv3d(64 -> bf) + ReLU
    feat = conv3d(x, *p["conv1"], mode="relu")

    # res1: x + conv2(relu(conv1(x)))   (residual add fused into conv2 epilogue)
    h = conv3d(feat, *p["res1a"], mode="relu")
    feat = conv3d(h, *p["res1b"], mode="residual", extra=feat)

    # ra: x * sigmoid(conv2(relu(conv1(x)))) + x  (gate fused into conv2 epilogue)
    h = conv3d(feat, *p["ra_a"], mode="relu")
    feat = conv3d(h, *p["ra_b"], mode="ra", extra=feat)

    # res2
    h = conv3d(feat, *p["res2a"], mode="relu")
    feat = conv3d(h, *p["res2b"], mode="residual", extra=feat)

    # gap -> squeeze -> conv1d  (tiny: plain JAX)
    return gap_conv1d(feat, *p["cov1d"])              # (N, 1, T) == PyTorch output


# ----------------------------------------------------------------------------
# Deterministic parameter init (synthetic; shapes follow Expert.__init__)
# ----------------------------------------------------------------------------
def init_params(key, base_filter):
    keys = jax.random.split(key, 8)

    def conv3_params(k, cin, cout):
        kw, kb = jax.random.split(k)
        scale = 1.0 / np.sqrt(cin * 27)
        w = jax.random.normal(kw, (27, cin, cout), jnp.float32) * scale
        b = jax.random.normal(kb, (cout,), jnp.float32) * scale
        return w, b

    bf = base_filter
    p = {
        "conv1": conv3_params(keys[0], 64, bf),
        "res1a": conv3_params(keys[1], bf, bf),
        "res1b": conv3_params(keys[2], bf, bf),
        "ra_a": conv3_params(keys[3], bf, bf),
        "ra_b": conv3_params(keys[4], bf, bf),
        "res2a": conv3_params(keys[5], bf, bf),
        "res2b": conv3_params(keys[6], bf, bf),
    }
    kw, kb = jax.random.split(keys[7])
    s = 1.0 / np.sqrt(bf * 3)
    p["cov1d"] = (jax.random.normal(kw, (3, bf, 1), jnp.float32) * s,
                  jax.random.normal(kb, (1,), jnp.float32) * s)
    return p


# ----------------------------------------------------------------------------
if __name__ == "__main__":
    base_filter = 16
    video_length = 4
    N, Cin, T, H, W = 2, 64, video_length, 8, 8   # Conv3d in_channels fixed to 64

    key = jax.random.PRNGKey(0)
    pkey, xkey = jax.random.split(key)
    params = init_params(pkey, base_filter)
    x = jax.random.normal(xkey, (N, Cin, T, H, W), jnp.float32)

    fwd = jax.jit(expert_forward)
    out = jax.block_until_ready(fwd(x, params))

    assert out.shape == (N, 1, T), out.shape
    assert bool(jnp.all(jnp.isfinite(out)))
    print("KERNEL_OK")
</pallas_src>

<mosaic_0001>
module attributes {stable_mosaic.version = 11 : i64} {
  func.func @kernel(%arg0: i32, %arg1: memref<256x1728xbf16, #tpu.memory_space<vmem>>, %arg2: memref<1728x16xbf16, #tpu.memory_space<vmem>>, %arg3: memref<1x16xf32, #tpu.memory_space<vmem>>, %arg4: memref<256x16xbf16, #tpu.memory_space<vmem>>) attributes {dimension_semantics = [#tpu.dimension_semantics<parallel>], iteration_bounds = array<i64: 2>, scalar_prefetch = 0 : i64, scratch_operands = 0 : i64, tpu.core_type = #tpu.core_type<tc>, window_params = [{transform_indices = @transform_0, window_bounds = array<i64: 256, 1728>}, {pipeline_mode = #tpu.pipeline_mode<synchronous>, transform_indices = @transform_1, window_bounds = array<i64: 1728, 16>}, {pipeline_mode = #tpu.pipeline_mode<synchronous>, transform_indices = @transform_2, window_bounds = array<i64: 1, 16>}, {transform_indices = @transform_3, window_bounds = array<i64: 256, 16>}]} {
    %c0 = arith.constant 0 : index
    %c0_0 = arith.constant 0 : index
    %0 = vector.load %arg1[%c0, %c0_0] : memref<256x1728xbf16, #tpu.memory_space<vmem>>, vector<256x1728xbf16>
    %c0_1 = arith.constant 0 : index
    %c0_2 = arith.constant 0 : index
    %1 = vector.load %arg2[%c0_1, %c0_2] : memref<1728x16xbf16, #tpu.memory_space<vmem>>, vector<1728x16xbf16>
    %cst = arith.constant dense<0.000000e+00> : vector<256x16xf32>
    %2 = tpu.matmul %0, %1, %cst {dimension_numbers = #tpu.dot_dimension_numbers<[1], [0], [0], [1], [0, 0, 1, 1], [], []>} : vector<256x1728xbf16>, vector<1728x16xbf16>, vector<256x16xf32> -> vector<256x16xf32>
    %c0_3 = arith.constant 0 : index
    %c0_4 = arith.constant 0 : index
    %3 = vector.load %arg3[%c0_3, %c0_4] : memref<1x16xf32, #tpu.memory_space<vmem>>, vector<1x16xf32>
    %4 = vector.broadcast %3 : vector<1x16xf32> to vector<256x16xf32>
    %5 = arith.addf %2, %4 : vector<256x16xf32>
    %cst_5 = arith.constant 0.000000e+00 : f32
    %6 = vector.broadcast %cst_5 : f32 to vector<256x16xf32>
    %7 = arith.maximumf %5, %6 : vector<256x16xf32>
    %8 = arith.truncf %7 : vector<256x16xf32> to vector<256x16xbf16>
    %c0_6 = arith.constant 0 : index
    %c0_7 = arith.constant 0 : index
    %9 = vector.load %arg4[%c0_6, %c0_7] : memref<256x16xbf16, #tpu.memory_space<vmem>>, vector<256x16xbf16>
    tpu.vector_store %arg4[%c0_6, %c0_7], %8 {strides = array<i32>} : memref<256x16xbf16, #tpu.memory_space<vmem>>, vector<256x16xbf16>,
    return
  }
  func.func @transform_0(%arg0: i32) -> (i32, i32) {
    %c0_i32 = arith.constant 0 : i32
    %c0_i32_0 = arith.constant 0 : i32
    return %arg0, %c0_i32 : i32, i32
  }
  func.func @transform_1(%arg0: i32) -> (i32, i32) {
    %c0_i32 = arith.constant 0 : i32
    %c0_i32_0 = arith.constant 0 : i32
    %c0_i32_1 = arith.constant 0 : i32
    return %c0_i32, %c0_i32_0 : i32, i32
  }
  func.func @transform_2(%arg0: i32) -> (i32, i32) {
    %c0_i32 = arith.constant 0 : i32
    %c0_i32_0 = arith.constant 0 : i32
    %c0_i32_1 = arith.constant 0 : i32
    return %c0_i32, %c0_i32_0 : i32, i32
  }
  func.func @transform_3(%arg0: i32) -> (i32, i32) {
    %c0_i32 = arith.constant 0 : i32
    %c0_i32_0 = arith.constant 0 : i32
    return %arg0, %c0_i32 : i32, i32
  }
}

module attributes {stable_mosaic.version = 11 : i64} {
  func.func @kernel(%arg0: i32, %arg1: memref<256x432xbf16, #tpu.memory_space<vmem>>, %arg2: memref<432x16xbf16, #tpu.memory_space<vmem>>, %arg3: memref<1x16xf32, #tpu.memory_space<vmem>>, %arg4: memref<256x16xbf16, #tpu.memory_space<vmem>>) attributes {dimension_semantics = [#tpu.dimension_semantics<parallel>], iteration_bounds = array<i64: 2>, scalar_prefetch = 0 : i64, scratch_operands = 0 : i64, tpu.core_type = #tpu.core_type<tc>, window_params = [{transform_indices = @transform_0, window_bounds = array<i64: 256, 432>}, {pipeline_mode = #tpu.pipeline_mode<synchronous>, transform_indices = @transform_1, window_bounds = array<i64: 432, 16>}, {pipeline_mode = #tpu.pipeline_mode<synchronous>, transform_indices = @transform_2, window_bounds = array<i64: 1, 16>}, {transform_indices = @transform_3, window_bounds = array<i64: 256, 16>}]} {
    %c0 = arith.constant 0 : index
    %c0_0 = arith.constant 0 : index
    %0 = vector.load %arg1[%c0, %c0_0] : memref<256x432xbf16, #tpu.memory_space<vmem>>, vector<256x432xbf16>
    %c0_1 = arith.constant 0 : index
    %c0_2 = arith.constant 0 : index
    %1 = vector.load %arg2[%c0_1, %c0_2] : memref<432x16xbf16, #tpu.memory_space<vmem>>, vector<432x16xbf16>
    %cst = arith.constant dense<0.000000e+00> : vector<256x16xf32>
    %2 = tpu.matmul %0, %1, %cst {dimension_numbers = #tpu.dot_dimension_numbers<[1], [0], [0], [1], [0, 0, 1, 1], [], []>} : vector<256x432xbf16>, vector<432x16xbf16>, vector<256x16xf32> -> vector<256x16xf32>
    %c0_3 = arith.constant 0 : index
    %c0_4 = arith.constant 0 : index
    %3 = vector.load %arg3[%c0_3, %c0_4] : memref<1x16xf32, #tpu.memory_space<vmem>>, vector<1x16xf32>
    %4 = vector.broadcast %3 : vector<1x16xf32> to vector<256x16xf32>
    %5 = arith.addf %2, %4 : vector<256x16xf32>
    %cst_5 = arith.constant 0.000000e+00 : f32
    %6 = vector.broadcast %cst_5 : f32 to vector<256x16xf32>
    %7 = arith.maximumf %5, %6 : vector<256x16xf32>
    %8 = arith.truncf %7 : vector<256x16xf32> to vector<256x16xbf16>
    %c0_6 = arith.constant 0 : index
    %c0_7 = arith.constant 0 : index
    %9 = vector.load %arg4[%c0_6, %c0_7] : memref<256x16xbf16, #tpu.memory_space<vmem>>, vector<256x16xbf16>
    tpu.vector_store %arg4[%c0_6, %c0_7], %8 {strides = array<i32>} : memref<256x16xbf16, #tpu.memory_space<vmem>>, vector<256x16xbf16>,
    return
  }
  func.func @transform_0(%arg0: i32) -> (i32, i32) {
    %c0_i32 = arith.constant 0 : i32
    %c0_i32_0 = arith.constant 0 : i32
    return %arg0, %c0_i32 : i32, i32
  }
  func.func @transform_1(%arg0: i32) -> (i32, i32) {
    %c0_i32 = arith.constant 0 : i32
    %c0_i32_0 = arith.constant 0 : i32
    %c0_i32_1 = arith.constant 0 : i32
    return %c0_i32, %c0_i32_0 : i32, i32
  }
  func.func @transform_2(%arg0: i32) -> (i32, i32) {
    %c0_i32 = arith.constant 0 : i32
    %c0_i32_0 = arith.constant 0 : i32
    %c0_i32_1 = arith.constant 0 : i32
    return %c0_i32, %c0_i32_0 : i32, i32
  }
  func.func @transform_3(%arg0: i32) -> (i32, i32) {
    %c0_i32 = arith.constant 0 : i32
    %c0_i32_0 = arith.constant 0 : i32
    return %arg0, %c0_i32 : i32, i32
  }
}

module attributes {stable_mosaic.version = 11 : i64} {
  func.func @kernel(%arg0: i32, %arg1: memref<256x432xbf16, #tpu.memory_space<vmem>>, %arg2: memref<432x16xbf16, #tpu.memory_space<vmem>>, %arg3: memref<1x16xf32, #tpu.memory_space<vmem>>, %arg4: memref<256x16xbf16, #tpu.memory_space<vmem>>, %arg5: memref<256x16xbf16, #tpu.memory_space<vmem>>) attributes {dimension_semantics = [#tpu.dimension_semantics<parallel>], iteration_bounds = array<i64: 2>, scalar_prefetch = 0 : i64, scratch_operands = 0 : i64, tpu.core_type = #tpu.core_type<tc>, window_params = [{transform_indices = @transform_0, window_bounds = array<i64: 256, 432>}, {pipeline_mode = #tpu.pipeline_mode<synchronous>, transform_indices = @transform_1, window_bounds = array<i64: 432, 16>}, {pipeline_mode = #tpu.pipeline_mode<synchronous>, transform_indices = @transform_2, window_bounds = array<i64: 1, 16>}, {transform_indices = @transform_3, window_bounds = array<i64: 256, 16>}, {transform_indices = @transform_4, window_bounds = array<i64: 256, 16>}]} {
    %c0 = arith.constant 0 : index
    %c0_0 = arith.constant 0 : index
    %0 = vector.load %arg1[%c0, %c0_0] : memref<256x432xbf16, #tpu.memory_space<vmem>>, vector<256x432xbf16>
    %c0_1 = arith.constant 0 : index
    %c0_2 = arith.constant 0 : index
    %1 = vector.load %arg2[%c0_1, %c0_2] : memref<432x16xbf16, #tpu.memory_space<vmem>>, vector<432x16xbf16>
    %cst = arith.constant dense<0.000000e+00> : vector<256x16xf32>
    %2 = tpu.matmul %0, %1, %cst {dimension_numbers = #tpu.dot_dimension_numbers<[1], [0], [0], [1], [0, 0, 1, 1], [], []>} : vector<256x432xbf16>, vector<432x16xbf16>, vector<256x16xf32> -> vector<256x16xf32>
    %c0_3 = arith.constant 0 : index
    %c0_4 = arith.constant 0 : index
    %3 = vector.load %arg3[%c0_3, %c0_4] : memref<1x16xf32, #tpu.memory_space<vmem>>, vector<1x16xf32>
    %4 = vector.broadcast %3 : vector<1x16xf32> to vector<256x16xf32>
    %5 = arith.addf %2, %4 : vector<256x16xf32>
    %c0_5 = arith.constant 0 : index
    %c0_6 = arith.constant 0 : index
    %6 = vector.load %arg4[%c0_5, %c0_6] : memref<256x16xbf16, #tpu.memory_space<vmem>>, vector<256x16xbf16>
    %7 = arith.extf %6 : vector<256x16xbf16> to vector<256x16xf32>
    %8 = arith.addf %7, %5 : vector<256x16xf32>
    %9 = arith.truncf %8 : vector<256x16xf32> to vector<256x16xbf16>
    %c0_7 = arith.constant 0 : index
    %c0_8 = arith.constant 0 : index
    %10 = vector.load %arg5[%c0_7, %c0_8] : memref<256x16xbf16, #tpu.memory_space<vmem>>, vector<256x16xbf16>
    tpu.vector_store %arg5[%c0_7, %c0_8], %9 {strides = array<i32>} : memref<256x16xbf16, #tpu.memory_space<vmem>>, vector<256x16xbf16>,
    return
  }
  func.func @transform_0(%arg0: i32) -> (i32, i32) {
    %c0_i32 = arith.constant 0 : i32
    %c0_i32_0 = arith.constant 0 : i32
    return %arg0, %c0_i32 : i32, i32
  }
  func.func @transform_1(%arg0: i32) -> (i32, i32) {
    %c0_i32 = arith.constant 0 : i32
    %c0_i32_0 = arith.constant 0 : i32
    %c0_i32_1 = arith.constant 0 : i32
    return %c0_i32, %c0_i32_0 : i32, i32
  }
  func.func @transform_2(%arg0: i32) -> (i32, i32) {
    %c0_i32 = arith.constant 0 : i32
    %c0_i32_0 = arith.constant 0 : i32
    %c0_i32_1 = arith.constant 0 : i32
    return %c0_i32, %c0_i32_0 : i32, i32
  }
  func.func @transform_3(%arg0: i32) -> (i32, i32) {
    %c0_i32 = arith.constant 0 : i32
    %c0_i32_0 = arith.constant 0 : i32
    return %arg0, %c0_i32 : i32, i32
  }
  func.func @transform_4(%arg0: i32) -> (i32, i32) {
    %c0_i32 = arith.constant 0 : i32
    %c0_i32_0 = arith.constant 0 : i32
    return %arg0, %c0_i32 : i32, i32
  }
}

module attributes {stable_mosaic.version = 11 : i64} {
  func.func @kernel(%arg0: i32, %arg1: memref<256x432xbf16, #tpu.memory_space<vmem>>, %arg2: memref<432x16xbf16, #tpu.memory_space<vmem>>, %arg3: memref<1x16xf32, #tpu.memory_space<vmem>>, %arg4: memref<256x16xbf16, #tpu.memory_space<vmem>>, %arg5: memref<256x16xbf16, #tpu.memory_space<vmem>>) attributes {dimension_semantics = [#tpu.dimension_semantics<parallel>], iteration_bounds = array<i64: 2>, scalar_prefetch = 0 : i64, scratch_operands = 0 : i64, tpu.core_type = #tpu.core_type<tc>, window_params = [{transform_indices = @transform_0, window_bounds = array<i64: 256, 432>}, {pipeline_mode = #tpu.pipeline_mode<synchronous>, transform_indices = @transform_1, window_bounds = array<i64: 432, 16>}, {pipeline_mode = #tpu.pipeline_mode<synchronous>, transform_indices = @transform_2, window_bounds = array<i64: 1, 16>}, {transform_indices = @transform_3, window_bounds = array<i64: 256, 16>}, {transform_indices = @transform_4, window_bounds = array<i64: 256, 16>}]} {
    %c0 = arith.constant 0 : index
    %c0_0 = arith.constant 0 : index
    %0 = vector.load %arg1[%c0, %c0_0] : memref<256x432xbf16, #tpu.memory_space<vmem>>, vector<256x432xbf16>
    %c0_1 = arith.constant 0 : index
    %c0_2 = arith.constant 0 : index
    %1 = vector.load %arg2[%c0_1, %c0_2] : memref<432x16xbf16, #tpu.memory_space<vmem>>, vector<432x16xbf16>
    %cst = arith.constant dense<0.000000e+00> : vector<256x16xf32>
    %2 = tpu.matmul %0, %1, %cst {dimension_numbers = #tpu.dot_dimension_numbers<[1], [0], [0], [1], [0, 0, 1, 1], [], []>} : vector<256x432xbf16>, vector<432x16xbf16>, vector<256x16xf32> -> vector<256x16xf32>
    %c0_3 = arith.constant 0 : index
    %c0_4 = arith.constant 0 : index
    %3 = vector.load %arg3[%c0_3, %c0_4] : memref<1x16xf32, #tpu.memory_space<vmem>>, vector<1x16xf32>
    %4 = vector.broadcast %3 : vector<1x16xf32> to vector<256x16xf32>
    %5 = arith.addf %2, %4 : vector<256x16xf32>
    %c0_5 = arith.constant 0 : index
    %c0_6 = arith.constant 0 : index
    %6 = vector.load %arg4[%c0_5, %c0_6] : memref<256x16xbf16, #tpu.memory_space<vmem>>, vector<256x16xbf16>
    %7 = arith.extf %6 : vector<256x16xbf16> to vector<256x16xf32>
    %8 = arith.negf %5 : vector<256x16xf32>
    %9 = math.exp %8 : vector<256x16xf32>
    %cst_7 = arith.constant 1.000000e+00 : f32
    %10 = vector.broadcast %cst_7 : f32 to vector<256x16xf32>
    %11 = arith.addf %10, %9 : vector<256x16xf32>
    %12 = arith.divf %10, %11 : vector<256x16xf32>
    %13 = arith.mulf %7, %12 : vector<256x16xf32>
    %14 = arith.addf %13, %7 : vector<256x16xf32>
    %15 = arith.truncf %14 : vector<256x16xf32> to vector<256x16xbf16>
    %c0_8 = arith.constant 0 : index
    %c0_9 = arith.constant 0 : index
    %16 = vector.load %arg5[%c0_8, %c0_9] : memref<256x16xbf16, #tpu.memory_space<vmem>>, vector<256x16xbf16>
    tpu.vector_store %arg5[%c0_8, %c0_9], %15 {strides = array<i32>} : memref<256x16xbf16, #tpu.memory_space<vmem>>, vector<256x16xbf16>,
    return
  }
  func.func @transform_0(%arg0: i32) -> (i32, i32) {
    %c0_i32 = arith.constant 0 : i32
    %c0_i32_0 = arith.constant 0 : i32
    return %arg0, %c0_i32 : i32, i32
  }
  func.func @transform_1(%arg0: i32) -> (i32, i32) {
    %c0_i32 = arith.constant 0 : i32
    %c0_i32_0 = arith.constant 0 : i32
    %c0_i32_1 = arith.constant 0 : i32
    return %c0_i32, %c0_i32_0 : i32, i32
  }
  func.func @transform_2(%arg0: i32) -> (i32, i32) {
    %c0_i32 = arith.constant 0 : i32
    %c0_i32_0 = arith.constant 0 : i32
    %c0_i32_1 = arith.constant 0 : i32
    return %c0_i32, %c0_i32_0 : i32, i32
  }
  func.func @transform_3(%arg0: i32) -> (i32, i32) {
    %c0_i32 = arith.constant 0 : i32
    %c0_i32_0 = arith.constant 0 : i32
    return %arg0, %c0_i32 : i32, i32
  }
  func.func @transform_4(%arg0: i32) -> (i32, i32) {
    %c0_i32 = arith.constant 0 : i32
    %c0_i32_0 = arith.constant 0 : i32
    return %arg0, %c0_i32 : i32, i32
  }
}

</mosaic_0001>

<bundles_post_ra>
// kernel: expert_forward.7
= control target key start
LH: loop header
LB: loop body
LE: loop exit
PB: predicated region body
PF: predicated region fallthrough
CT: control target
= control target key end

     0   :  { %s5397_s12 = smov 0   ;;  %s6387_s0 = inlined_call_operand.vmem [shape: bf16[512,1728], index: 0, kind: input, shape index: {}]   ;;  %s6388_s1 = inlined_call_operand.vmem [shape: bf16[1728,16], index: 1, kind: input, shape index: {}]   ;;  %s6389_s2 = inlined_call_operand.vmem [shape: f32[1,16], index: 2, kind: input, shape index: {}]   ;;  %s6390_s3 = inlined_call_operand.vmem [shape: bf16[512,16], index: 3, kind: output, shape index: {}]  }
   0x1 LB: > { %s3802_s13 = sadd.s32 4294967295, %s5374_s12   ;;  %p3806_p0 = scmp.ge.s32.totalorder %s5374_s12, 1  ;;  %s5374_s12 = sphi %s5397_s12, %s13_s12  }
   0x2   : > { %p139_p1 = scmp.lt.s32.totalorder %s5374_s12, 3 }
   0x4   : > { %p140_p2 = pnand %p3806_p0, %p139_p1 }
   0x5   : > { %v4924_v0 = vld [vmem:[%s6388_s1 + $0x40] sm:$0xff] (!%p140_p2)   ;;  %s3807_s16 = sshll.u32 (!%p140_p2), %s3802_s13, 5  ;;  %v4926_v2 = vld [vmem:[%s6388_s1 + $0x48] sm:$0xff] (!%p140_p2)   ;;  %v4928_v4 = vld [vmem:[%s6388_s1 + $0x50] sm:$0xff] (!%p140_p2)   ;;  %vm2377_vm0 = vcmask (!%p140_p2), 523264   ;;  %vm3713_vm1 = vcmask (!%p140_p2), 125952  }
   0x6   : > { %143 = sbr.rel (%p140_p2) target bundleno = 704 (0x2c0), region = 32  ;;  %v4925_v1 = vld [vmem:[%s6388_s1] sm:$0xff] (!%p140_p2)   ;;  %4898 = vmatprep.subr.bf16.mxu1 (!%p140_p2), %v4924_v0  ;;  %4226 = vmatprep.subr.bf16.mxu0 (!%p140_p2), %v4924_v0  ;;  %p165_p3 = scmp.lt.s32.totalorder (!%p140_p2), %s3807_s16, 63  ;;  %v4927_v3 = vld [vmem:[%s6388_s1 + $0x8] sm:$0xff] (!%p140_p2)   ;;  %v4929_v5 = vld [vmem:[%s6388_s1 + $0x10] sm:$0xff] (!%p140_p2)  }
   0x7   : > { %4906 = vmatpush3.bf16.msra.mxu1 (!%p140_p2), %v4925_v1  ;;  %4227 = vmatpush3.bf16.msra.mxu0 (!%p140_p2), %v4925_v1  ;;  %v4930_v6 = vld [vmem:[%s6388_s1 + $0x58] sm:$0xff] (!%p140_p2)   ;;  %v4932_v8 = vld [vmem:[%s6388_s1 + $0x60] sm:$0xff] (!%p140_p2)   ;;  %v4934_v10 = vld [vmem:[%s6388_s1 + $0x68] sm:$0xff] (!%p140_p2)  }
   0x8   : > { %4899 = vmatprep.subr.bf16.mxu1 (!%p140_p2), %v4926_v2  ;;  %4228 = vmatprep.subr.bf16.mxu0 (!%p140_p2), %v4926_v2  ;;  %v4931_v7 = vld [vmem:[%s6388_s1 + $0x18] sm:$0xff] (!%p140_p2)   ;;  %v4933_v9 = vld [vmem:[%s6388_s1 + $0x20] sm:$0xff] (!%p140_p2)   ;;  %v4935_v12 = vld [vmem:[%s6388_s1 + $0x28] sm:$0xff] (!%p140_p2)  }
   0x9   : > { %v4936_v14 = vld [vmem:[%s6388_s1 + $0x70] sm:$0xff] (!%p140_p2)   ;;  %v4938_v16 = vld [vmem:[%s6388_s1 + $0x78] sm:$0xff] (!%p140_p2)   ;;  %v4943_v18 = vld [vmem:[%s6388_s1 + $0xc0] sm:$0xff] (!%p140_p2)  }
   0xa   : > { %v4937_v15 = vld [vmem:[%s6388_s1 + $0x30] sm:$0xff] (!%p140_p2)   ;;  %v4939_v17 = vld [vmem:[%s6388_s1 + $0x38] sm:$0xff] (!%p140_p2)   ;;  %v4948_v21 = vld [vmem:[%s6388_s1 + $0x140] sm:$0xff] (!%p140_p2)  }
   0xb   : > { %4907 = vmatpush3.bf16.msra.mxu1 (!%p140_p2), %v4927_v3  ;;  %4229 = vmatpush3.bf16.msra.mxu0 (!%p140_p2), %v4927_v3  ;;  %v4947_v22 = vld [vmem:[%s6388_s1 + $0x80] sm:$0xff] (!%p140_p2)   ;;  %v4953_v25 = vld [vmem:[%s6388_s1 + $0xc8] sm:$0xff] (!%p140_p2)   ;;  %v4963_v30 = vld [vmem:[%s6388_s1 + $0xd0] sm:$0xff] (!%p140_p2)  }
   0xc   : > { %4900 = vmatprep.subr.bf16.mxu1 (!%p140_p2), %v4928_v4  ;;  %4230 = vmatprep.subr.bf16.mxu0 (!%p140_p2), %v4928_v4  ;;  %v4949_v23 = vld [vmem:[%s6388_s1 + $0x100] sm:$0xff] (!%p140_p2)   ;;  %v4956_v27 = vld [vmem:[%s6388_s1 + $0x88] sm:$0xff] (!%p140_p2)   ;;  %v4968_v33 = vld [vmem:[%s6388_s1 + $0x150] sm:$0xff] (!%p140_p2)  }
   0xd   : > { %s6392_s16 = smov (!%p165_p3, %s3807_s16), 63  ;;  %v4958_v28 = vld [vmem:[%s6388_s1 + $0x148] sm:$0xff]   ;;  %v4966_v36 = vld [vmem:[%s6388_s1 + $0x90] sm:$0xff]   ;;  %v4973_v38 = vld [vmem:[%s6388_s1 + $0xd8] sm:$0xff]  }
   0xe   : > { %s4914_s29 = smul.u32 56, %s6392_s16  ;;  %v4959_v29 = vld [vmem:[%s6388_s1 + $0x108] sm:$0xff]   ;;  %v4969_v37 = vld [vmem:[%s6388_s1 + $0x110] sm:$0xff]   ;;  %v4978_v39 = vld [vmem:[%s6388_s1 + $0x158] sm:$0xff]  }
   0xf   : > { %4908 = vmatpush3.bf16.msra.mxu1 %v4929_v5  ;;  %4231 = vmatpush3.bf16.msra.mxu0 %v4929_v5  ;;  %v4976_v40 = vld [vmem:[%s6388_s1 + $0x98] sm:$0xff]   ;;  %v4983_v45 = vld [vmem:[%s6388_s1 + $0xe0] sm:$0xff]   ;;  %v4993_v50 = vld [vmem:[%s6388_s1 + $0xe8] sm:$0xff]  }
  0x10   : > { %4901 = vmatprep.subr.bf16.mxu1 %v4930_v6  ;;  %4232 = vmatprep.subr.bf16.mxu0 %v4930_v6  ;;  %s5438_s9 = scalar_lea.vmem %s6387_s0, %s4914_s29  ;;  %v4979_v43 = vld [vmem:[%s6388_s1 + $0x118] sm:$0xff]   ;;  %v4986_v47 = vld [vmem:[%s6388_s1 + $0xa0] sm:$0xff]   ;;  %v4996_v55 = vld [vmem:[%s6388_s1 + $0xa8] sm:$0xff]  }
  0x11   : > { %v4942_v11 = vld [vmem:[%s5438_s9 + $0x384] ss:$56 sps:$4 sm:$0xff]   ;;  %v4940_v19 = vld [vmem:[%s5438_s9 + $0x380] ss:$56 sps:$4 sm:$0xff]   ;;  %v4950_v24 = vld [vmem:[%s5438_s9 + $0x3f4] ss:$56 sps:$4 sm:$0xff]  }
  0x12   : > { %v4946_v13 = vld [vmem:[%s5438_s9 + $0x4] ss:$56 sps:$4 sm:$0xff]   ;;  %2522 = vmatprep.mubr.bf16.mxu1 %v4942_v11  ;;  %v4944_v20 = vld [vmem:[%s5438_s9] ss:$56 sps:$4 sm:$0xff]   ;;  %v4954_v26 = vld [vmem:[%s5438_s9 + $0x74] ss:$56 sps:$4 sm:$0xff]  }
  0x13   : > { %4909 = vmatpush3.bf16.msra.mxu1 %v4931_v7  ;;  %4233 = vmatpush3.bf16.msra.mxu0 %v4931_v7  ;;  %v4952_v31 = vld [vmem:[%s5438_s9 + $0x3f0] ss:$56 sps:$4 sm:$0xff]   ;;  %v4960_v34 = vld [vmem:[%s5438_s9 + $0x464] ss:$56 sps:$4 sm:$0xff]   ;;  %v4962_v41 = vld [vmem:[%s5438_s9 + $0x460] ss:$56 sps:$4 sm:$0xff]  }
  0x14   : > { %4902 = vmatprep.subr.bf16.mxu1 %v4932_v8  ;;  %4234 = vmatprep.subr.bf16.mxu0 %v4932_v8  ;;  %v4957_v32 = vld [vmem:[%s5438_s9 + $0x70] ss:$56 sps:$4 sm:$0xff]   ;;  %v4964_v35 = vld [vmem:[%s5438_s9 + $0xe4] ss:$56 sps:$4 sm:$0xff]   ;;  %v4967_v42 = vld [vmem:[%s5438_s9 + $0xe0] ss:$56 sps:$4 sm:$0xff]  }
  0x15   : > { %2458 = vmatprep.mubr.bf16.mxu0 %v4946_v13  ;;  %v4970_v44 = vld [vmem:[%s5438_s9 + $0x4d4] ss:$56 sps:$4 sm:$0xff]   ;;  %v4988_v48 = vld [vmem:[%s6388_s1 + $0x160] sm:$0xff]   ;;  %v4972_v51 = vld [vmem:[%s5438_s9 + $0x4d0] ss:$56 sps:$4 sm:$0xff]  }
  0x16   : > { %v4974_v46 = vld [vmem:[%s5438_s9 + $0x154] ss:$56 sps:$4 sm:$0xff]   ;;  %v4989_v49 = vld [vmem:[%s6388_s1 + $0x120] sm:$0xff]   ;;  %v4977_v52 = vld [vmem:[%s5438_s9 + $0x150] ss:$56 sps:$4 sm:$0xff]  }
  0x17   : > { %4910 = vmatpush3.bf16.msra.mxu1 %v4933_v9  ;;  %4235 = vmatpush3.bf16.msra.mxu0 %v4933_v9  ;;  %v4980_v53 = vld [vmem:[%s5438_s9 + $0x544] ss:$56 sps:$4 sm:$0xff]   ;;  %v4998_v56 = vld [vmem:[%s6388_s1 + $0x168] sm:$0xff]   ;;  %v5003_v58 = vld [vmem:[%s6388_s1 + $0xf0] sm:$0xff]  }
  0x18   : > { %4903 = vmatprep.subr.bf16.mxu1 %v4934_v10  ;;  %4236 = vmatprep.subr.bf16.mxu0 %v4934_v10  ;;  %v4984_v54 = vld [vmem:[%s5438_s9 + $0x1c4] ss:$56 sps:$4 sm:$0xff]   ;;  %v4999_v57 = vld [vmem:[%s6388_s1 + $0x128] sm:$0xff]   ;;  %v4982_v59 = vld [vmem:[%s5438_s9 + $0x540] ss:$56 sps:$4 sm:$0xff]  }
  0x19   : > { %v4987_v60 = vld [vmem:[%s5438_s9 + $0x1c0] ss:$56 sps:$4 sm:$0xff]   ;;  %v5006_v61 = vld [vmem:[%s6388_s1 + $0xb0] sm:$0xff]   ;;  %v5000_v8 = vld [vmem:[%s5438_s9 + $0x624] ss:$56 sps:$4 sm:$0xff]  }
  0x1a   : > { %v5008_v62 = vld [vmem:[%s6388_s1 + $0x170] sm:$0xff]   ;;  %v5013_v2 = vld [vmem:[%s6388_s1 + $0xf8] sm:$0xff]   ;;  %v5023_v10 = vld [vmem:[%s6388_s1 + $0x1c0] sm:$0xff]  }
  0x1b   : > { %4911 = vmatpush3.bf16.msra.mxu1 %v4935_v12  ;;  %4237 = vmatpush3.bf16.msra.mxu0 %v4935_v12  ;;  %v5009_v63 = vld [vmem:[%s6388_s1 + $0x130] sm:$0xff]   ;;  %v5016_v3 = vld [vmem:[%s6388_s1 + $0xb8] sm:$0xff]   ;;  %v5028_v11 = vld [vmem:[%s6388_s1 + $0x240] sm:$0xff]  }
  0x1c   : > { %4904 = vmatprep.subr.bf16.mxu1 %v4936_v14  ;;  %4238 = vmatprep.subr.bf16.mxu0 %v4936_v14  ;;  %v4990_v0 = vld [vmem:[%s5438_s9 + $0x5b4] ss:$56 sps:$4 sm:$0xff]   ;;  %v4992_v4 = vld [vmem:[%s5438_s9 + $0x5b0] ss:$56 sps:$4 sm:$0xff]   ;;  %v5018_v6 = vld [vmem:[%s6388_s1 + $0x178] sm:$0xff]  }
  0x1d   : > { %v4994_v1 = vld [vmem:[%s5438_s9 + $0x234] ss:$56 sps:$4 sm:$0xff]   ;;  %v4997_v5 = vld [vmem:[%s5438_s9 + $0x230] ss:$56 sps:$4 sm:$0xff]   ;;  %v5019_v7 = vld [vmem:[%s6388_s1 + $0x138] sm:$0xff]  }
  0x1e   : > { %v5004_v9 = vld [vmem:[%s5438_s9 + $0x2a4] ss:$56 sps:$4 sm:$0xff]   ;;  %v5002_v12 = vld [vmem:[%s5438_s9 + $0x620] ss:$56 sps:$4 sm:$0xff]   ;;  %v5010_v14 = vld [vmem:[%s5438_s9 + $0x694] ss:$56 sps:$4 sm:$0xff]  }
  0x1f   : > { %4912 = vmatpush3.bf16.msra.mxu1 %v4937_v15  ;;  %4239 = vmatpush3.bf16.msra.mxu0 %v4937_v15  ;;  %v5007_v13 = vld [vmem:[%s5438_s9 + $0x2a0] ss:$56 sps:$4 sm:$0xff]   ;;  %v5014_v15 = vld [vmem:[%s5438_s9 + $0x314] ss:$56 sps:$4 sm:$0xff]  }
  0x20   : > { %4905 = vmatprep.subr.bf16.mxu1 %v4938_v16  ;;  %4240 = vmatprep.subr.bf16.mxu0 %v4938_v16  ;;  %v5012_v16 = vld [vmem:[%s5438_s9 + $0x690] ss:$56 sps:$4 sm:$0xff]  }
  0x23   : > { %4913 = vmatpush3.bf16.msra.mxu1 %v4939_v17  ;;  %4241 = vmatpush3.bf16.msra.mxu0 %v4939_v17  ;;  %v5017_v17 = vld [vmem:[%s5438_s9 + $0x310] ss:$56 sps:$4 sm:$0xff]  }
  0x24   : > { %4338 = vmatprep.subr.bf16.mxu1 %v4943_v18  ;;  %4450 = vmatprep.subr.bf16.mxu0 %v4948_v21  ;;  %v5022_v18 = vld [vmem:[%s5438_s9 + $0xc] ss:$56 sps:$4 sm:$0xff]   ;;  %v5024_v21 = vld [vmem:[%s5438_s9 + $0x10] ss:$56 sps:$4 sm:$0xff]  }
  0x26   : > { %2523 = vmatmul.mubr.bf16.vlgmr.msra.gmra.mrb[0].mxu1 %v4940_v19  ;;  %2459 = vmatmul.mubr.bf16.vlgmr.msra.gmra.mrb[0].mxu0 %v4944_v20  ;;  %v5026_v19 = vld [vmem:[%s5438_s9 + $0x14] ss:$56 sps:$4 sm:$0xff]   ;;  %v5020_v20 = vld [vmem:[%s5438_s9 + $0x8] ss:$56 sps:$4 sm:$0xff]  }
  0x27   : > { %4339 = vmatpush3.bf16.msra.mxu1 %v4947_v22  ;;  %4451 = vmatpush3.bf16.msra.mxu0 %v4949_v23  ;;  %v5027_v22 = vld [vmem:[%s6388_s1 + $0x180] sm:$0xff]  }
  0x28   : > { %2530 = vmatprep.mubr.bf16.mxu1 %v4950_v24  ;;  %4340 = vmatprep.subr.bf16.mxu1 %v4953_v25  ;;  %v5029_v23 = vld [vmem:[%s6388_s1 + $0x200] sm:$0xff]   ;;  %v5030_v24 = vld [vmem:[%s5438_s9 + $0x7c] ss:$56 sps:$4 sm:$0xff]  }
  0x29   : > { %2466 = vmatprep.mubr.bf16.mxu0 %v4954_v26  ;;  %4452 = vmatprep.subr.bf16.mxu0 %v4958_v28  ;;  %v5033_v25 = vld [vmem:[%s5438_s9 + $0x84] ss:$56 sps:$4 sm:$0xff]   ;;  %v5039_v26 = vld [vmem:[%s6388_s1 + $0x1c8] sm:$0xff]  }
  0x2a   : > { %v5042_v28 = vld [vmem:[%s6388_s1 + $0x188] sm:$0xff]  }
  0x2b   : > { %4341 = vmatpush3.bf16.msra.mxu1 %v4956_v27  ;;  %4453 = vmatpush3.bf16.msra.mxu0 %v4959_v29  ;;  %v5044_v27 = vld [vmem:[%s6388_s1 + $0x248] sm:$0xff]  }
  0x2c   : > { %4342 = vmatprep.subr.bf16.mxu1 %v4963_v30  ;;  %4454 = vmatprep.subr.bf16.mxu0 %v4968_v33  ;;  %v5045_v29 = vld [vmem:[%s6388_s1 + $0x208] sm:$0xff]   ;;  %v5055_v30 = vld [vmem:[%s6388_s1 + $0x1d0] sm:$0xff]  }
  0x2d   : > { %v5060_v33 = vld [vmem:[%s6388_s1 + $0x250] sm:$0xff]  }
  0x2e   : > { %2531 = vmatmul.mubr.bf16.gmra.mrb[4].mxu1 %v4952_v31  ;;  %2467 = vmatmul.mubr.bf16.gmra.mrb[4].mxu0 %v4957_v32  ;;  %v5032_v31 = vld [vmem:[%s5438_s9 + $0x78] ss:$56 sps:$4 sm:$0xff]  }
  0x2f   : > { %2538 = vmatprep.mubr.bf16.mxu1 %v4960_v34  ;;  %2474 = vmatprep.mubr.bf16.mxu0 %v4964_v35  ;;  %v5035_v32 = vld [vmem:[%s5438_s9 + $0x80] ss:$56 sps:$4 sm:$0xff]   ;;  %v5036_v34 = vld [vmem:[%s5438_s9 + $0xec] ss:$56 sps:$4 sm:$0xff]  }
  0x30   : > { %4343 = vmatpush3.bf16.msra.mxu1 %v4966_v36  ;;  %4455 = vmatpush3.bf16.msra.mxu0 %v4969_v37  ;;  %v5040_v35 = vld [vmem:[%s5438_s9 + $0xf4] ss:$56 sps:$4 sm:$0xff]  }
  0x31   : > { %4344 = vmatprep.subr.bf16.mxu1 %v4973_v38  ;;  %4456 = vmatprep.subr.bf16.mxu0 %v4978_v39  ;;  %v5058_v36 = vld [vmem:[%s6388_s1 + $0x190] sm:$0xff]   ;;  %v5071_v38 = vld [vmem:[%s6388_s1 + $0x1d8] sm:$0xff]  }
  0x32   : > { %v5061_v37 = vld [vmem:[%s6388_s1 + $0x210] sm:$0xff]   ;;  %v5076_v39 = vld [vmem:[%s6388_s1 + $0x258] sm:$0xff]  }
  0x34   : > { %4345 = vmatpush3.bf16.msra.mxu1 %v4976_v40  ;;  %4457 = vmatpush3.bf16.msra.mxu0 %v4979_v43  ;;  %v5074_v40 = vld [vmem:[%s6388_s1 + $0x198] sm:$0xff]  }
  0x35   : > { %4346 = vmatprep.subr.bf16.mxu1 %v4983_v45  ;;  %4458 = vmatprep.subr.bf16.mxu0 %v4988_v48  ;;  %v5077_v43 = vld [vmem:[%s6388_s1 + $0x218] sm:$0xff]   ;;  %v5087_v45 = vld [vmem:[%s6388_s1 + $0x1e0] sm:$0xff]  }
  0x36   : > { %2539 = vmatmul.mubr.bf16.gmra.mrb[8].mxu1 %v4962_v41  ;;  %2475 = vmatmul.mubr.bf16.gmra.mrb[8].mxu0 %v4967_v42  ;;  %v5038_v41 = vld [vmem:[%s5438_s9 + $0xe8] ss:$56 sps:$4 sm:$0xff]  }
  0x37   : > { %2546 = vmatprep.mubr.bf16.mxu1 %v4970_v44  ;;  %2482 = vmatprep.mubr.bf16.mxu0 %v4974_v46  ;;  %v5043_v42 = vld [vmem:[%s5438_s9 + $0xf0] ss:$56 sps:$4 sm:$0xff]   ;;  %v5046_v44 = vld [vmem:[%s5438_s9 + $0x15c] ss:$56 sps:$4 sm:$0xff]   ;;  %v5092_v48 = vld [vmem:[%s6388_s1 + $0x260] sm:$0xff]  }
  0x38   : > { %4347 = vmatpush3.bf16.msra.mxu1 %v4986_v47  ;;  %4459 = vmatpush3.bf16.msra.mxu0 %v4989_v49  ;;  %v5049_v46 = vld [vmem:[%s5438_s9 + $0x164] ss:$56 sps:$4 sm:$0xff]  }
  0x39   : > { %4348 = vmatprep.subr.bf16.mxu1 %v4993_v50  ;;  %4460 = vmatprep.subr.bf16.mxu0 %v4998_v56  ;;  %v5090_v47 = vld [vmem:[%s6388_s1 + $0x1a0] sm:$0xff]   ;;  %v5048_v50 = vld [vmem:[%s5438_s9 + $0x158] ss:$56 sps:$4 sm:$0xff]   ;;  %v5108_v56 = vld [vmem:[%s6388_s1 + $0x268] sm:$0xff]  }
  0x3a   : > { %v5093_v49 = vld [vmem:[%s6388_s1 + $0x220] sm:$0xff]  }
  0x3c   : > { %4349 = vmatpush3.bf16.msra.mxu1 %v4996_v55  ;;  %4461 = vmatpush3.bf16.msra.mxu0 %v4999_v57  ;;  %v5106_v55 = vld [vmem:[%s6388_s1 + $0x1a8] sm:$0xff]  }
  0x3d   : > { %4350 = vmatprep.subr.bf16.mxu1 %v5003_v58  ;;  %4462 = vmatprep.subr.bf16.mxu0 %v5008_v62  ;;  %v5109_v57 = vld [vmem:[%s6388_s1 + $0x228] sm:$0xff]   ;;  %v5119_v62 = vld [vmem:[%s6388_s1 + $0x1f0] sm:$0xff]  }
  0x3e   : > { %2547 = vmatmul.mubr.bf16.gmra.mrb[12].mxu1 %v4972_v51  ;;  %2483 = vmatmul.mubr.bf16.gmra.mrb[12].mxu0 %v4977_v52  ;;  %v5051_v51 = vld [vmem:[%s5438_s9 + $0x160] ss:$56 sps:$4 sm:$0xff]   ;;  %v5052_v52 = vld [vmem:[%s5438_s9 + $0x1cc] ss:$56 sps:$4 sm:$0xff]  }
  0x3f   : > { %2554 = vmatprep.mubr.bf16.mxu1 %v4980_v53  ;;  %2490 = vmatprep.mubr.bf16.mxu0 %v4984_v54  ;;  %v5103_v53 = vld [vmem:[%s6388_s1 + $0x1e8] sm:$0xff]  }
  0x40   : > { %4351 = vmatpush3.bf16.msra.mxu1 %v5006_v61  ;;  %4463 = vmatpush3.bf16.msra.mxu0 %v5009_v63  ;;  %v5056_v54 = vld [vmem:[%s5438_s9 + $0x1d4] ss:$56 sps:$4 sm:$0xff]   ;;  %v5054_v58 = vld [vmem:[%s5438_s9 + $0x1c8] ss:$56 sps:$4 sm:$0xff]   ;;  %v5065_v61 = vld [vmem:[%s5438_s9 + $0x244] ss:$56 sps:$4 sm:$0xff]  }
  0x41   : > { %4352 = vmatprep.subr.bf16.mxu1 %v5013_v2  ;;  %4464 = vmatprep.subr.bf16.mxu0 %v5018_v6  ;;  %v5122_v63 = vld [vmem:[%s6388_s1 + $0x1b0] sm:$0xff]   ;;  %v5135_v6 = vld [vmem:[%s6388_s1 + $0x1f8] sm:$0xff]  }
  0x42   : > { %v5064_v2 = vld [vmem:[%s5438_s9 + $0x238] ss:$56 sps:$4 sm:$0xff]  }
  0x44   : > { %4353 = vmatpush3.bf16.msra.mxu1 %v5016_v3  ;;  %4465 = vmatpush3.bf16.msra.mxu0 %v5019_v7  ;;  %v5067_v3 = vld [vmem:[%s5438_s9 + $0x240] ss:$56 sps:$4 sm:$0xff]  }
  0x45   : > { %4562 = vmatprep.subr.bf16.mxu1 %v5023_v10  ;;  %4674 = vmatprep.subr.bf16.mxu0 %v5028_v11  ;;  %v5138_v7 = vld [vmem:[%s6388_s1 + $0x1b8] sm:$0xff]   ;;  %v5070_v10 = vld [vmem:[%s5438_s9 + $0x2a8] ss:$56 sps:$4 sm:$0xff]  }
  0x46   : > { %2555 = vmatmul.mubr.bf16.gmra.mrb[16].mxu1 %v4982_v59  ;;  %2491 = vmatmul.mubr.bf16.gmra.mrb[16].mxu0 %v4987_v60  ;;  %v5059_v59 = vld [vmem:[%s5438_s9 + $0x1d0] ss:$56 sps:$4 sm:$0xff]   ;;  %v5062_v60 = vld [vmem:[%s5438_s9 + $0x23c] ss:$56 sps:$4 sm:$0xff]  }
  0x47   : > { %2562 = vmatprep.mubr.bf16.mxu1 %v4990_v0  ;;  %2498 = vmatprep.mubr.bf16.mxu0 %v4994_v1  ;;  %v5124_v0 = vld [vmem:[%s6388_s1 + $0x270] sm:$0xff]  }
  0x48   : > { %v5125_v1 = vld [vmem:[%s6388_s1 + $0x230] sm:$0xff]  }
  0x49   : > { %v5075_v11 = vld [vmem:[%s5438_s9 + $0x2b0] ss:$56 sps:$4 sm:$0xff]  }
  0x4e   : > { %2563 = vmatmul.mubr.bf16.gmra.mrb[20].mxu1 %v4992_v4  ;;  %2499 = vmatmul.mubr.bf16.gmra.mrb[20].mxu0 %v4997_v5  ;;  %v5068_v4 = vld [vmem:[%s5438_s9 + $0x2ac] ss:$56 sps:$4 sm:$0xff]  }
  0x4f   : > { %2570 = vmatprep.mubr.bf16.mxu1 %v5000_v8  ;;  %2506 = vmatprep.mubr.bf16.mxu0 %v5004_v9  ;;  %v5072_v5 = vld [vmem:[%s5438_s9 + $0x2b4] ss:$56 sps:$4 sm:$0xff]   ;;  %v5140_v8 = vld [vmem:[%s6388_s1 + $0x278] sm:$0xff]  }
  0x50   : > { %v5141_v9 = vld [vmem:[%s6388_s1 + $0x238] sm:$0xff]  }
  0x56   : > { %2571 = vmatmul.mubr.bf16.gmra.mrb[24].mxu1 %v5002_v12  ;;  %2507 = vmatmul.mubr.bf16.gmra.mrb[24].mxu0 %v5007_v13  ;;  %v5078_v12 = vld [vmem:[%s5438_s9 + $0x31c] ss:$56 sps:$4 sm:$0xff]  }
  0x57   : > { %2578 = vmatprep.mubr.bf16.mxu1 %v5010_v14  ;;  %2514 = vmatprep.mubr.bf16.mxu0 %v5014_v15  ;;  %v5081_v13 = vld [vmem:[%s5438_s9 + $0x324] ss:$56 sps:$4 sm:$0xff]   ;;  %v5376_v14 = vmov 0  }
  0x58   : > { %v5151_v15 = vld [vmem:[%s6388_s1 + $0x2c0] sm:$0xff]  }
  0x5e   : > { %2579 = vmatmul.mubr.bf16.gmra.mrb[28].mxu1 %v5012_v16  ;;  %2515 = vmatmul.mubr.bf16.gmra.mrb[28].mxu0 %v5017_v17  ;;  %v5080_v16 = vld [vmem:[%s5438_s9 + $0x318] ss:$56 sps:$4 sm:$0xff]  }
  0x5f   : > { %2619 = vmatprep.mubr.bf16.mxu1 %v5022_v18  ;;  %2780 = vmatprep.mubr.bf16.mxu0 %v5026_v19  ;;  %v5083_v17 = vld [vmem:[%s5438_s9 + $0x320] ss:$56 sps:$4 sm:$0xff]   ;;  %v5084_v18 = vld [vmem:[%s5438_s9 + $0x38c] ss:$56 sps:$4 sm:$0xff]  }
  0x60   : > { %v5088_v19 = vld [vmem:[%s5438_s9 + $0x394] ss:$56 sps:$4 sm:$0xff]  }
  0x66   : > { %2620 = vmatmul.mubr.bf16.vlgmr.msra.gmra.mrb[32].mxu1 %v5020_v20  ;;  %2781 = vmatmul.mubr.bf16.vlgmr.msra.gmra.mrb[32].mxu0 %v5024_v21  ;;  %v5086_v20 = vld [vmem:[%s5438_s9 + $0x388] ss:$56 sps:$4 sm:$0xff]  }
  0x67   : > { %4563 = vmatpush3.bf16.msra.mxu1 %v5027_v22  ;;  %4675 = vmatpush3.bf16.msra.mxu0 %v5029_v23  ;;  %v5091_v21 = vld [vmem:[%s5438_s9 + $0x390] ss:$56 sps:$4 sm:$0xff]   ;;  %v5094_v22 = vld [vmem:[%s5438_s9 + $0x3fc] ss:$56 sps:$4 sm:$0xff]  }
  0x68   : > { %2627 = vmatprep.mubr.bf16.mxu1 %v5030_v24  ;;  %2788 = vmatprep.mubr.bf16.mxu0 %v5033_v25  ;;  %v5097_v23 = vld [vmem:[%s5438_s9 + $0x404] ss:$56 sps:$4 sm:$0xff]   ;;  %v5096_v24 = vld [vmem:[%s5438_s9 + $0x3f8] ss:$56 sps:$4 sm:$0xff]  }
  0x69   : > { %4564 = vmatprep.subr.bf16.mxu1 %v5039_v26  ;;  %4676 = vmatprep.subr.bf16.mxu0 %v5044_v27  ;;  %v5099_v25 = vld [vmem:[%s5438_s9 + $0x400] ss:$56 sps:$4 sm:$0xff]   ;;  %v5100_v26 = vld [vmem:[%s5438_s9 + $0x46c] ss:$56 sps:$4 sm:$0xff]  }
  0x6a   : > { %v5104_v27 = vld [vmem:[%s5438_s9 + $0x474] ss:$56 sps:$4 sm:$0xff]  }
  0x6b   : > { %4565 = vmatpush3.bf16.msra.mxu1 %v5042_v28  ;;  %4677 = vmatpush3.bf16.msra.mxu0 %v5045_v29  ;;  %v5102_v28 = vld [vmem:[%s5438_s9 + $0x468] ss:$56 sps:$4 sm:$0xff]  }
  0x6c   : > { %4566 = vmatprep.subr.bf16.mxu1 %v5055_v30  ;;  %4678 = vmatprep.subr.bf16.mxu0 %v5060_v33  ;;  %v5107_v29 = vld [vmem:[%s5438_s9 + $0x470] ss:$56 sps:$4 sm:$0xff]   ;;  %v5110_v30 = vld [vmem:[%s5438_s9 + $0x4dc] ss:$56 sps:$4 sm:$0xff]   ;;  %v5115_v33 = vld [vmem:[%s5438_s9 + $0x4e0] ss:$56 sps:$4 sm:$0xff]  }
  0x6e   : > { %2628 = vmatmul.mubr.bf16.gmra.mrb[36].mxu1 %v5032_v31  ;;  %2789 = vmatmul.mubr.bf16.gmra.mrb[36].mxu0 %v5035_v32  ;;  %v5113_v31 = vld [vmem:[%s5438_s9 + $0x4e4] ss:$56 sps:$4 sm:$0xff]   ;;  %v5112_v32 = vld [vmem:[%s5438_s9 + $0x4d8] ss:$56 sps:$4 sm:$0xff]  }
  0x6f   : > { %2635 = vmatprep.mubr.bf16.mxu1 %v5036_v34  ;;  %2796 = vmatprep.mubr.bf16.mxu0 %v5040_v35  ;;  %v5116_v34 = vld [vmem:[%s5438_s9 + $0x54c] ss:$56 sps:$4 sm:$0xff]  }
  0x70   : > { %4567 = vmatpush3.bf16.msra.mxu1 %v5058_v36  ;;  %4679 = vmatpush3.bf16.msra.mxu0 %v5061_v37  ;;  %v5120_v35 = vld [vmem:[%s5438_s9 + $0x554] ss:$56 sps:$4 sm:$0xff]   ;;  %v5118_v36 = vld [vmem:[%s5438_s9 + $0x548] ss:$56 sps:$4 sm:$0xff]  }
  0x71   : > { %4568 = vmatprep.subr.bf16.mxu1 %v5071_v38  ;;  %4680 = vmatprep.subr.bf16.mxu0 %v5076_v39  ;;  %v5123_v37 = vld [vmem:[%s5438_s9 + $0x550] ss:$56 sps:$4 sm:$0xff]   ;;  %v5126_v38 = vld [vmem:[%s5438_s9 + $0x5bc] ss:$56 sps:$4 sm:$0xff]  }
  0x72   : > { %v5129_v39 = vld [vmem:[%s5438_s9 + $0x5c4] ss:$56 sps:$4 sm:$0xff]  }
  0x74   : > { %4569 = vmatpush3.bf16.msra.mxu1 %v5074_v40  ;;  %4681 = vmatpush3.bf16.msra.mxu0 %v5077_v43  ;;  %v5128_v40 = vld [vmem:[%s5438_s9 + $0x5b8] ss:$56 sps:$4 sm:$0xff]   ;;  %v5136_v43 = vld [vmem:[%s5438_s9 + $0x634] ss:$56 sps:$4 sm:$0xff]  }
  0x75   : > { %4570 = vmatprep.subr.bf16.mxu1 %v5087_v45  ;;  %4682 = vmatprep.subr.bf16.mxu0 %v5092_v48  ;;  %v5139_v45 = vld [vmem:[%s5438_s9 + $0x630] ss:$56 sps:$4 sm:$0xff]  }
  0x76   : > { %2636 = vmatmul.mubr.bf16.gmra.mrb[40].mxu1 %v5038_v41  ;;  %2797 = vmatmul.mubr.bf16.gmra.mrb[40].mxu0 %v5043_v42  ;;  %v5131_v41 = vld [vmem:[%s5438_s9 + $0x5c0] ss:$56 sps:$4 sm:$0xff]   ;;  %v5132_v42 = vld [vmem:[%s5438_s9 + $0x62c] ss:$56 sps:$4 sm:$0xff]  }
  0x77   : > { %2643 = vmatprep.mubr.bf16.mxu1 %v5046_v44  ;;  %2804 = vmatprep.mubr.bf16.mxu0 %v5049_v46  ;;  %v5134_v44 = vld [vmem:[%s5438_s9 + $0x628] ss:$56 sps:$4 sm:$0xff]   ;;  %v5142_v46 = vld [vmem:[%s5438_s9 + $0x69c] ss:$56 sps:$4 sm:$0xff]   ;;  %v5144_v48 = vld [vmem:[%s5438_s9 + $0x698] ss:$56 sps:$4 sm:$0xff]  }
  0x78   : > { %4571 = vmatpush3.bf16.msra.mxu1 %v5090_v47  ;;  %4683 = vmatpush3.bf16.msra.mxu0 %v5093_v49  ;;  %v5145_v47 = vld [vmem:[%s5438_s9 + $0x6a4] ss:$56 sps:$4 sm:$0xff]   ;;  %v5147_v49 = vld [vmem:[%s5438_s9 + $0x6a0] ss:$56 sps:$4 sm:$0xff]  }
  0x79   : > { %4572 = vmatprep.subr.bf16.mxu1 %v5103_v53  ;;  %4684 = vmatprep.subr.bf16.mxu0 %v5108_v56  ;;  %v5152_v53 = vld [vmem:[%s5438_s9 + $0x20] ss:$56 sps:$4 sm:$0xff]   ;;  %v5157_v56 = vld [vmem:[%s5438_s9 + $0x8c] ss:$56 sps:$4 sm:$0xff]  }
  0x7c   : > { %4573 = vmatpush3.bf16.msra.mxu1 %v5106_v55  ;;  %4685 = vmatpush3.bf16.msra.mxu0 %v5109_v57  ;;  %v5156_v55 = vld [vmem:[%s6388_s1 + $0x300] sm:$0xff]   ;;  %v5160_v57 = vld [vmem:[%s5438_s9 + $0x94] ss:$56 sps:$4 sm:$0xff]  }
  0x7d   : > { %4574 = vmatprep.subr.bf16.mxu1 %v5119_v62  ;;  %4686 = vmatprep.subr.bf16.mxu0 %v5124_v0  ;;  %v5159_v62 = vld [vmem:[%s5438_s9 + $0x88] ss:$56 sps:$4 sm:$0xff]   ;;  %v5163_v0 = vld [vmem:[%s5438_s9 + $0xfc] ss:$56 sps:$4 sm:$0xff]  }
  0x7e   : > { %2644 = vmatmul.mubr.bf16.gmra.mrb[44].mxu1 %v5048_v50  ;;  %2805 = vmatmul.mubr.bf16.gmra.mrb[44].mxu0 %v5051_v51  ;;  %v5150_v50 = vld [vmem:[%s5438_s9 + $0x1c] ss:$56 sps:$4 sm:$0xff]  }
  0x7f   : > { %2651 = vmatprep.mubr.bf16.mxu1 %v5052_v52  ;;  %2812 = vmatprep.mubr.bf16.mxu0 %v5056_v54  ;;  %v5154_v51 = vld [vmem:[%s5438_s9 + $0x24] ss:$56 sps:$4 sm:$0xff]   ;;  %v5148_v52 = vld [vmem:[%s5438_s9 + $0x18] ss:$56 sps:$4 sm:$0xff]  }
  0x80   : > { %4575 = vmatpush3.bf16.msra.mxu1 %v5122_v63  ;;  %4687 = vmatpush3.bf16.msra.mxu0 %v5125_v1  ;;  %v5155_v54 = vld [vmem:[%s6388_s1 + $0x280] sm:$0xff]   ;;  %v5162_v63 = vld [vmem:[%s5438_s9 + $0x90] ss:$56 sps:$4 sm:$0xff]  }
  0x81   : > { %4576 = vmatprep.subr.bf16.mxu1 %v5135_v6  ;;  %4688 = vmatprep.subr.bf16.mxu0 %v5140_v8  ;;  %v5167_v1 = vld [vmem:[%s5438_s9 + $0x104] ss:$56 sps:$4 sm:$0xff]   ;;  %v5165_v8 = vld [vmem:[%s5438_s9 + $0xf8] ss:$56 sps:$4 sm:$0xff]  }
  0x82   : > { %v5200_v6 = vld [vmem:[%s6388_s1 + $0x298] sm:$0xff]  }
  0x84   : > { %4577 = vmatpush3.bf16.msra.mxu1 %v5138_v7  ;;  %4689 = vmatpush3.bf16.msra.mxu0 %v5141_v9  ;;  %v5213_v7 = vld [vmem:[%s6388_s1 + $0x2e0] sm:$0xff]  }
  0x85   : > { %3392 = vmatprep.subr.bf16.mxu0 %v5376_v14  ;;  %4786 = vmatprep.subr.bf16.mxu1 %v5151_v15  ;;  %v5171_v9 = vld [vmem:[%s5438_s9 + $0x100] ss:$56 sps:$4 sm:$0xff]   ;;  %v5228_v15 = vld [vmem:[%s6388_s1 + $0x2e8] sm:$0xff]  }
  0x86   : > { %2652 = vmatmul.mubr.bf16.gmra.mrb[48].mxu1 %v5054_v58  ;;  %2813 = vmatmul.mubr.bf16.gmra.mrb[48].mxu0 %v5059_v59  ;;  %v5166_v58 = vld [vmem:[%s6388_s1 + $0x2c8] sm:$0xff]  }
  0x87   : > { %2659 = vmatprep.mubr.bf16.mxu1 %v5062_v60  ;;  %2820 = vmatprep.mubr.bf16.mxu0 %v5065_v61  ;;  %v5169_v59 = vld [vmem:[%s6388_s1 + $0x288] sm:$0xff]   ;;  %v5182_v61 = vld [vmem:[%s6388_s1 + $0x2d0] sm:$0xff]  }
  0x88   : > { %v5170_v60 = vld [vmem:[%s6388_s1 + $0x308] sm:$0xff]  }
  0x8e   : > { %2660 = vmatmul.mubr.bf16.gmra.mrb[52].mxu1 %v5064_v2  ;;  %2821 = vmatmul.mubr.bf16.gmra.mrb[52].mxu0 %v5067_v3  ;;  %v5178_v2 = vld [vmem:[%s6388_s1 + $0x310] sm:$0xff]  }
  0x8f   : > { %2667 = vmatprep.mubr.bf16.mxu1 %v5068_v4  ;;  %2828 = vmatprep.mubr.bf16.mxu0 %v5072_v5  ;;  %v5185_v3 = vld [vmem:[%s6388_s1 + $0x290] sm:$0xff]   ;;  %v5197_v4 = vld [vmem:[%s6388_s1 + $0x2d8] sm:$0xff]  }
  0x90   : > { %v5187_v5 = vld [vmem:[%s6388_s1 + $0x318] sm:$0xff]  }
  0x96   : > { %2668 = vmatmul.mubr.bf16.gmra.mrb[56].mxu1 %v5070_v10  ;;  %2829 = vmatmul.mubr.bf16.gmra.mrb[56].mxu0 %v5075_v11  ;;  %v5172_v10 = vld [vmem:[%s5438_s9 + $0x16c] ss:$56 sps:$4 sm:$0xff]  }
  0x97   : > { %2675 = vmatprep.mubr.bf16.mxu1 %v5078_v12  ;;  %2836 = vmatprep.mubr.bf16.mxu0 %v5081_v13  ;;  %v5175_v11 = vld [vmem:[%s5438_s9 + $0x174] ss:$56 sps:$4 sm:$0xff]   ;;  %v5201_v12 = vld [vmem:[%s6388_s1 + $0x320] sm:$0xff]  }
  0x98   : > { %v5216_v13 = vld [vmem:[%s6388_s1 + $0x2a0] sm:$0xff]  }
  0x9e   : > { %2676 = vmatmul.mubr.bf16.gmra.mrb[60].mxu1 %v5080_v16  ;;  %2837 = vmatmul.mubr.bf16.gmra.mrb[60].mxu0 %v5083_v17  ;;  %v5209_v16 = vld [vmem:[%s6388_s1 + $0x328] sm:$0xff]  }
  0x9f   : > { %2683 = vmatprep.mubr.bf16.mxu1 %v5084_v18  ;;  %2844 = vmatprep.mubr.bf16.mxu0 %v5088_v19  ;;  %v5231_v17 = vld [vmem:[%s6388_s1 + $0x2a8] sm:$0xff]   ;;  %v5825_v19 = vld [vmem:[%s6389_s2] ss:$0 sm:$0xff] }
  0xa6   : > { %2684 = vmatmul.mubr.bf16.gmra.mrb[64].mxu1 %v5086_v20  ;;  %2845 = vmatmul.mubr.bf16.gmra.mrb[64].mxu0 %v5091_v21 }
  0xa7   : > { %2691 = vmatprep.mubr.bf16.mxu1 %v5094_v22  ;;  %2852 = vmatprep.mubr.bf16.mxu0 %v5097_v23  ;;  %v5174_v23 = vld [vmem:[%s5438_s9 + $0x168] ss:$56 sps:$4 sm:$0xff]  }
  0xae   : > { %2692 = vmatmul.mubr.bf16.gmra.mrb[68].mxu1 %v5096_v24  ;;  %2853 = vmatmul.mubr.bf16.gmra.mrb[68].mxu0 %v5099_v25  ;;  %v5177_v24 = vld [vmem:[%s5438_s9 + $0x170] ss:$56 sps:$4 sm:$0xff]  }
  0xaf   : > { %2699 = vmatprep.mubr.bf16.mxu1 %v5100_v26  ;;  %2860 = vmatprep.mubr.bf16.mxu0 %v5104_v27 }
  0xb6   : > { %2700 = vmatmul.mubr.bf16.gmra.mrb[72].mxu1 %v5102_v28  ;;  %2861 = vmatmul.mubr.bf16.gmra.mrb[72].mxu0 %v5107_v29  ;;  %v5179_v29 = vld [vmem:[%s5438_s9 + $0x1dc] ss:$56 sps:$4 sm:$0xff]  }
  0xb7   : > { %2707 = vmatprep.mubr.bf16.mxu1 %v5110_v30  ;;  %2868 = vmatprep.mubr.bf16.mxu0 %v5113_v31  ;;  %v5183_v30 = vld [vmem:[%s5438_s9 + $0x1e4] ss:$56 sps:$4 sm:$0xff]  }
  0xbe   : > { %2708 = vmatmul.mubr.bf16.gmra.mrb[76].mxu1 %v5112_v32  ;;  %2869 = vmatmul.mubr.bf16.gmra.mrb[76].mxu0 %v5115_v33  ;;  %v5218_v33 = vld [vmem:[%s6388_s1 + $0x330] sm:$0xff]  }
  0xbf   : > { %2715 = vmatprep.mubr.bf16.mxu1 %v5116_v34  ;;  %2876 = vmatprep.mubr.bf16.mxu0 %v5120_v35  ;;  %v5244_v34 = vld [vmem:[%s6388_s1 + $0x2f0] sm:$0xff]  }
  0xc6   : > { %2716 = vmatmul.mubr.bf16.gmra.mrb[80].mxu1 %v5118_v36  ;;  %2877 = vmatmul.mubr.bf16.gmra.mrb[80].mxu0 %v5123_v37 }
  0xc7   : > { %2723 = vmatprep.mubr.bf16.mxu1 %v5126_v38  ;;  %2884 = vmatprep.mubr.bf16.mxu0 %v5129_v39  ;;  %v5247_v38 = vld [vmem:[%s6388_s1 + $0x2b0] sm:$0xff]   ;;  %v5259_v39 = vld [vmem:[%s6388_s1 + $0x2f8] sm:$0xff]  }
  0xce   : > { %2724 = vmatmul.mubr.bf16.gmra.mrb[84].mxu1 %v5128_v40  ;;  %2885 = vmatmul.mubr.bf16.gmra.mrb[84].mxu0 %v5131_v41  ;;  %v5232_v41 = vld [vmem:[%s6388_s1 + $0x338] sm:$0xff]  }
  0xcf   : > { %2731 = vmatprep.mubr.bf16.mxu1 %v5132_v42  ;;  %2892 = vmatprep.mubr.bf16.mxu0 %v5136_v43 }
  0xd6   : > { %2732 = vmatmul.mubr.bf16.gmra.mrb[88].mxu1 %v5134_v44  ;;  %2893 = vmatmul.mubr.bf16.gmra.mrb[88].mxu0 %v5139_v45 }
  0xd7   : > { %2739 = vmatprep.mubr.bf16.mxu1 %v5142_v46  ;;  %2900 = vmatprep.mubr.bf16.mxu0 %v5145_v47  ;;  %v5181_v46 = vld [vmem:[%s5438_s9 + $0x1d8] ss:$56 sps:$4 sm:$0xff]  }
  0xd8   : > { %v5186_v47 = vld [vmem:[%s5438_s9 + $0x1e0] ss:$56 sps:$4 sm:$0xff]  }
  0xde   : > { %2740 = vmatmul.mubr.bf16.gmra.mrb[92].mxu1 %v5144_v48  ;;  %2901 = vmatmul.mubr.bf16.gmra.mrb[92].mxu0 %v5147_v49 }
  0xdf   : > { %2941 = vmatprep.mubr.bf16.mxu1 %v5150_v50  ;;  %3102 = vmatprep.mubr.bf16.mxu0 %v5154_v51 }
  0xe6   : > { %2942 = vmatmul.mubr.bf16.vlgmr.msra.gmra.mrb[96].mxu1 %v5148_v52  ;;  %3103 = vmatmul.mubr.bf16.vlgmr.msra.gmra.mrb[96].mxu0 %v5152_v53  ;;  %v5188_v52 = vld [vmem:[%s5438_s9 + $0x24c] ss:$56 sps:$4 sm:$0xff]  }
  0xe7   : > { %4787 = vmatpush3.bf16.msra.mxu1 %v5155_v54  ;;  %3393 = vmatpush1.bf16.msra.mxu0 %v5156_v55  ;;  %v5191_v53 = vld [vmem:[%s5438_s9 + $0x254] ss:$56 sps:$4 sm:$0xff]  }
  0xe8   : > { %2949 = vmatprep.mubr.bf16.mxu1 %v5157_v56  ;;  %3110 = vmatprep.mubr.bf16.mxu0 %v5160_v57  ;;  %v5240_v56 = vld [vmem:[%s6388_s1 + $0x340] sm:$0xff]   ;;  %v5262_v57 = vld [vmem:[%s6388_s1 + $0x2b8] sm:$0xff]  }
  0xe9   : > { %4788 = vmatprep.subr.bf16.mxu1 %v5166_v58  ;;  %3394 = vmatprep.subr.bf16.mxu0 %v5376_v14 }
  0xeb   : > { %4789 = vmatpush3.bf16.msra.mxu1 %v5169_v59  ;;  %3395 = vmatpush1.bf16.msra.mxu0 %v5170_v60 }
  0xec   : > { %3396 = vmatprep.subr.bf16.mxu0 %v5376_v14  ;;  %4790 = vmatprep.subr.bf16.mxu1 %v5182_v61 }
  0xee   : > { %2950 = vmatmul.mubr.bf16.gmra.mrb[100].mxu1 %v5159_v62  ;;  %3111 = vmatmul.mubr.bf16.gmra.mrb[100].mxu0 %v5162_v63  ;;  %v5249_v62 = vld [vmem:[%s6388_s1 + $0x348] sm:$0xff]  }
  0xef   : > { %2957 = vmatprep.mubr.bf16.mxu1 %v5163_v0  ;;  %3118 = vmatprep.mubr.bf16.mxu0 %v5167_v1 }
  0xf0   : > { %3397 = vmatpush1.bf16.msra.mxu0 %v5178_v2  ;;  %4791 = vmatpush3.bf16.msra.mxu1 %v5185_v3  ;;  %v5190_v3 = vld [vmem:[%s5438_s9 + $0x248] ss:$56 sps:$4 sm:$0xff]  }
  0xf1   : > { %3398 = vmatprep.subr.bf16.mxu0 %v5376_v14  ;;  %4792 = vmatprep.subr.bf16.mxu1 %v5197_v4  ;;  %v5193_v4 = vld [vmem:[%s5438_s9 + $0x250] ss:$56 sps:$4 sm:$0xff]  }
  0xf4   : > { %3399 = vmatpush1.bf16.msra.mxu0 %v5187_v5  ;;  %4793 = vmatpush3.bf16.msra.mxu1 %v5200_v6 }
  0xf5   : > { %3400 = vmatprep.subr.bf16.mxu0 %v5376_v14  ;;  %4794 = vmatprep.subr.bf16.mxu1 %v5213_v7 }
  0xf6   : > { %2958 = vmatmul.mubr.bf16.gmra.mrb[104].mxu1 %v5165_v8  ;;  %3119 = vmatmul.mubr.bf16.gmra.mrb[104].mxu0 %v5171_v9  ;;  %v5194_v9 = vld [vmem:[%s5438_s9 + $0x2bc] ss:$56 sps:$4 sm:$0xff]  }
  0xf7   : > { %2965 = vmatprep.mubr.bf16.mxu1 %v5172_v10  ;;  %3126 = vmatprep.mubr.bf16.mxu0 %v5175_v11  ;;  %v5198_v10 = vld [vmem:[%s5438_s9 + $0x2c4] ss:$56 sps:$4 sm:$0xff]  }
  0xf8   : > { %3401 = vmatpush1.bf16.msra.mxu0 %v5201_v12  ;;  %4795 = vmatpush3.bf16.msra.mxu1 %v5216_v13  ;;  %v5263_v13 = vld [vmem:[%s6388_s1 + $0x350] sm:$0xff]  }
  0xf9   : > { %v4290_v18 = vpop.f32.mrb[0].mxu1  ;;  %v4242_v20 = vpop.f32.mrb[0].mxu0  ;;  %3402 = vmatprep.subr.bf16.mxu0 %v5376_v14  ;;  %4796 = vmatprep.subr.bf16.mxu1 %v5228_v15 }
  0xfa   : > { %v4291_v21 = vpop.f32.mrb[1].mxu1  ;;  %v4243_v22 = vpop.f32.mrb[1].mxu0 }
  0xfb   : > { %v4292_v25 = vadd.f32 %v4291_v21, %v4290_v18  ;;  %v4293_v26 = vpop.f32.mrb[2].mxu1  ;;  %v5830_v27 = vadd.f32 %v4243_v22, %v4242_v20  ;;  %v4245_v28 = vpop.f32.mrb[2].mxu0  ;;  %v5271_v20 = vld [vmem:[%s6388_s1 + $0x358] sm:$0xff]  }
  0xfc   : > { %v4294_v31 = vpop.f32.mrb[3].mxu1  ;;  %v4246_v32 = vpop.f32.mrb[3].mxu0  ;;  %3403 = vmatpush1.bf16.msra.mxu0 %v5209_v16  ;;  %4797 = vmatpush3.bf16.msra.mxu1 %v5231_v17 }
  0xfd   : > { %v5841_v35 = vadd.f32 %v4292_v25, %v5825_v19  ;;  %v4295_v36 = vadd.f32 %v4294_v31, %v4293_v26  ;;  %v5843_v37 = vadd.f32 %v4246_v32, %v4245_v28  ;;  %3404 = vmatprep.subr.bf16.mxu0 %v5376_v14  ;;  %4798 = vmatprep.subr.bf16.mxu1 %v5244_v34  ;;  %v5196_v25 = vld [vmem:[%s5438_s9 + $0x2b8] ss:$56 sps:$4 sm:$0xff]   ;;  %v5203_v32 = vld [vmem:[%s5438_s9 + $0x32c] ss:$56 sps:$4 sm:$0xff]  }
  0xfe   : > { %2966 = vmatmul.mubr.bf16.gmra.mrb[108].mxu1 %v5174_v23  ;;  %3127 = vmatmul.mubr.bf16.gmra.mrb[108].mxu0 %v5177_v24  ;;  %v5202_v26 = vld [vmem:[%s5438_s9 + $0x2c0] ss:$56 sps:$4 sm:$0xff]  }
  0xff   : > { %v5853_v40 = vadd.f32 %v4295_v36, %v5825_v19  ;;  %2973 = vmatprep.mubr.bf16.mxu1 %v5179_v29  ;;  %3134 = vmatprep.mubr.bf16.mxu0 %v5183_v30 }
 0x100   : > { %3405 = vmatpush1.bf16.msra.mxu0 %v5218_v33  ;;  %4799 = vmatpush3.bf16.msra.mxu1 %v5247_v38  ;;  %v5206_v33 = vld [vmem:[%s5438_s9 + $0x334] ss:$56 sps:$4 sm:$0xff]  }
 0x101   : > { %v4296_v42 = vpop.f32.mrb[4].mxu1  ;;  %v4248_v43 = vpop.f32.mrb[4].mxu0  ;;  %3406 = vmatprep.subr.bf16.mxu0 %v5376_v14  ;;  %4800 = vmatprep.subr.bf16.mxu1 %v5259_v39 }
 0x102   : > { %v4297_v44 = vpop.f32.mrb[5].mxu1  ;;  %v4249_v45 = vpop.f32.mrb[5].mxu0 }
 0x103   : > { %v4298_v48 = vadd.f32 %v4297_v44, %v4296_v42  ;;  %v4299_v49 = vpop.f32.mrb[6].mxu1  ;;  %v5861_v50 = vadd.f32 %v4249_v45, %v4248_v43  ;;  %v4251_v51 = vpop.f32.mrb[6].mxu0 }
 0x104   : > { %v4300_v54 = vpop.f32.mrb[7].mxu1  ;;  %v4252_v55 = vpop.f32.mrb[7].mxu0  ;;  %3407 = vmatpush1.bf16.msra.mxu0 %v5232_v41  ;;  %4801 = vmatpush3.bf16.msra.mxu1 %v5262_v57 }
 0x105   : > { %v5872_v58 = vadd.f32 %v4298_v48, %v5825_v19  ;;  %v4301_v59 = vadd.f32 %v4300_v54, %v4299_v49  ;;  %v5874_v60 = vadd.f32 %v4252_v55, %v4251_v51  ;;  %3408 = vmatprep.subr.bf16.mxu0 %v5376_v14  ;;  %v5214_v54 = vld [vmem:[%s5438_s9 + $0x3a4] ss:$56 sps:$4 sm:$0xff]  }
 0x106   : > { %2974 = vmatmul.mubr.bf16.gmra.mrb[112].mxu1 %v5181_v46  ;;  %3135 = vmatmul.mubr.bf16.gmra.mrb[112].mxu0 %v5186_v47  ;;  %v5205_v46 = vld [vmem:[%s5438_s9 + $0x328] ss:$56 sps:$4 sm:$0xff]  }
 0x107   : > { %v5878_v61 = vadd.f32 %v4301_v59, %v5825_v19  ;;  %2981 = vmatprep.mubr.bf16.mxu1 %v5188_v52  ;;  %3142 = vmatprep.mubr.bf16.mxu0 %v5191_v53  ;;  %v5208_v47 = vld [vmem:[%s5438_s9 + $0x330] ss:$56 sps:$4 sm:$0xff]   ;;  %v5210_v53 = vld [vmem:[%s5438_s9 + $0x39c] ss:$56 sps:$4 sm:$0xff]  }
 0x108   : > { %3409 = vmatpush1.bf16.msra.mxu0 %v5240_v56 }
 0x109   : > { %v4302_v63 = vpop.f32.mrb[8].mxu1  ;;  %v4254_v0 = vpop.f32.mrb[8].mxu0  ;;  %3410 = vmatprep.subr.bf16.mxu0 %v5376_v14 }
 0x10a   : > { %v4303_v1 = vpop.f32.mrb[9].mxu1  ;;  %v4255_v2 = vpop.f32.mrb[9].mxu0 }
 0x10b   : > { %v4304_v5 = vadd.f32 %v4303_v1, %v4302_v63  ;;  %v4305_v6 = vpop.f32.mrb[10].mxu1  ;;  %v5886_v7 = vadd.f32 %v4255_v2, %v4254_v0  ;;  %v4257_v8 = vpop.f32.mrb[10].mxu0 }
 0x10c   : > { %v4306_v11 = vpop.f32.mrb[11].mxu1  ;;  %v4258_v12 = vpop.f32.mrb[11].mxu0  ;;  %3411 = vmatpush1.bf16.msra.mxu0 %v5249_v62 }
 0x10d   : > { %v5894_v15 = vadd.f32 %v4304_v5, %v5825_v19  ;;  %v4307_v16 = vadd.f32 %v4306_v11, %v4305_v6  ;;  %v5896_v17 = vadd.f32 %v4258_v12, %v4257_v8  ;;  %3412 = vmatprep.subr.bf16.mxu0 %v5376_v14  ;;  %v5217_v5 = vld [vmem:[%s5438_s9 + $0x3a0] ss:$56 sps:$4 sm:$0xff]   ;;  %v5219_v11 = vld [vmem:[%s5438_s9 + $0x40c] ss:$56 sps:$4 sm:$0xff]  }
 0x10e   : > { %2982 = vmatmul.mubr.bf16.gmra.mrb[116].mxu1 %v5190_v3  ;;  %3143 = vmatmul.mubr.bf16.gmra.mrb[116].mxu0 %v5193_v4  ;;  %v5212_v4 = vld [vmem:[%s5438_s9 + $0x398] ss:$56 sps:$4 sm:$0xff]   ;;  %v5222_v12 = vld [vmem:[%s5438_s9 + $0x414] ss:$56 sps:$4 sm:$0xff]  }
 0x10f   : > { %v5900_v18 = vadd.f32 %v4307_v16, %v5825_v19  ;;  %2989 = vmatprep.mubr.bf16.mxu1 %v5194_v9  ;;  %3150 = vmatprep.mubr.bf16.mxu0 %v5198_v10 }
 0x110   : > { %3413 = vmatpush1.bf16.msra.mxu0 %v5263_v13 }
 0x111   : > { %v4308_v21 = vpop.f32.mrb[12].mxu1  ;;  %v4260_v22 = vpop.f32.mrb[12].mxu0  ;;  %3414 = vmatprep.subr.bf16.mxu0 %v5376_v14 }
 0x112   : > { %v4309_v23 = vpop.f32.mrb[13].mxu1  ;;  %v4261_v24 = vpop.f32.mrb[13].mxu0 }
 0x113   : > { %v4310_v28 = vadd.f32 %v4309_v23, %v4308_v21  ;;  %v4311_v29 = vpop.f32.mrb[14].mxu1  ;;  %v5908_v30 = vadd.f32 %v4261_v24, %v4260_v22  ;;  %v4263_v31 = vpop.f32.mrb[14].mxu0 }
 0x114   : > { %v4312_v34 = vpop.f32.mrb[15].mxu1  ;;  %v4264_v36 = vpop.f32.mrb[15].mxu0  ;;  %3415 = vmatpush1.bf16.msra.mxu0 %v5271_v20 }
 0x115   : > { %v5913_v38 = vadd.f32 %v4310_v28, %v5825_v19  ;;  %v4313_v14 = vadd.f32 %v4312_v34, %v4311_v29  ;;  %v5915_v39 = vadd.f32 %v4264_v36, %v4263_v31  ;;  %v5221_v29 = vld [vmem:[%s5438_s9 + $0x408] ss:$56 sps:$4 sm:$0xff]  }
 0x116   : > { %2990 = vmatmul.mubr.bf16.gmra.mrb[120].mxu1 %v5196_v25  ;;  %3151 = vmatmul.mubr.bf16.gmra.mrb[120].mxu0 %v5202_v26  ;;  %v5224_v31 = vld [vmem:[%s5438_s9 + $0x410] ss:$56 sps:$4 sm:$0xff]  }
 0x117   : > { %v5918_v41 = vadd.f32 %v4313_v14, %v5825_v19  ;;  %2997 = vmatprep.mubr.bf16.mxu1 %v5203_v32  ;;  %3158 = vmatprep.mubr.bf16.mxu0 %v5206_v33  ;;  %v5225_v14 = vld [vmem:[%s5438_s9 + $0x47c] ss:$56 sps:$4 sm:$0xff]  }
 0x119   : > { %v4314_v42 = vpop.f32.mrb[16].mxu1  ;;  %v4266_v43 = vpop.f32.mrb[16].mxu0 }
 0x11a   : > { %v4315_v44 = vpop.f32.mrb[17].mxu1  ;;  %v4267_v45 = vpop.f32.mrb[17].mxu0 }
 0x11b   : > { %v4316_v48 = vadd.f32 %v4315_v44, %v4314_v42  ;;  %v4317_v49 = vpop.f32.mrb[18].mxu1  ;;  %v5922_v51 = vadd.f32 %v4267_v45, %v4266_v43  ;;  %v4269_v52 = vpop.f32.mrb[18].mxu0  ;;  %v5229_v42 = vld [vmem:[%s5438_s9 + $0x484] ss:$56 sps:$4 sm:$0xff]  }
 0x11c   : > { %v4318_v55 = vpop.f32.mrb[19].mxu1  ;;  %v4270_v56 = vpop.f32.mrb[19].mxu0 }
 0x11d   : > { %v5927_v57 = vadd.f32 %v4316_v48, %v5825_v19  ;;  %v4319_v59 = vadd.f32 %v4318_v55, %v4317_v49  ;;  %v5929_v62 = vadd.f32 %v4270_v56, %v4269_v52  ;;  %v5227_v55 = vld [vmem:[%s5438_s9 + $0x478] ss:$56 sps:$4 sm:$0xff]  }
 0x11e   : > { %2998 = vmatmul.mubr.bf16.gmra.mrb[124].mxu1 %v5205_v46  ;;  %3159 = vmatmul.mubr.bf16.gmra.mrb[124].mxu0 %v5208_v47  ;;  %v5233_v56 = vld [vmem:[%s5438_s9 + $0x480] ss:$56 sps:$4 sm:$0xff]  }
 0x11f   : > { %v5932_v63 = vadd.f32 %v4319_v59, %v5825_v19  ;;  %3005 = vmatprep.mubr.bf16.mxu1 %v5210_v53  ;;  %3166 = vmatprep.mubr.bf16.mxu0 %v5214_v54 }
 0x121   : > { %v4320_v0 = vpop.f32.mrb[20].mxu1  ;;  %v4272_v1 = vpop.f32.mrb[20].mxu0 }
 0x122   : > { %v4321_v2 = vpop.f32.mrb[21].mxu1  ;;  %v4273_v3 = vpop.f32.mrb[21].mxu0 }
 0x123   : > { %v4322_v6 = vadd.f32 %v4321_v2, %v4320_v0  ;;  %v4323_v8 = vpop.f32.mrb[22].mxu1  ;;  %v5936_v9 = vadd.f32 %v4273_v3, %v4272_v1  ;;  %v4275_v10 = vpop.f32.mrb[22].mxu0  ;;  %v5234_v3 = vld [vmem:[%s5438_s9 + $0x4ec] ss:$56 sps:$4 sm:$0xff]  }
 0x124   : > { %v4324_v13 = vpop.f32.mrb[23].mxu1  ;;  %v4276_v16 = vpop.f32.mrb[23].mxu0 }
 0x125   : > { %v5941_v20 = vadd.f32 %v4322_v6, %v5825_v19  ;;  %v4325_v21 = vadd.f32 %v4324_v13, %v4323_v8  ;;  %v5943_v22 = vadd.f32 %v4276_v16, %v4275_v10 }
 0x126   : > { %3006 = vmatmul.mubr.bf16.gmra.mrb[128].mxu1 %v5212_v4  ;;  %3167 = vmatmul.mubr.bf16.gmra.mrb[128].mxu0 %v5217_v5  ;;  %v5237_v4 = vld [vmem:[%s5438_s9 + $0x4f4] ss:$56 sps:$4 sm:$0xff]  }
 0x127   : > { %v5946_v23 = vadd.f32 %v4325_v21, %v5825_v19  ;;  %3013 = vmatprep.mubr.bf16.mxu1 %v5219_v11  ;;  %3174 = vmatprep.mubr.bf16.mxu0 %v5222_v12 }
 0x129   : > { %v4326_v24 = vpop.f32.mrb[24].mxu1  ;;  %v4278_v25 = vpop.f32.mrb[24].mxu0 }
 0x12a   : > { %v4327_v26 = vpop.f32.mrb[25].mxu1  ;;  %v4279_v28 = vpop.f32.mrb[25].mxu0 }
 0x12b   : > { %v4328_v32 = vadd.f32 %v4327_v26, %v4326_v24  ;;  %v4329_v33 = vpop.f32.mrb[26].mxu1  ;;  %v5950_v34 = vadd.f32 %v4279_v28, %v4278_v25  ;;  %v4281_v36 = vpop.f32.mrb[26].mxu0  ;;  %v5236_v25 = vld [vmem:[%s5438_s9 + $0x4e8] ss:$56 sps:$4 sm:$0xff]   ;;  %v2461_v28 = vadd.f32 %v5830_v27, %v5825_v19 }
 0x12c   : > { %v4330_v43 = vpop.f32.mrb[27].mxu1  ;;  %v4282_v44 = vpop.f32.mrb[27].mxu0  ;;  %v5239_v26 = vld [vmem:[%s5438_s9 + $0x4f0] ss:$56 sps:$4 sm:$0xff]  }
 0x12d   : > { %v5955_v45 = vadd.f32 %v4328_v32, %v5825_v19  ;;  %v4331_v46 = vadd.f32 %v4330_v43, %v4329_v33  ;;  %v5957_v47 = vadd.f32 %v4282_v44, %v4281_v36  ;;  %v5241_v36 = vld [vmem:[%s5438_s9 + $0x55c] ss:$56 sps:$4 sm:$0xff]   ;;  %v2464_v44 = vadd.f32 %v5843_v37, %v5825_v19  ;;  %v5243_v37 = vld [vmem:[%s5438_s9 + $0x558] ss:$56 sps:$4 sm:$0xff]  }
 0x12e   : > { %3014 = vmatmul.mubr.bf16.gmra.mrb[132].mxu1 %v5221_v29  ;;  %3175 = vmatmul.mubr.bf16.gmra.mrb[132].mxu0 %v5224_v31 }
 0x12f   : > { %v5960_v48 = vadd.f32 %v4331_v46, %v5825_v19  ;;  %3021 = vmatprep.mubr.bf16.mxu1 %v5225_v14  ;;  %3182 = vmatprep.mubr.bf16.mxu0 %v5229_v42  ;;  %v5245_v14 = vld [vmem:[%s5438_s9 + $0x564] ss:$56 sps:$4 sm:$0xff]  }
 0x131   : > { %v4332_v49 = vpop.f32.mrb[28].mxu1  ;;  %v4284_v52 = vpop.f32.mrb[28].mxu0 }
 0x132   : > { %v4333_v53 = vpop.f32.mrb[29].mxu1  ;;  %v4285_v54 = vpop.f32.mrb[29].mxu0 }
 0x133   : > { %v4334_v59 = vadd.f32 %v4333_v53, %v4332_v49  ;;  %v4335_v0 = vpop.f32.mrb[30].mxu1  ;;  %v5964_v1 = vadd.f32 %v4285_v54, %v4284_v52  ;;  %v4287_v2 = vpop.f32.mrb[30].mxu0 }
 0x134   : > { %v4336_v5 = vpop.f32.mrb[31].mxu1  ;;  %v4288_v6 = vpop.f32.mrb[31].mxu0 }
 0x135   : > { %v5969_v8 = vadd.f32 %v4334_v59, %v5825_v19  ;;  %v4337_v10 = vadd.f32 %v4336_v5, %v4335_v0  ;;  %v5971_v11 = vadd.f32 %v4288_v6, %v4287_v2  ;;  %v5248_v2 = vld [vmem:[%s5438_s9 + $0x560] ss:$56 sps:$4 sm:$0xff]  }
 0x136   : > { %3022 = vmatmul.mubr.bf16.gmra.mrb[136].mxu1 %v5227_v55  ;;  %3183 = vmatmul.mubr.bf16.gmra.mrb[136].mxu0 %v5233_v56 }
 0x137   : > { %v5974_v12 = vadd.f32 %v4337_v10, %v5825_v19  ;;  %3029 = vmatprep.mubr.bf16.mxu1 %v5234_v3  ;;  %3190 = vmatprep.mubr.bf16.mxu0 %v5237_v4  ;;  %v2469_v3 = vadd.f32 %v5861_v50, %v5825_v19 }
 0x139   : > { %v4354_v13 = vpop.f32.mrb[32].mxu1  ;;  %v4466_v16 = vpop.f32.mrb[32].mxu0 }
 0x13a   : > { %v4355_v21 = vpop.f32.mrb[33].mxu1  ;;  %v4467_v24 = vpop.f32.mrb[33].mxu0 }
 0x13b   : > { %v4356_v29 = vadd.f32 %v4355_v21, %v4354_v13  ;;  %v4357_v31 = vpop.f32.mrb[34].mxu1  ;;  %v4468_v32 = vadd.f32 %v4467_v24, %v4466_v16  ;;  %v4469_v33 = vpop.f32.mrb[34].mxu0  ;;  %v5250_v13 = vld [vmem:[%s5438_s9 + $0x5cc] ss:$56 sps:$4 sm:$0xff]  }
 0x13c   : > { %v4358_v42 = vpop.f32.mrb[35].mxu1  ;;  %v4470_v43 = vpop.f32.mrb[35].mxu0  ;;  %v5253_v16 = vld [vmem:[%s5438_s9 + $0x5d4] ss:$56 sps:$4 sm:$0xff]  }
 0x13d   : > { %v2622_v46 = vadd.f32 %v4356_v29, %v2461_v28  ;;  %v4359_v49 = vadd.f32 %v4358_v42, %v4357_v31  ;;  %v4471_v52 = vadd.f32 %v4470_v43, %v4469_v33  ;;  %v5255_v43 = vld [vmem:[%s5438_s9 + $0x5d0] ss:$56 sps:$4 sm:$0xff]  }
 0x13e   : > { %3030 = vmatmul.mubr.bf16.gmra.mrb[140].mxu1 %v5236_v25  ;;  %3191 = vmatmul.mubr.bf16.gmra.mrb[140].mxu0 %v5239_v26  ;;  %v2472_v25 = vadd.f32 %v5874_v60, %v5825_v19  ;;  %v5252_v60 = vld [vmem:[%s5438_s9 + $0x5c8] ss:$56 sps:$4 sm:$0xff]  }
 0x13f   : > { %v2625_v53 = vadd.f32 %v4359_v49, %v2464_v44  ;;  %v5984_v27 = vadd.f32 %v4468_v32, %v2622_v46  ;;  %3037 = vmatprep.mubr.bf16.mxu1 %v5241_v36  ;;  %3198 = vmatprep.mubr.bf16.mxu0 %v5245_v14  ;;  %v2477_v44 = vadd.f32 %v5886_v7, %v5825_v19 }
 0x141   : > { %v5986_v54 = vadd.f32 %v4471_v52, %v2625_v53  ;;  %v4360_v55 = vpop.f32.mrb[36].mxu1  ;;  %v4472_v56 = vpop.f32.mrb[36].mxu0 }
 0x142   : > { %v4361_v59 = vpop.f32.mrb[37].mxu1  ;;  %v4473_v0 = vpop.f32.mrb[37].mxu0 }
 0x143   : > { %v4362_v4 = vadd.f32 %v4361_v59, %v4360_v55  ;;  %v4363_v5 = vpop.f32.mrb[38].mxu1  ;;  %v4474_v6 = vadd.f32 %v4473_v0, %v4472_v56  ;;  %v4475_v10 = vpop.f32.mrb[38].mxu0  ;;  %v5256_v55 = vld [vmem:[%s5438_s9 + $0x63c] ss:$56 sps:$4 sm:$0xff]  }
 0x144   : > { %v4364_v21 = vpop.f32.mrb[39].mxu1  ;;  %v4476_v24 = vpop.f32.mrb[39].mxu0  ;;  %v5260_v56 = vld [vmem:[%s5438_s9 + $0x644] ss:$56 sps:$4 sm:$0xff]  }
 0x145   : > { %v2630_v26 = vadd.f32 %v4362_v4, %v2469_v3  ;;  %v4365_v28 = vadd.f32 %v4364_v21, %v4363_v5  ;;  %v4477_v29 = vadd.f32 %v4476_v24, %v4475_v10  ;;  %v5264_v24 = vld [vmem:[%s5438_s9 + $0x640] ss:$56 sps:$4 sm:$0xff]  }
 0x146   : > { %3038 = vmatmul.mubr.bf16.gmra.mrb[144].mxu1 %v5243_v37  ;;  %3199 = vmatmul.mubr.bf16.gmra.mrb[144].mxu0 %v5248_v2  ;;  %v2480_v37 = vadd.f32 %v5896_v17, %v5825_v19  ;;  %v5258_v17 = vld [vmem:[%s5438_s9 + $0x638] ss:$56 sps:$4 sm:$0xff]  }
 0x147   : > { %v2633_v31 = vadd.f32 %v4365_v28, %v2472_v25  ;;  %v5996_v50 = vadd.f32 %v4474_v6, %v2630_v26  ;;  %3045 = vmatprep.mubr.bf16.mxu1 %v5250_v13  ;;  %3206 = vmatprep.mubr.bf16.mxu0 %v5253_v16  ;;  %v2485_v25 = vadd.f32 %v5908_v30, %v5825_v19 }
 0x149   : > { %v5998_v32 = vadd.f32 %v4477_v29, %v2633_v31  ;;  %v4366_v33 = vpop.f32.mrb[40].mxu1  ;;  %v4478_v36 = vpop.f32.mrb[40].mxu0 }
 0x14a   : > { %v4367_v14 = vpop.f32.mrb[41].mxu1  ;;  %v4479_v42 = vpop.f32.mrb[41].mxu0 }
 0x14b   : > { %v4368_v46 = vadd.f32 %v4367_v14, %v4366_v33  ;;  %v4369_v49 = vpop.f32.mrb[42].mxu1  ;;  %v4480_v52 = vadd.f32 %v4479_v42, %v4478_v36  ;;  %v4481_v53 = vpop.f32.mrb[42].mxu0  ;;  %v5265_v33 = vld [vmem:[%s5438_s9 + $0x6ac] ss:$56 sps:$4 sm:$0xff]  }
 0x14c   : > { %v4370_v59 = vpop.f32.mrb[43].mxu1  ;;  %v4482_v0 = vpop.f32.mrb[43].mxu0  ;;  %v5268_v36 = vld [vmem:[%s5438_s9 + $0x6b4] ss:$56 sps:$4 sm:$0xff]  }
 0x14d   : > { %v2638_v2 = vadd.f32 %v4368_v46, %v2477_v44  ;;  %v4371_v3 = vadd.f32 %v4370_v59, %v4369_v49  ;;  %v4483_v4 = vadd.f32 %v4482_v0, %v4481_v53  ;;  %v5270_v0 = vld [vmem:[%s5438_s9 + $0x6b0] ss:$56 sps:$4 sm:$0xff]  }
 0x14e   : > { %3046 = vmatmul.mubr.bf16.gmra.mrb[148].mxu1 %v5252_v60  ;;  %3207 = vmatmul.mubr.bf16.gmra.mrb[148].mxu0 %v5255_v43  ;;  %v2488_v60 = vadd.f32 %v5915_v39, %v5825_v19  ;;  %v5267_v39 = vld [vmem:[%s5438_s9 + $0x6a8] ss:$56 sps:$4 sm:$0xff]  }
 0x14f   : > { %v2641_v5 = vadd.f32 %v4371_v3, %v2480_v37  ;;  %v6008_v7 = vadd.f32 %v4480_v52, %v2638_v2  ;;  %3053 = vmatprep.mubr.bf16.mxu1 %v5256_v55  ;;  %3214 = vmatprep.mubr.bf16.mxu0 %v5260_v56  ;;  %v2493_v37 = vadd.f32 %v5922_v51, %v5825_v19 }
 0x151   : > { %v6010_v6 = vadd.f32 %v4483_v4, %v2641_v5  ;;  %v4372_v10 = vpop.f32.mrb[44].mxu1  ;;  %v4484_v13 = vpop.f32.mrb[44].mxu0 }
 0x152   : > { %v4373_v16 = vpop.f32.mrb[45].mxu1  ;;  %v4485_v21 = vpop.f32.mrb[45].mxu0 }
 0x153   : > { %v4374_v26 = vadd.f32 %v4373_v16, %v4372_v10  ;;  %v4375_v28 = vpop.f32.mrb[46].mxu1  ;;  %v4486_v29 = vadd.f32 %v4485_v21, %v4484_v13  ;;  %v4487_v31 = vpop.f32.mrb[46].mxu0  ;;  %v5274_v10 = vld [vmem:[%s5438_s9 + $0x2c] ss:$56 sps:$4 sm:$0xff]  }
 0x154   : > { %v4376_v14 = vpop.f32.mrb[47].mxu1  ;;  %v4488_v42 = vpop.f32.mrb[47].mxu0  ;;  %v5277_v13 = vld [vmem:[%s5438_s9 + $0x34] ss:$56 sps:$4 sm:$0xff]  }
 0x155   : > { %v2646_v43 = vadd.f32 %v4374_v26, %v2485_v25  ;;  %v4377_v44 = vadd.f32 %v4376_v14, %v4375_v28  ;;  %v4489_v46 = vadd.f32 %v4488_v42, %v4487_v31  ;;  %v5272_v14 = vld [vmem:[%s5438_s9 + $0x28] ss:$56 sps:$4 sm:$0xff]  }
 0x156   : > { %3054 = vmatmul.mubr.bf16.gmra.mrb[152].mxu1 %v5258_v17  ;;  %3215 = vmatmul.mubr.bf16.gmra.mrb[152].mxu0 %v5264_v24  ;;  %v2496_v17 = vadd.f32 %v5929_v62, %v5825_v19  ;;  %v5275_v42 = vld [vmem:[%s5438_s9 + $0x30] ss:$56 sps:$4 sm:$0xff]  }
 0x157   : > { %v2649_v49 = vadd.f32 %v4377_v44, %v2488_v60  ;;  %v6020_v30 = vadd.f32 %v4486_v29, %v2646_v43  ;;  %3061 = vmatprep.mubr.bf16.mxu1 %v5265_v33  ;;  %3222 = vmatprep.mubr.bf16.mxu0 %v5268_v36  ;;  %v2501_v60 = vadd.f32 %v5936_v9, %v5825_v19 }
 0x159   : > { %v6022_v52 = vadd.f32 %v4489_v46, %v2649_v49  ;;  %v4378_v53 = vpop.f32.mrb[48].mxu1  ;;  %v4490_v55 = vpop.f32.mrb[48].mxu0 }
 0x15a   : > { %v4379_v56 = vpop.f32.mrb[49].mxu1  ;;  %v4491_v59 = vpop.f32.mrb[49].mxu0 }
 0x15b   : > { %v4380_v2 = vadd.f32 %v4379_v56, %v4378_v53  ;;  %v4381_v3 = vpop.f32.mrb[50].mxu1  ;;  %v4492_v4 = vadd.f32 %v4491_v59, %v4490_v55  ;;  %v4493_v5 = vpop.f32.mrb[50].mxu0  ;;  %v5278_v53 = vld [vmem:[%s5438_s9 + $0x9c] ss:$56 sps:$4 sm:$0xff]  }
 0x15c   : > { %v4382_v16 = vpop.f32.mrb[51].mxu1  ;;  %v4494_v21 = vpop.f32.mrb[51].mxu0  ;;  %v5281_v55 = vld [vmem:[%s5438_s9 + $0xa4] ss:$56 sps:$4 sm:$0xff]  }
 0x15d   : > { %v2654_v24 = vadd.f32 %v4380_v2, %v2493_v37  ;;  %v4383_v25 = vadd.f32 %v4382_v16, %v4381_v3  ;;  %v4495_v26 = vadd.f32 %v4494_v21, %v4493_v5  ;;  %v5280_v16 = vld [vmem:[%s5438_s9 + $0x98] ss:$56 sps:$4 sm:$0xff]  }
 0x15e   : > { %3062 = vmatmul.mubr.bf16.gmra.mrb[156].mxu1 %v5267_v39  ;;  %3223 = vmatmul.mubr.bf16.gmra.mrb[156].mxu0 %v5270_v0  ;;  %v2504_v39 = vadd.f32 %v5943_v22, %v5825_v19  ;;  %v5283_v21 = vld [vmem:[%s5438_s9 + $0xa0] ss:$56 sps:$4 sm:$0xff]  }
 0x15f   : > { %v2657_v51 = vadd.f32 %v4383_v25, %v2496_v17  ;;  %v6032_v28 = vadd.f32 %v4492_v4, %v2654_v24  ;;  %3263 = vmatprep.mubr.bf16.mxu1 %v5274_v10  ;;  %4144 = vmatprep.mubr.msk.bf16.mxu0 %vm2377_vm0, %v5277_v13  ;;  %v2509_v17 = vadd.f32 %v5950_v34, %v5825_v19 }
 0x161   : > { %v6035_v29 = vadd.f32 %v4495_v26, %v2657_v51  ;;  %v4384_v31 = vpop.f32.mrb[52].mxu1  ;;  %v4496_v33 = vpop.f32.mrb[52].mxu0 }
 0x162   : > { %v4385_v36 = vpop.f32.mrb[53].mxu1  ;;  %v4497_v62 = vpop.f32.mrb[53].mxu0 }
 0x163   : > { %v4386_v43 = vadd.f32 %v4385_v36, %v4384_v31  ;;  %v4387_v44 = vpop.f32.mrb[54].mxu1  ;;  %v4498_v46 = vadd.f32 %v4497_v62, %v4496_v33  ;;  %v4499_v49 = vpop.f32.mrb[54].mxu0  ;;  %v5284_v31 = vld [vmem:[%s5438_s9 + $0x10c] ss:$56 sps:$4 sm:$0xff]  }
 0x164   : > { %v4388_v56 = vpop.f32.mrb[55].mxu1  ;;  %v4500_v59 = vpop.f32.mrb[55].mxu0  ;;  %v5287_v33 = vld [vmem:[%s5438_s9 + $0x114] ss:$56 sps:$4 sm:$0xff]  }
 0x165   : > { %v2662_v0 = vadd.f32 %v4386_v43, %v2501_v60  ;;  %v4389_v37 = vadd.f32 %v4388_v56, %v4387_v44  ;;  %v4501_v2 = vadd.f32 %v4500_v59, %v4499_v49  ;;  %v5286_v56 = vld [vmem:[%s5438_s9 + $0x108] ss:$56 sps:$4 sm:$0xff]  }
 0x166   : > { %3264 = vmatmul.mubr.bf16.vlgmr.msra.gmra.mrb[160].mxu1 %v5272_v14  ;;  %3425 = vmatmul.mubr.bf16.vlgmr.msra.gmra.mrb[160].mxu0 %v5275_v42  ;;  %v2512_v14 = vadd.f32 %v5957_v47, %v5825_v19  ;;  %v5289_v59 = vld [vmem:[%s5438_s9 + $0x110] ss:$56 sps:$4 sm:$0xff]  }
 0x167   : > { %v2665_v3 = vadd.f32 %v4389_v37, %v2504_v39  ;;  %v6045_v9 = vadd.f32 %v4498_v46, %v2662_v0  ;;  %3271 = vmatprep.mubr.bf16.mxu1 %v5278_v53  ;;  %4145 = vmatprep.mubr.msk.bf16.mxu0 %vm2377_vm0, %v5281_v55  ;;  %v2517_v39 = vadd.f32 %v5964_v1, %v5825_v19 }
 0x169   : > { %v6048_v4 = vadd.f32 %v4501_v2, %v2665_v3  ;;  %v4390_v5 = vpop.f32.mrb[56].mxu1  ;;  %v4502_v10 = vpop.f32.mrb[56].mxu0 }
 0x16a   : > { %v4391_v13 = vpop.f32.mrb[57].mxu1  ;;  %v4503_v22 = vpop.f32.mrb[57].mxu0 }
 0x16b   : > { %v4392_v24 = vadd.f32 %v4391_v13, %v4390_v5  ;;  %v4393_v25 = vpop.f32.mrb[58].mxu1  ;;  %v4504_v26 = vadd.f32 %v4503_v22, %v4502_v10  ;;  %v4505_v51 = vpop.f32.mrb[58].mxu0  ;;  %v5290_v5 = vld [vmem:[%s5438_s9 + $0x17c] ss:$56 sps:$4 sm:$0xff]  }
 0x16c   : > { %v4394_v36 = vpop.f32.mrb[59].mxu1  ;;  %v4506_v62 = vpop.f32.mrb[59].mxu0  ;;  %v5293_v10 = vld [vmem:[%s5438_s9 + $0x184] ss:$56 sps:$4 sm:$0xff]  }
 0x16d   : > { %v2670_v42 = vadd.f32 %v4392_v24, %v2509_v17  ;;  %v4395_v60 = vadd.f32 %v4394_v36, %v4393_v25  ;;  %v4507_v43 = vadd.f32 %v4506_v62, %v4505_v51  ;;  %v5295_v36 = vld [vmem:[%s5438_s9 + $0x180] ss:$56 sps:$4 sm:$0xff]  }
 0x16e   : > { %3272 = vmatmul.mubr.bf16.gmra.mrb[164].mxu1 %v5280_v16  ;;  %3433 = vmatmul.mubr.bf16.gmra.mrb[164].mxu0 %v5283_v21  ;;  %v2520_v16 = vadd.f32 %v5971_v11, %v5825_v19  ;;  %v5292_v11 = vld [vmem:[%s5438_s9 + $0x178] ss:$56 sps:$4 sm:$0xff]  }
 0x16f   : > { %v2673_v44 = vadd.f32 %v4395_v60, %v2512_v14  ;;  %v6058_v34 = vadd.f32 %v4504_v26, %v2670_v42  ;;  %3279 = vmatprep.mubr.bf16.mxu1 %v5284_v31  ;;  %4146 = vmatprep.mubr.msk.bf16.mxu0 %vm2377_vm0, %v5287_v33 }
 0x171   : > { %v6061_v46 = vadd.f32 %v4507_v43, %v2673_v44  ;;  %v4396_v49 = vpop.f32.mrb[60].mxu1  ;;  %v4508_v53 = vpop.f32.mrb[60].mxu0  ;;  %v5296_v43 = vld [vmem:[%s5438_s9 + $0x1ec] ss:$56 sps:$4 sm:$0xff]  }
 0x172   : > { %v4397_v55 = vpop.f32.mrb[61].mxu1  ;;  %v4509_v47 = vpop.f32.mrb[61].mxu0  ;;  %v5299_v44 = vld [vmem:[%s5438_s9 + $0x1f4] ss:$56 sps:$4 sm:$0xff]  }
 0x173   : > { %v4398_v0 = vadd.f32 %v4397_v55, %v4396_v49  ;;  %v4399_v37 = vpop.f32.mrb[62].mxu1  ;;  %v4510_v2 = vadd.f32 %v4509_v47, %v4508_v53  ;;  %v4511_v3 = vpop.f32.mrb[62].mxu0 }
 0x174   : > { %v4400_v13 = vpop.f32.mrb[63].mxu1  ;;  %v4512_v22 = vpop.f32.mrb[63].mxu0 }
 0x175   : > { %v2678_v21 = vadd.f32 %v4398_v0, %v2517_v39  ;;  %v4401_v17 = vadd.f32 %v4400_v13, %v4399_v37  ;;  %v4513_v24 = vadd.f32 %v4512_v22, %v4511_v3 }
 0x176   : > { %3280 = vmatmul.mubr.bf16.gmra.mrb[168].mxu1 %v5286_v56  ;;  %3441 = vmatmul.mubr.bf16.gmra.mrb[168].mxu0 %v5289_v59 }
 0x177   : > { %v2681_v1 = vadd.f32 %v4401_v17, %v2520_v16  ;;  %v6071_v25 = vadd.f32 %v4510_v2, %v2678_v21  ;;  %3287 = vmatprep.mubr.bf16.mxu1 %v5290_v5  ;;  %4147 = vmatprep.mubr.msk.bf16.mxu0 %vm2377_vm0, %v5293_v10  ;;  %v5301_v10 = vld [vmem:[%s5438_s9 + $0x1f0] ss:$56 sps:$4 sm:$0xff]   ;;  %v5302_v17 = vld [vmem:[%s5438_s9 + $0x25c] ss:$56 sps:$4 sm:$0xff]  }
 0x179   : > { %v6074_v26 = vadd.f32 %v4513_v24, %v2681_v1  ;;  %v4402_v51 = vpop.f32.mrb[64].mxu1  ;;  %v4514_v31 = vpop.f32.mrb[64].mxu0 }
 0x17a   : > { %v4403_v33 = vpop.f32.mrb[65].mxu1  ;;  %v4515_v19 = vpop.f32.mrb[65].mxu0 }
 0x17b   : > { %v4404_v62 = vadd.f32 %v4403_v33, %v4402_v51  ;;  %v4405_v14 = vpop.f32.mrb[66].mxu1  ;;  %v4516_v42 = vadd.f32 %v4515_v19, %v4514_v31  ;;  %v4517_v60 = vpop.f32.mrb[66].mxu0 }
 0x17c   : > { %v4406_v49 = vpop.f32.mrb[67].mxu1  ;;  %v4518_v53 = vpop.f32.mrb[67].mxu0 }
 0x17d   : > { %v2686_v55 = vadd.f32 %v4404_v62, %v5841_v35  ;;  %v4407_v47 = vadd.f32 %v4406_v49, %v4405_v14  ;;  %v4519_v56 = vadd.f32 %v4518_v53, %v4517_v60  ;;  %v5298_v35 = vld [vmem:[%s5438_s9 + $0x1e8] ss:$56 sps:$4 sm:$0xff]  }
 0x17e   : > { %3288 = vmatmul.mubr.bf16.gmra.mrb[172].mxu1 %v5292_v11  ;;  %3449 = vmatmul.mubr.bf16.gmra.mrb[172].mxu0 %v5295_v36 }
 0x17f   : > { %v2689_v59 = vadd.f32 %v4407_v47, %v5853_v40  ;;  %v6082_v39 = vadd.f32 %v4516_v42, %v2686_v55  ;;  %3295 = vmatprep.mubr.bf16.mxu1 %v5296_v43  ;;  %4148 = vmatprep.mubr.msk.bf16.mxu0 %vm2377_vm0, %v5299_v44  ;;  %v5305_v40 = vld [vmem:[%s5438_s9 + $0x264] ss:$56 sps:$4 sm:$0xff]   ;;  %v5307_v43 = vld [vmem:[%s5438_s9 + $0x260] ss:$56 sps:$4 sm:$0xff]  }
 0x180   : > { %v5308_v47 = vld [vmem:[%s5438_s9 + $0x2cc] ss:$56 sps:$4 sm:$0xff]  }
 0x181   : > { %v6085_v0 = vadd.f32 %v4519_v56, %v2689_v59  ;;  %v4408_v37 = vpop.f32.mrb[68].mxu1  ;;  %v4520_v2 = vpop.f32.mrb[68].mxu0 }
 0x182   : > { %v4409_v3 = vpop.f32.mrb[69].mxu1  ;;  %v4521_v5 = vpop.f32.mrb[69].mxu0 }
 0x183   : > { %v4410_v13 = vadd.f32 %v4409_v3, %v4408_v37  ;;  %v4411_v22 = vpop.f32.mrb[70].mxu1  ;;  %v4522_v16 = vadd.f32 %v4521_v5, %v4520_v2  ;;  %v4523_v21 = vpop.f32.mrb[70].mxu0 }
 0x184   : > { %v4412_v24 = vpop.f32.mrb[71].mxu1  ;;  %v4524_v1 = vpop.f32.mrb[71].mxu0 }
 0x185   : > { %v2694_v51 = vadd.f32 %v4410_v13, %v5872_v58  ;;  %v4413_v31 = vadd.f32 %v4412_v24, %v4411_v22  ;;  %v4525_v33 = vadd.f32 %v4524_v1, %v4523_v21  ;;  %v5304_v58 = vld [vmem:[%s5438_s9 + $0x258] ss:$56 sps:$4 sm:$0xff]  }
 0x186   : > { %3296 = vmatmul.mubr.bf16.gmra.mrb[176].mxu1 %v5298_v35  ;;  %3457 = vmatmul.mubr.bf16.gmra.mrb[176].mxu0 %v5301_v10 }
 0x187   : > { %v2697_v19 = vadd.f32 %v4413_v31, %v5878_v61  ;;  %v6093_v11 = vadd.f32 %v4522_v16, %v2694_v51  ;;  %3303 = vmatprep.mubr.bf16.mxu1 %v5302_v17  ;;  %4149 = vmatprep.mubr.msk.bf16.mxu0 %vm2377_vm0, %v5305_v40  ;;  %v5311_v61 = vld [vmem:[%s5438_s9 + $0x2d4] ss:$56 sps:$4 sm:$0xff]   ;;  %v5313_v17 = vld [vmem:[%s5438_s9 + $0x2d0] ss:$56 sps:$4 sm:$0xff]  }
 0x188   : > { %v5314_v31 = vld [vmem:[%s5438_s9 + $0x33c] ss:$56 sps:$4 sm:$0xff]  }
 0x189   : > { %v6096_v36 = vadd.f32 %v4525_v33, %v2697_v19  ;;  %v4414_v62 = vpop.f32.mrb[72].mxu1  ;;  %v4526_v14 = vpop.f32.mrb[72].mxu0 }
 0x18a   : > { %v4415_v42 = vpop.f32.mrb[73].mxu1  ;;  %v4527_v60 = vpop.f32.mrb[73].mxu0 }
 0x18b   : > { %v4416_v44 = vadd.f32 %v4415_v42, %v4414_v62  ;;  %v4417_v49 = vpop.f32.mrb[74].mxu1  ;;  %v4528_v53 = vadd.f32 %v4527_v60, %v4526_v14  ;;  %v4529_v55 = vpop.f32.mrb[74].mxu0 }
 0x18c   : > { %v4418_v56 = vpop.f32.mrb[75].mxu1  ;;  %v4530_v59 = vpop.f32.mrb[75].mxu0 }
 0x18d   : > { %v2702_v37 = vadd.f32 %v4416_v44, %v5894_v15  ;;  %v4419_v2 = vadd.f32 %v4418_v56, %v4417_v49  ;;  %v4531_v3 = vadd.f32 %v4530_v59, %v4529_v55  ;;  %v5310_v15 = vld [vmem:[%s5438_s9 + $0x2c8] ss:$56 sps:$4 sm:$0xff]  }
 0x18e   : > { %3304 = vmatmul.mubr.bf16.gmra.mrb[180].mxu1 %v5304_v58  ;;  %3465 = vmatmul.mubr.bf16.gmra.mrb[180].mxu0 %v5307_v43 }
 0x18f   : > { %v2705_v5 = vadd.f32 %v4419_v2, %v5900_v18  ;;  %v6104_v35 = vadd.f32 %v4528_v53, %v2702_v37  ;;  %3311 = vmatprep.mubr.bf16.mxu1 %v5308_v47  ;;  %4150 = vmatprep.mubr.msk.bf16.mxu0 %vm2377_vm0, %v5311_v61  ;;  %v5317_v18 = vld [vmem:[%s5438_s9 + $0x344] ss:$56 sps:$4 sm:$0xff]   ;;  %v5319_v47 = vld [vmem:[%s5438_s9 + $0x340] ss:$56 sps:$4 sm:$0xff]  }
 0x190   : > { %v5320_v2 = vld [vmem:[%s5438_s9 + $0x3ac] ss:$56 sps:$4 sm:$0xff]  }
 0x191   : > { %v6107_v10 = vadd.f32 %v4531_v3, %v2705_v5  ;;  %v4420_v13 = vpop.f32.mrb[76].mxu1  ;;  %v4532_v22 = vpop.f32.mrb[76].mxu0 }
 0x192   : > { %v4421_v16 = vpop.f32.mrb[77].mxu1  ;;  %v4533_v21 = vpop.f32.mrb[77].mxu0 }
 0x193   : > { %v4422_v40 = vadd.f32 %v4421_v16, %v4420_v13  ;;  %v4423_v24 = vpop.f32.mrb[78].mxu1  ;;  %v4534_v1 = vadd.f32 %v4533_v21, %v4532_v22  ;;  %v4535_v51 = vpop.f32.mrb[78].mxu0 }
 0x194   : > { %v4424_v33 = vpop.f32.mrb[79].mxu1  ;;  %v4536_v19 = vpop.f32.mrb[79].mxu0 }
 0x195   : > { %v2710_v62 = vadd.f32 %v4422_v40, %v5913_v38  ;;  %v4425_v14 = vadd.f32 %v4424_v33, %v4423_v24  ;;  %v4537_v42 = vadd.f32 %v4536_v19, %v4535_v51  ;;  %v5316_v38 = vld [vmem:[%s5438_s9 + $0x338] ss:$56 sps:$4 sm:$0xff]  }
 0x196   : > { %3312 = vmatmul.mubr.bf16.gmra.mrb[184].mxu1 %v5310_v15  ;;  %3473 = vmatmul.mubr.bf16.gmra.mrb[184].mxu0 %v5313_v17 }
 0x197   : > { %v2713_v60 = vadd.f32 %v4425_v14, %v5918_v41  ;;  %v6115_v58 = vadd.f32 %v4534_v1, %v2710_v62  ;;  %3319 = vmatprep.mubr.bf16.mxu1 %v5314_v31  ;;  %4151 = vmatprep.mubr.msk.bf16.mxu0 %vm2377_vm0, %v5317_v18  ;;  %v5323_v41 = vld [vmem:[%s5438_s9 + $0x3b4] ss:$56 sps:$4 sm:$0xff]   ;;  %v5325_v31 = vld [vmem:[%s5438_s9 + $0x3b0] ss:$56 sps:$4 sm:$0xff]  }
 0x198   : > { %v5326_v14 = vld [vmem:[%s5438_s9 + $0x41c] ss:$56 sps:$4 sm:$0xff]  }
 0x199   : > { %v6118_v43 = vadd.f32 %v4537_v42, %v2713_v60  ;;  %v4426_v44 = vpop.f32.mrb[80].mxu1  ;;  %v4538_v49 = vpop.f32.mrb[80].mxu0 }
 0x19a   : > { %v4427_v53 = vpop.f32.mrb[81].mxu1  ;;  %v4539_v55 = vpop.f32.mrb[81].mxu0 }
 0x19b   : > { %v4428_v61 = vadd.f32 %v4427_v53, %v4426_v44  ;;  %v4429_v56 = vpop.f32.mrb[82].mxu1  ;;  %v4540_v59 = vadd.f32 %v4539_v55, %v4538_v49  ;;  %v4541_v37 = vpop.f32.mrb[82].mxu0 }
 0x19c   : > { %v4430_v3 = vpop.f32.mrb[83].mxu1  ;;  %v4542_v5 = vpop.f32.mrb[83].mxu0 }
 0x19d   : > { %v2718_v13 = vadd.f32 %v4428_v61, %v5927_v57  ;;  %v4431_v22 = vadd.f32 %v4430_v3, %v4429_v56  ;;  %v4543_v16 = vadd.f32 %v4542_v5, %v4541_v37  ;;  %v5322_v57 = vld [vmem:[%s5438_s9 + $0x3a8] ss:$56 sps:$4 sm:$0xff]  }
 0x19e   : > { %3320 = vmatmul.mubr.bf16.gmra.mrb[188].mxu1 %v5316_v38  ;;  %3481 = vmatmul.mubr.bf16.gmra.mrb[188].mxu0 %v5319_v47 }
 0x19f   : > { %v2721_v21 = vadd.f32 %v4431_v22, %v5932_v63  ;;  %v6126_v15 = vadd.f32 %v4540_v59, %v2718_v13  ;;  %3327 = vmatprep.mubr.bf16.mxu1 %v5320_v2  ;;  %4152 = vmatprep.mubr.msk.bf16.mxu0 %vm2377_vm0, %v5323_v41  ;;  %v5329_v63 = vld [vmem:[%s5438_s9 + $0x424] ss:$56 sps:$4 sm:$0xff]   ;;  %v5331_v2 = vld [vmem:[%s5438_s9 + $0x420] ss:$56 sps:$4 sm:$0xff]  }
 0x1a0   : > { %v5332_v22 = vld [vmem:[%s5438_s9 + $0x48c] ss:$56 sps:$4 sm:$0xff]  }
 0x1a1   : > { %v6129_v17 = vadd.f32 %v4543_v16, %v2721_v21  ;;  %v4432_v40 = vpop.f32.mrb[84].mxu1  ;;  %v4544_v24 = vpop.f32.mrb[84].mxu0 }
 0x1a2   : > { %v4433_v1 = vpop.f32.mrb[85].mxu1  ;;  %v4545_v51 = vpop.f32.mrb[85].mxu0 }
 0x1a3   : > { %v4434_v18 = vadd.f32 %v4433_v1, %v4432_v40  ;;  %v4435_v33 = vpop.f32.mrb[86].mxu1  ;;  %v4546_v19 = vadd.f32 %v4545_v51, %v4544_v24  ;;  %v4547_v62 = vpop.f32.mrb[86].mxu0 }
 0x1a4   : > { %v4436_v42 = vpop.f32.mrb[87].mxu1  ;;  %v4548_v60 = vpop.f32.mrb[87].mxu0 }
 0x1a5   : > { %v2726_v44 = vadd.f32 %v4434_v18, %v5941_v20  ;;  %v4437_v49 = vadd.f32 %v4436_v42, %v4435_v33  ;;  %v4549_v53 = vadd.f32 %v4548_v60, %v4547_v62  ;;  %v5328_v20 = vld [vmem:[%s5438_s9 + $0x418] ss:$56 sps:$4 sm:$0xff]  }
 0x1a6   : > { %3328 = vmatmul.mubr.bf16.gmra.mrb[192].mxu1 %v5322_v57  ;;  %3489 = vmatmul.mubr.bf16.gmra.mrb[192].mxu0 %v5325_v31 }
 0x1a7   : > { %v2729_v55 = vadd.f32 %v4437_v49, %v5946_v23  ;;  %v6137_v38 = vadd.f32 %v4546_v19, %v2726_v44  ;;  %3335 = vmatprep.mubr.bf16.mxu1 %v5326_v14  ;;  %4153 = vmatprep.mubr.msk.bf16.mxu0 %vm2377_vm0, %v5329_v63  ;;  %v5335_v23 = vld [vmem:[%s5438_s9 + $0x494] ss:$56 sps:$4 sm:$0xff]   ;;  %v5337_v14 = vld [vmem:[%s5438_s9 + $0x490] ss:$56 sps:$4 sm:$0xff]  }
 0x1a8   : > { %v5338_v49 = vld [vmem:[%s5438_s9 + $0x4fc] ss:$56 sps:$4 sm:$0xff]  }
 0x1a9   : > { %v6140_v47 = vadd.f32 %v4549_v53, %v2729_v55  ;;  %v4438_v61 = vpop.f32.mrb[88].mxu1  ;;  %v4550_v56 = vpop.f32.mrb[88].mxu0 }
 0x1aa   : > { %v4439_v59 = vpop.f32.mrb[89].mxu1  ;;  %v4551_v37 = vpop.f32.mrb[89].mxu0 }
 0x1ab   : > { %v4440_v41 = vadd.f32 %v4439_v59, %v4438_v61  ;;  %v4441_v3 = vpop.f32.mrb[90].mxu1  ;;  %v4552_v5 = vadd.f32 %v4551_v37, %v4550_v56  ;;  %v4553_v13 = vpop.f32.mrb[90].mxu0 }
 0x1ac   : > { %v4442_v16 = vpop.f32.mrb[91].mxu1  ;;  %v4554_v21 = vpop.f32.mrb[91].mxu0 }
 0x1ad   : > { %v2734_v40 = vadd.f32 %v4440_v41, %v5955_v45  ;;  %v4443_v24 = vadd.f32 %v4442_v16, %v4441_v3  ;;  %v4555_v1 = vadd.f32 %v4554_v21, %v4553_v13  ;;  %v5334_v45 = vld [vmem:[%s5438_s9 + $0x488] ss:$56 sps:$4 sm:$0xff]  }
 0x1ae   : > { %3336 = vmatmul.mubr.bf16.gmra.mrb[196].mxu1 %v5328_v20  ;;  %3497 = vmatmul.mubr.bf16.gmra.mrb[196].mxu0 %v5331_v2 }
 0x1af   : > { %v2737_v51 = vadd.f32 %v4443_v24, %v5960_v48  ;;  %v6148_v57 = vadd.f32 %v4552_v5, %v2734_v40  ;;  %3343 = vmatprep.mubr.bf16.mxu1 %v5332_v22  ;;  %4154 = vmatprep.mubr.msk.bf16.mxu0 %vm2377_vm0, %v5335_v23  ;;  %v5341_v48 = vld [vmem:[%s5438_s9 + $0x504] ss:$56 sps:$4 sm:$0xff]   ;;  %v5343_v22 = vld [vmem:[%s5438_s9 + $0x500] ss:$56 sps:$4 sm:$0xff]  }
 0x1b0   : > { %v5344_v24 = vld [vmem:[%s5438_s9 + $0x56c] ss:$56 sps:$4 sm:$0xff]  }
 0x1b1   : > { %v6151_v31 = vadd.f32 %v4555_v1, %v2737_v51  ;;  %v4444_v18 = vpop.f32.mrb[92].mxu1  ;;  %v4556_v33 = vpop.f32.mrb[92].mxu0 }
 0x1b2   : > { %v4445_v19 = vpop.f32.mrb[93].mxu1  ;;  %v4557_v62 = vpop.f32.mrb[93].mxu0 }
 0x1b3   : > { %v4446_v63 = vadd.f32 %v4445_v19, %v4444_v18  ;;  %v4447_v42 = vpop.f32.mrb[94].mxu1  ;;  %v4558_v60 = vadd.f32 %v4557_v62, %v4556_v33  ;;  %v4559_v44 = vpop.f32.mrb[94].mxu0 }
 0x1b4   : > { %v4448_v53 = vpop.f32.mrb[95].mxu1  ;;  %v4560_v55 = vpop.f32.mrb[95].mxu0 }
 0x1b5   : > { %v2742_v61 = vadd.f32 %v4446_v63, %v5969_v8  ;;  %v4449_v56 = vadd.f32 %v4448_v53, %v4447_v42  ;;  %v4561_v59 = vadd.f32 %v4560_v55, %v4559_v44  ;;  %v5340_v8 = vld [vmem:[%s5438_s9 + $0x4f8] ss:$56 sps:$4 sm:$0xff]  }
 0x1b6   : > { %3344 = vmatmul.mubr.bf16.gmra.mrb[200].mxu1 %v5334_v45  ;;  %3505 = vmatmul.mubr.bf16.gmra.mrb[200].mxu0 %v5337_v14 }
 0x1b7   : > { %v2745_v37 = vadd.f32 %v4449_v56, %v5974_v12  ;;  %v6159_v20 = vadd.f32 %v4558_v60, %v2742_v61  ;;  %3351 = vmatprep.mubr.bf16.mxu1 %v5338_v49  ;;  %4155 = vmatprep.mubr.msk.bf16.mxu0 %vm2377_vm0, %v5341_v48  ;;  %v5347_v12 = vld [vmem:[%s5438_s9 + $0x574] ss:$56 sps:$4 sm:$0xff]   ;;  %v5349_v49 = vld [vmem:[%s5438_s9 + $0x570] ss:$56 sps:$4 sm:$0xff]  }
 0x1b8   : > { %v5350_v56 = vld [vmem:[%s5438_s9 + $0x5dc] ss:$56 sps:$4 sm:$0xff]  }
 0x1b9   : > { %v6162_v2 = vadd.f32 %v4561_v59, %v2745_v37  ;;  %v4578_v41 = vpop.f32.mrb[96].mxu1  ;;  %v4690_v3 = vpop.f32.mrb[96].mxu0 }
 0x1ba   : > { %v4579_v5 = vpop.f32.mrb[97].mxu1  ;;  %v4691_v13 = vpop.f32.mrb[97].mxu0 }
 0x1bb   : > { %v4580_v23 = vadd.f32 %v4579_v5, %v4578_v41  ;;  %v4581_v16 = vpop.f32.mrb[98].mxu1  ;;  %v4692_v21 = vadd.f32 %v4691_v13, %v4690_v3  ;;  %v4693_v40 = vpop.f32.mrb[98].mxu0 }
 0x1bc   : > { %v4582_v1 = vpop.f32.mrb[99].mxu1  ;;  %v4694_v51 = vpop.f32.mrb[99].mxu0 }
 0x1bd   : > { %v2944_v18 = vadd.f32 %v4580_v23, %v5984_v27  ;;  %v4583_v33 = vadd.f32 %v4582_v1, %v4581_v16  ;;  %v4695_v19 = vadd.f32 %v4694_v51, %v4693_v40  ;;  %v5346_v27 = vld [vmem:[%s5438_s9 + $0x568] ss:$56 sps:$4 sm:$0xff]  }
 0x1be   : > { %3352 = vmatmul.mubr.bf16.gmra.mrb[204].mxu1 %v5340_v8  ;;  %3513 = vmatmul.mubr.bf16.gmra.mrb[204].mxu0 %v5343_v22 }
 0x1bf   : > { %v2947_v62 = vadd.f32 %v4583_v33, %v5986_v54  ;;  %v6170_v45 = vadd.f32 %v4692_v21, %v2944_v18  ;;  %3359 = vmatprep.mubr.bf16.mxu1 %v5344_v24  ;;  %4156 = vmatprep.mubr.msk.bf16.mxu0 %vm2377_vm0, %v5347_v12  ;;  %v5353_v54 = vld [vmem:[%s5438_s9 + $0x5e4] ss:$56 sps:$4 sm:$0xff]   ;;  %v5355_v24 = vld [vmem:[%s5438_s9 + $0x5e0] ss:$56 sps:$4 sm:$0xff]  }
 0x1c0   : > { %v5356_v33 = vld [vmem:[%s5438_s9 + $0x64c] ss:$56 sps:$4 sm:$0xff]  }
 0x1c1   : > { %v6173_v14 = vadd.f32 %v4695_v19, %v2947_v62  ;;  %v4584_v63 = vpop.f32.mrb[100].mxu1  ;;  %v4696_v42 = vpop.f32.mrb[100].mxu0 }
 0x1c2   : > { %v4585_v60 = vpop.f32.mrb[101].mxu1  ;;  %v4697_v44 = vpop.f32.mrb[101].mxu0 }
 0x1c3   : > { %v4586_v48 = vadd.f32 %v4585_v60, %v4584_v63  ;;  %v4587_v53 = vpop.f32.mrb[102].mxu1  ;;  %v4698_v55 = vadd.f32 %v4697_v44, %v4696_v42  ;;  %v4699_v61 = vpop.f32.mrb[102].mxu0 }
 0x1c4   : > { %v4588_v59 = vpop.f32.mrb[103].mxu1  ;;  %v4700_v37 = vpop.f32.mrb[103].mxu0 }
 0x1c5   : > { %v2952_v41 = vadd.f32 %v4586_v48, %v5996_v50  ;;  %v4589_v3 = vadd.f32 %v4588_v59, %v4587_v53  ;;  %v4701_v5 = vadd.f32 %v4700_v37, %v4699_v61  ;;  %v5352_v50 = vld [vmem:[%s5438_s9 + $0x5d8] ss:$56 sps:$4 sm:$0xff]  }
 0x1c6   : > { %3360 = vmatmul.mubr.bf16.gmra.mrb[208].mxu1 %v5346_v27  ;;  %3521 = vmatmul.mubr.bf16.gmra.mrb[208].mxu0 %v5349_v49 }
 0x1c7   : > { %v2955_v13 = vadd.f32 %v4589_v3, %v5998_v32  ;;  %v6181_v8 = vadd.f32 %v4698_v55, %v2952_v41  ;;  %3367 = vmatprep.mubr.bf16.mxu1 %v5350_v56  ;;  %4157 = vmatprep.mubr.msk.bf16.mxu0 %vm2377_vm0, %v5353_v54  ;;  %v5359_v32 = vld [vmem:[%s5438_s9 + $0x654] ss:$56 sps:$4 sm:$0xff]   ;;  %v5361_v56 = vld [vmem:[%s5438_s9 + $0x650] ss:$56 sps:$4 sm:$0xff]  }
 0x1c8   : > { %v5362_v3 = vld [vmem:[%s5438_s9 + $0x6bc] ss:$56 sps:$4 sm:$0xff]  }
 0x1c9   : > { %v6184_v22 = vadd.f32 %v4701_v5, %v2955_v13  ;;  %v4590_v23 = vpop.f32.mrb[104].mxu1  ;;  %v4702_v16 = vpop.f32.mrb[104].mxu0 }
 0x1ca   : > { %v4591_v21 = vpop.f32.mrb[105].mxu1  ;;  %v4703_v40 = vpop.f32.mrb[105].mxu0 }
 0x1cb   : > { %v4592_v12 = vadd.f32 %v4591_v21, %v4590_v23  ;;  %v4593_v1 = vpop.f32.mrb[106].mxu1  ;;  %v4704_v51 = vadd.f32 %v4703_v40, %v4702_v16  ;;  %v4705_v18 = vpop.f32.mrb[106].mxu0 }
 0x1cc   : > { %v4594_v19 = vpop.f32.mrb[107].mxu1  ;;  %v4706_v62 = vpop.f32.mrb[107].mxu0 }
 0x1cd   : > { %v2960_v63 = vadd.f32 %v4592_v12, %v6008_v7  ;;  %v4595_v42 = vadd.f32 %v4594_v19, %v4593_v1  ;;  %v4707_v60 = vadd.f32 %v4706_v62, %v4705_v18  ;;  %v5358_v7 = vld [vmem:[%s5438_s9 + $0x648] ss:$56 sps:$4 sm:$0xff]  }
 0x1ce   : > { %3368 = vmatmul.mubr.bf16.gmra.mrb[212].mxu1 %v5352_v50  ;;  %3529 = vmatmul.mubr.bf16.gmra.mrb[212].mxu0 %v5355_v24 }
 0x1cf   : > { %v2963_v44 = vadd.f32 %v4595_v42, %v6010_v6  ;;  %v6192_v27 = vadd.f32 %v4704_v51, %v2960_v63  ;;  %3375 = vmatprep.mubr.bf16.mxu1 %v5356_v33  ;;  %4158 = vmatprep.mubr.msk.bf16.mxu0 %vm2377_vm0, %v5359_v32  ;;  %v5365_v6 = vld [vmem:[%s5438_s9 + $0x6c4] ss:$56 sps:$4 sm:$0xff]   ;;  %v5364_v33 = vld [vmem:[%s5438_s9 + $0x6b8] ss:$56 sps:$4 sm:$0xff]  }
 0x1d0   : > { %v5367_v32 = vld [vmem:[%s5438_s9 + $0x6c0] ss:$56 sps:$4 sm:$0xff]   ;;  %s3810_s9 = sshll.u32 %s6392_s16, 2 }
 0x1d1   : > { %v6195_v49 = vadd.f32 %v4707_v60, %v2963_v44  ;;  %v4596_v48 = vpop.f32.mrb[108].mxu1  ;;  %v4708_v53 = vpop.f32.mrb[108].mxu0  ;;  %s6288_s22 = scalar_lea.vmem %s6390_s3, %s3810_s9 }
 0x1d2   : > { %v4597_v55 = vpop.f32.mrb[109].mxu1  ;;  %v4709_v61 = vpop.f32.mrb[109].mxu0 }
 0x1d3   : > { %v4598_v54 = vadd.f32 %v4597_v55, %v4596_v48  ;;  %v4599_v59 = vpop.f32.mrb[110].mxu1  ;;  %v4710_v37 = vadd.f32 %v4709_v61, %v4708_v53  ;;  %v4711_v41 = vpop.f32.mrb[110].mxu0 }
 0x1d4   : > { %v4600_v5 = vpop.f32.mrb[111].mxu1  ;;  %v4712_v13 = vpop.f32.mrb[111].mxu0 }
 0x1d5   : > { %v2968_v23 = vadd.f32 %v4598_v54, %v6020_v30  ;;  %v4601_v16 = vadd.f32 %v4600_v5, %v4599_v59  ;;  %v4713_v21 = vadd.f32 %v4712_v13, %v4711_v41 }
 0x1d6   : > { %3376 = vmatmul.mubr.bf16.gmra.mrb[216].mxu1 %v5358_v7  ;;  %3537 = vmatmul.mubr.bf16.gmra.mrb[216].mxu0 %v5361_v56 }
 0x1d7   : > { %v2971_v40 = vadd.f32 %v4601_v16, %v6022_v52  ;;  %v6203_v50 = vadd.f32 %v4710_v37, %v2968_v23  ;;  %3383 = vmatprep.mubr.bf16.mxu1 %v5362_v3  ;;  %4159 = vmatprep.mubr.msk.bf16.mxu0 %vm2377_vm0, %v5365_v6 }
 0x1d9   : > { %v6206_v24 = vadd.f32 %v4713_v21, %v2971_v40  ;;  %v4602_v12 = vpop.f32.mrb[112].mxu1  ;;  %v4714_v1 = vpop.f32.mrb[112].mxu0 }
 0x1da   : > { %v4603_v51 = vpop.f32.mrb[113].mxu1  ;;  %v4715_v18 = vpop.f32.mrb[113].mxu0 }
 0x1db   : > { %v4604_v30 = vadd.f32 %v4603_v51, %v4602_v12  ;;  %v4605_v19 = vpop.f32.mrb[114].mxu1  ;;  %v4716_v62 = vadd.f32 %v4715_v18, %v4714_v1  ;;  %v4717_v63 = vpop.f32.mrb[114].mxu0 }
 0x1dc   : > { %v4606_v42 = vpop.f32.mrb[115].mxu1  ;;  %v4718_v60 = vpop.f32.mrb[115].mxu0 }
 0x1dd   : > { %v2976_v52 = vadd.f32 %v4604_v30, %v6032_v28  ;;  %v4607_v44 = vadd.f32 %v4606_v42, %v4605_v19  ;;  %v4719_v48 = vadd.f32 %v4718_v60, %v4717_v63 }
 0x1de   : > { %3384 = vmatmul.mubr.bf16.gmra.mrb[220].mxu1 %v5364_v33  ;;  %3545 = vmatmul.mubr.bf16.gmra.mrb[220].mxu0 %v5367_v32 }
 0x1df   : > { %v2979_v53 = vadd.f32 %v4607_v44, %v6035_v29  ;;  %v6212_v55 = vadd.f32 %v4716_v62, %v2976_v52 }
 0x1e1   : > { %v6214_v61 = vadd.f32 %v4719_v48, %v2979_v53  ;;  %v4608_v7 = vpop.f32.mrb[116].mxu1  ;;  %v4720_v56 = vpop.f32.mrb[116].mxu0 }
 0x1e2   : > { %v4609_v54 = vpop.f32.mrb[117].mxu1  ;;  %v4721_v59 = vpop.f32.mrb[117].mxu0 }
 0x1e3   : > { %v4610_v37 = vadd.f32 %v4609_v54, %v4608_v7  ;;  %v4611_v41 = vpop.f32.mrb[118].mxu1  ;;  %v4722_v3 = vadd.f32 %v4721_v59, %v4720_v56  ;;  %v4723_v6 = vpop.f32.mrb[118].mxu0 }
 0x1e4   : > { %v4612_v5 = vpop.f32.mrb[119].mxu1  ;;  %v4724_v28 = vpop.f32.mrb[119].mxu0 }
 0x1e5   : > { %v2984_v13 = vadd.f32 %v4610_v37, %v6045_v9  ;;  %v4613_v23 = vadd.f32 %v4612_v5, %v4611_v41  ;;  %v4725_v16 = vadd.f32 %v4724_v28, %v4723_v6 }
 0x1e7   : > { %v2987_v29 = vadd.f32 %v4613_v23, %v6048_v4  ;;  %v6218_v21 = vadd.f32 %v4722_v3, %v2984_v13 }
 0x1e9   : > { %v6220_v40 = vadd.f32 %v4725_v16, %v2987_v29  ;;  %v4614_v12 = vpop.f32.mrb[120].mxu1  ;;  %v4726_v1 = vpop.f32.mrb[120].mxu0 }
 0x1ea   : > { %v4615_v51 = vpop.f32.mrb[121].mxu1  ;;  %v4727_v18 = vpop.f32.mrb[121].mxu0 }
 0x1eb   : > { %v4616_v33 = vadd.f32 %v4615_v51, %v4614_v12  ;;  %v4617_v32 = vpop.f32.mrb[122].mxu1  ;;  %v4728_v30 = vadd.f32 %v4727_v18, %v4726_v1  ;;  %v4729_v19 = vpop.f32.mrb[122].mxu0 }
 0x1ec   : > { %v4618_v62 = vpop.f32.mrb[123].mxu1  ;;  %v4730_v63 = vpop.f32.mrb[123].mxu0 }
 0x1ed   : > { %v2992_v9 = vadd.f32 %v4616_v33, %v6058_v34  ;;  %v4619_v42 = vadd.f32 %v4618_v62, %v4617_v32  ;;  %v4731_v60 = vadd.f32 %v4730_v63, %v4729_v19 }
 0x1ef   : > { %v2995_v4 = vadd.f32 %v4619_v42, %v6061_v46  ;;  %v6224_v52 = vadd.f32 %v4728_v30, %v2992_v9 }
 0x1f1   : > { %v6226_v44 = vadd.f32 %v4731_v60, %v2995_v4  ;;  %v4620_v48 = vpop.f32.mrb[124].mxu1  ;;  %v4732_v53 = vpop.f32.mrb[124].mxu0 }
 0x1f2   : > { %v4621_v7 = vpop.f32.mrb[125].mxu1  ;;  %v4733_v56 = vpop.f32.mrb[125].mxu0 }
 0x1f3   : > { %v4622_v54 = vadd.f32 %v4621_v7, %v4620_v48  ;;  %v4623_v59 = vpop.f32.mrb[126].mxu1  ;;  %v4734_v37 = vadd.f32 %v4733_v56, %v4732_v53  ;;  %v4735_v41 = vpop.f32.mrb[126].mxu0 }
 0x1f4   : > { %v4624_v3 = vpop.f32.mrb[127].mxu1  ;;  %v4736_v6 = vpop.f32.mrb[127].mxu0 }
 0x1f5   : > { %v3000_v34 = vadd.f32 %v4622_v54, %v6071_v25  ;;  %v4625_v5 = vadd.f32 %v4624_v3, %v4623_v59  ;;  %v4737_v28 = vadd.f32 %v4736_v6, %v4735_v41 }
 0x1f7   : > { %v3003_v46 = vadd.f32 %v4625_v5, %v6074_v26  ;;  %v6230_v13 = vadd.f32 %v4734_v37, %v3000_v34 }
 0x1f9   : > { %v6232_v23 = vadd.f32 %v4737_v28, %v3003_v46  ;;  %v4626_v16 = vpop.f32.mrb[128].mxu1  ;;  %v4738_v29 = vpop.f32.mrb[128].mxu0 }
 0x1fa   : > { %v4627_v12 = vpop.f32.mrb[129].mxu1  ;;  %v4739_v1 = vpop.f32.mrb[129].mxu0 }
 0x1fb   : > { %v4628_v51 = vadd.f32 %v4627_v12, %v4626_v16  ;;  %v4629_v18 = vpop.f32.mrb[130].mxu1  ;;  %v4740_v33 = vadd.f32 %v4739_v1, %v4738_v29  ;;  %v4741_v32 = vpop.f32.mrb[130].mxu0 }
 0x1fc   : > { %v4630_v30 = vpop.f32.mrb[131].mxu1  ;;  %v4742_v19 = vpop.f32.mrb[131].mxu0 }
 0x1fd   : > { %v3008_v25 = vadd.f32 %v4628_v51, %v6082_v39  ;;  %v4631_v62 = vadd.f32 %v4630_v30, %v4629_v18  ;;  %v4743_v63 = vadd.f32 %v4742_v19, %v4741_v32 }
 0x1ff   : > { %v3011_v26 = vadd.f32 %v4631_v62, %v6085_v0  ;;  %v6236_v9 = vadd.f32 %v4740_v33, %v3008_v25 }
 0x201   : > { %v6238_v42 = vadd.f32 %v4743_v63, %v3011_v26  ;;  %v4632_v60 = vpop.f32.mrb[132].mxu1  ;;  %v4744_v4 = vpop.f32.mrb[132].mxu0 }
 0x202   : > { %v4633_v48 = vpop.f32.mrb[133].mxu1  ;;  %v4745_v53 = vpop.f32.mrb[133].mxu0 }
 0x203   : > { %v4634_v7 = vadd.f32 %v4633_v48, %v4632_v60  ;;  %v4635_v56 = vpop.f32.mrb[134].mxu1  ;;  %v4746_v54 = vadd.f32 %v4745_v53, %v4744_v4  ;;  %v4747_v59 = vpop.f32.mrb[134].mxu0 }
 0x204   : > { %v4636_v37 = vpop.f32.mrb[135].mxu1  ;;  %v4748_v41 = vpop.f32.mrb[135].mxu0 }
 0x205   : > { %v3016_v39 = vadd.f32 %v4634_v7, %v6093_v11  ;;  %v4637_v3 = vadd.f32 %v4636_v37, %v4635_v56  ;;  %v4749_v6 = vadd.f32 %v4748_v41, %v4747_v59 }
 0x207   : > { %v3019_v0 = vadd.f32 %v4637_v3, %v6096_v36  ;;  %v6242_v34 = vadd.f32 %v4746_v54, %v3016_v39 }
 0x209   : > { %v6244_v5 = vadd.f32 %v4749_v6, %v3019_v0  ;;  %v4638_v28 = vpop.f32.mrb[136].mxu1  ;;  %v4750_v46 = vpop.f32.mrb[136].mxu0 }
 0x20a   : > { %v4639_v16 = vpop.f32.mrb[137].mxu1  ;;  %v4751_v29 = vpop.f32.mrb[137].mxu0 }
 0x20b   : > { %v4640_v12 = vadd.f32 %v4639_v16, %v4638_v28  ;;  %v4641_v1 = vpop.f32.mrb[138].mxu1  ;;  %v4752_v51 = vadd.f32 %v4751_v29, %v4750_v46  ;;  %v4753_v18 = vpop.f32.mrb[138].mxu0 }
 0x20c   : > { %v4642_v33 = vpop.f32.mrb[139].mxu1  ;;  %v4754_v32 = vpop.f32.mrb[139].mxu0 }
 0x20d   : > { %v3024_v11 = vadd.f32 %v4640_v12, %v6104_v35  ;;  %v4643_v30 = vadd.f32 %v4642_v33, %v4641_v1  ;;  %v4755_v19 = vadd.f32 %v4754_v32, %v4753_v18 }
 0x20f   : > { %v3027_v36 = vadd.f32 %v4643_v30, %v6107_v10  ;;  %v6248_v25 = vadd.f32 %v4752_v51, %v3024_v11 }
 0x211   : > { %v6250_v62 = vadd.f32 %v4755_v19, %v3027_v36  ;;  %v4644_v63 = vpop.f32.mrb[140].mxu1  ;;  %v4756_v26 = vpop.f32.mrb[140].mxu0 }
 0x212   : > { %v4645_v60 = vpop.f32.mrb[141].mxu1  ;;  %v4757_v4 = vpop.f32.mrb[141].mxu0 }
 0x213   : > { %v4646_v48 = vadd.f32 %v4645_v60, %v4644_v63  ;;  %v4647_v53 = vpop.f32.mrb[142].mxu1  ;;  %v4758_v7 = vadd.f32 %v4757_v4, %v4756_v26  ;;  %v4759_v56 = vpop.f32.mrb[142].mxu0 }
 0x214   : > { %v4648_v54 = vpop.f32.mrb[143].mxu1  ;;  %v4760_v59 = vpop.f32.mrb[143].mxu0 }
 0x215   : > { %v3032_v35 = vadd.f32 %v4646_v48, %v6115_v58  ;;  %v4649_v37 = vadd.f32 %v4648_v54, %v4647_v53  ;;  %v4761_v41 = vadd.f32 %v4760_v59, %v4759_v56 }
 0x217   : > { %v3035_v10 = vadd.f32 %v4649_v37, %v6118_v43  ;;  %v6254_v39 = vadd.f32 %v4758_v7, %v3032_v35 }
 0x219   : > { %v6256_v3 = vadd.f32 %v4761_v41, %v3035_v10  ;;  %v4650_v6 = vpop.f32.mrb[144].mxu1  ;;  %v4762_v0 = vpop.f32.mrb[144].mxu0 }
 0x21a   : > { %v4651_v28 = vpop.f32.mrb[145].mxu1  ;;  %v4763_v46 = vpop.f32.mrb[145].mxu0 }
 0x21b   : > { %v4652_v16 = vadd.f32 %v4651_v28, %v4650_v6  ;;  %v4653_v29 = vpop.f32.mrb[146].mxu1  ;;  %v4764_v12 = vadd.f32 %v4763_v46, %v4762_v0  ;;  %v4765_v1 = vpop.f32.mrb[146].mxu0 }
 0x21c   : > { %v4654_v51 = vpop.f32.mrb[147].mxu1  ;;  %v4766_v18 = vpop.f32.mrb[147].mxu0 }
 0x21d   : > { %v3040_v58 = vadd.f32 %v4652_v16, %v6126_v15  ;;  %v4655_v33 = vadd.f32 %v4654_v51, %v4653_v29  ;;  %v4767_v32 = vadd.f32 %v4766_v18, %v4765_v1 }
 0x21f   : > { %v3043_v43 = vadd.f32 %v4655_v33, %v6129_v17  ;;  %v6260_v11 = vadd.f32 %v4764_v12, %v3040_v58 }
 0x221   : > { %v6262_v30 = vadd.f32 %v4767_v32, %v3043_v43  ;;  %v4656_v19 = vpop.f32.mrb[148].mxu1  ;;  %v4768_v36 = vpop.f32.mrb[148].mxu0 }
 0x222   : > { %v4657_v63 = vpop.f32.mrb[149].mxu1  ;;  %v4769_v26 = vpop.f32.mrb[149].mxu0 }
 0x223   : > { %v4658_v60 = vadd.f32 %v4657_v63, %v4656_v19  ;;  %v4659_v4 = vpop.f32.mrb[150].mxu1  ;;  %v4770_v48 = vadd.f32 %v4769_v26, %v4768_v36  ;;  %v4771_v53 = vpop.f32.mrb[150].mxu0 }
 0x224   : > { %v4660_v7 = vpop.f32.mrb[151].mxu1  ;;  %v4772_v56 = vpop.f32.mrb[151].mxu0 }
 0x225   : > { %v3048_v15 = vadd.f32 %v4658_v60, %v6137_v38  ;;  %v4661_v54 = vadd.f32 %v4660_v7, %v4659_v4  ;;  %v4773_v59 = vadd.f32 %v4772_v56, %v4771_v53 }
 0x227   : > { %v3051_v17 = vadd.f32 %v4661_v54, %v6140_v47  ;;  %v6266_v35 = vadd.f32 %v4770_v48, %v3048_v15 }
 0x229   : > { %v6268_v37 = vadd.f32 %v4773_v59, %v3051_v17  ;;  %v4662_v41 = vpop.f32.mrb[152].mxu1  ;;  %v4774_v10 = vpop.f32.mrb[152].mxu0 }
 0x22a   : > { %v4663_v6 = vpop.f32.mrb[153].mxu1  ;;  %v4775_v0 = vpop.f32.mrb[153].mxu0 }
 0x22b   : > { %v4664_v28 = vadd.f32 %v4663_v6, %v4662_v41  ;;  %v4665_v46 = vpop.f32.mrb[154].mxu1  ;;  %v4776_v16 = vadd.f32 %v4775_v0, %v4774_v10  ;;  %v4777_v29 = vpop.f32.mrb[154].mxu0 }
 0x22c   : > { %v4666_v12 = vpop.f32.mrb[155].mxu1  ;;  %v4778_v1 = vpop.f32.mrb[155].mxu0 }
 0x22d   : > { %v3056_v38 = vadd.f32 %v4664_v28, %v6148_v57  ;;  %v4667_v51 = vadd.f32 %v4666_v12, %v4665_v46  ;;  %v4779_v18 = vadd.f32 %v4778_v1, %v4777_v29 }
 0x22f   : > { %v3059_v47 = vadd.f32 %v4667_v51, %v6151_v31  ;;  %v6272_v58 = vadd.f32 %v4776_v16, %v3056_v38 }
 0x231   : > { %v6274_v33 = vadd.f32 %v4779_v18, %v3059_v47  ;;  %v4668_v32 = vpop.f32.mrb[156].mxu1  ;;  %v4780_v43 = vpop.f32.mrb[156].mxu0 }
 0x232   : > { %v4669_v19 = vpop.f32.mrb[157].mxu1  ;;  %v4781_v36 = vpop.f32.mrb[157].mxu0 }
 0x233   : > { %v4670_v63 = vadd.f32 %v4669_v19, %v4668_v32  ;;  %v4671_v26 = vpop.f32.mrb[158].mxu1  ;;  %v4782_v60 = vadd.f32 %v4781_v36, %v4780_v43  ;;  %v4783_v4 = vpop.f32.mrb[158].mxu0 }
 0x234   : > { %v4672_v48 = vpop.f32.mrb[159].mxu1  ;;  %v4784_v53 = vpop.f32.mrb[159].mxu0 }
 0x235   : > { %v3064_v57 = vadd.f32 %v4670_v63, %v6159_v20  ;;  %v4673_v7 = vadd.f32 %v4672_v48, %v4671_v26  ;;  %v4785_v56 = vadd.f32 %v4784_v53, %v4783_v4 }
 0x237   : > { %v3067_v31 = vadd.f32 %v4673_v7, %v6162_v2  ;;  %v6278_v15 = vadd.f32 %v4782_v60, %v3064_v57 }
 0x239   : > { %v6280_v54 = vadd.f32 %v4785_v56, %v3067_v31  ;;  %v4802_v59 = vpop.f32.mrb[160].mxu1  ;;  %v3426_v17 = vpop.f32.mrb[160].mxu0 }
 0x23a   : > { %v4803_v41 = vpop.f32.mrb[161].mxu1  ;;  %v3428_v10 = vpop.f32.mrb[161].mxu0 }
 0x23b   : > { %v4804_v6 = vadd.f32 %v4803_v41, %v4802_v59  ;;  %v4805_v0 = vpop.f32.mrb[162].mxu1  ;;  %v3429_v28 = vpop.f32.mrb[162].mxu0 }
 0x23c   : > { %v4806_v46 = vpop.f32.mrb[163].mxu1  ;;  %v3431_v16 = vpop.f32.mrb[163].mxu0 }
 0x23d   : > { %v4807_v29 = vadd.f32 %v4806_v46, %v4805_v0  ;;  %v3266_v20 = vadd.f32 %v4804_v6, %v6170_v45 }
 0x23f   : > { %v3427_v12 = vadd.f32 %v3426_v17, %v3266_v20  ;;  %v3269_v2 = vadd.f32 %v4807_v29, %v6173_v14 }
 0x241   : > { %v3553_v1 = vmax.f32 %v3427_v12, 0.0  ;;  %v3430_v38 = vadd.f32 %v3429_v28, %v3269_v2  ;;  %v4808_v51 = vpop.f32.mrb[164].mxu1  ;;  %v3434_v18 = vpop.f32.mrb[164].mxu0 }
 0x242   : > { %v4809_v47 = vpop.f32.mrb[165].mxu1  ;;  %v3436_v32 = vpop.f32.mrb[165].mxu0 }
 0x243   : > { %v4194_v43 = vpack.c.bf16 %v3553_v1, %v3553_v1  ;;  %v3554_v45 = vmax.f32 %v3430_v38, 0.0  ;;  %v4810_v19 = vadd.f32 %v4809_v47, %v4808_v51  ;;  %v4811_v36 = vpop.f32.mrb[166].mxu1  ;;  %v3437_v63 = vpop.f32.mrb[166].mxu0 }
 0x244   : > { %v4812_v14 = vpop.f32.mrb[167].mxu1  ;;  %v3439_v26 = vpop.f32.mrb[167].mxu0 }
 0x245   : > { %3714 = vst.msk [vmem:[%s6288_s22] sm:$0xf] %vm3713_vm1, %v4194_v43  ;;  %v4195_v60 = vpack.c.bf16 %v3554_v45, %v3554_v45  ;;  %v4813_v4 = vadd.f32 %v4812_v14, %v4811_v36  ;;  %v3274_v48 = vadd.f32 %v4810_v19, %v6181_v8 }
 0x247   : > { %3715 = vst.msk [vmem:[%s6288_s22 + $0x4] sm:$0xf] %vm3713_vm1, %v4195_v60  ;;  %v3435_v53 = vadd.f32 %v3434_v18, %v3274_v48  ;;  %v3277_v57 = vadd.f32 %v4813_v4, %v6184_v22 }
 0x249   : > { %v3555_v7 = vmax.f32 %v3435_v53, 0.0  ;;  %v3438_v56 = vadd.f32 %v3437_v63, %v3277_v57  ;;  %v4814_v31 = vpop.f32.mrb[168].mxu1  ;;  %v3442_v59 = vpop.f32.mrb[168].mxu0 }
 0x24a   : > { %v4815_v17 = vpop.f32.mrb[169].mxu1  ;;  %v3444_v41 = vpop.f32.mrb[169].mxu0 }
 0x24b   : > { %v4196_v10 = vpack.c.bf16 %v3555_v7, %v3555_v7  ;;  %v3556_v6 = vmax.f32 %v3438_v56, 0.0  ;;  %v4816_v0 = vadd.f32 %v4815_v17, %v4814_v31  ;;  %v4817_v28 = vpop.f32.mrb[170].mxu1  ;;  %v3445_v46 = vpop.f32.mrb[170].mxu0 }
 0x24c   : > { %v4818_v16 = vpop.f32.mrb[171].mxu1  ;;  %v3447_v8 = vpop.f32.mrb[171].mxu0 }
 0x24d   : > { %3716 = vst.msk [vmem:[%s6288_s22 + $0x8] sm:$0xf] %vm3713_vm1, %v4196_v10  ;;  %v4197_v29 = vpack.c.bf16 %v3556_v6, %v3556_v6  ;;  %v4819_v20 = vadd.f32 %v4818_v16, %v4817_v28  ;;  %v3282_v22 = vadd.f32 %v4816_v0, %v6192_v27 }
 0x24f   : > { %3717 = vst.msk [vmem:[%s6288_s22 + $0xc] sm:$0xf] %vm3713_vm1, %v4197_v29  ;;  %v3443_v12 = vadd.f32 %v3442_v59, %v3282_v22  ;;  %v3285_v2 = vadd.f32 %v4819_v20, %v6195_v49 }
 0x251   : > { %v3557_v1 = vmax.f32 %v3443_v12, 0.0  ;;  %v3446_v38 = vadd.f32 %v3445_v46, %v3285_v2  ;;  %v4820_v51 = vpop.f32.mrb[172].mxu1  ;;  %v3450_v18 = vpop.f32.mrb[172].mxu0 }
 0x252   : > { %v4821_v47 = vpop.f32.mrb[173].mxu1  ;;  %v3452_v32 = vpop.f32.mrb[173].mxu0 }
 0x253   : > { %v4198_v43 = vpack.c.bf16 %v3557_v1, %v3557_v1  ;;  %v3558_v45 = vmax.f32 %v3446_v38, 0.0  ;;  %v4822_v19 = vadd.f32 %v4821_v47, %v4820_v51  ;;  %v4823_v36 = vpop.f32.mrb[174].mxu1  ;;  %v3453_v63 = vpop.f32.mrb[174].mxu0 }
 0x254   : > { %v4824_v14 = vpop.f32.mrb[175].mxu1  ;;  %v3455_v27 = vpop.f32.mrb[175].mxu0 }
 0x255   : > { %3718 = vst.msk [vmem:[%s6288_s22 + $0x10] sm:$0xf] %vm3713_vm1, %v4198_v43  ;;  %v4199_v26 = vpack.c.bf16 %v3558_v45, %v3558_v45  ;;  %v4825_v60 = vadd.f32 %v4824_v14, %v4823_v36  ;;  %v3290_v49 = vadd.f32 %v4822_v19, %v6203_v50 }
 0x257   : > { %3719 = vst.msk [vmem:[%s6288_s22 + $0x14] sm:$0xf] %vm3713_vm1, %v4199_v26  ;;  %v3451_v4 = vadd.f32 %v3450_v18, %v3290_v49  ;;  %v3293_v48 = vadd.f32 %v4825_v60, %v6206_v24 }
 0x259   : > { %v3559_v53 = vmax.f32 %v3451_v4, 0.0  ;;  %v3454_v57 = vadd.f32 %v3453_v63, %v3293_v48  ;;  %v4826_v7 = vpop.f32.mrb[176].mxu1  ;;  %v3458_v56 = vpop.f32.mrb[176].mxu0 }
 0x25a   : > { %v4827_v31 = vpop.f32.mrb[177].mxu1  ;;  %v3460_v59 = vpop.f32.mrb[177].mxu0 }
 0x25b   : > { %v4200_v17 = vpack.c.bf16 %v3559_v53, %v3559_v53  ;;  %v3560_v41 = vmax.f32 %v3454_v57, 0.0  ;;  %v4828_v10 = vadd.f32 %v4827_v31, %v4826_v7  ;;  %v4829_v6 = vpop.f32.mrb[178].mxu1  ;;  %v3461_v0 = vpop.f32.mrb[178].mxu0 }
 0x25c   : > { %v4830_v28 = vpop.f32.mrb[179].mxu1  ;;  %v3463_v50 = vpop.f32.mrb[179].mxu0 }
 0x25d   : > { %3720 = vst.msk [vmem:[%s6288_s22 + $0x18] sm:$0xf] %vm3713_vm1, %v4200_v17  ;;  %v4201_v46 = vpack.c.bf16 %v3560_v41, %v3560_v41  ;;  %v4831_v16 = vadd.f32 %v4830_v28, %v4829_v6  ;;  %v3298_v24 = vadd.f32 %v4828_v10, %v6212_v55 }
 0x25f   : > { %3721 = vst.msk [vmem:[%s6288_s22 + $0x1c] sm:$0xf] %vm3713_vm1, %v4201_v46  ;;  %v3459_v8 = vadd.f32 %v3458_v56, %v3298_v24  ;;  %v3301_v29 = vadd.f32 %v4831_v16, %v6214_v61 }
 0x261   : > { %v3561_v20 = vmax.f32 %v3459_v8, 0.0  ;;  %v3462_v22 = vadd.f32 %v3461_v0, %v3301_v29  ;;  %v4832_v12 = vpop.f32.mrb[180].mxu1  ;;  %v3466_v2 = vpop.f32.mrb[180].mxu0 }
 0x262   : > { %v4833_v1 = vpop.f32.mrb[181].mxu1  ;;  %v3468_v38 = vpop.f32.mrb[181].mxu0 }
 0x263   : > { %v4202_v51 = vpack.c.bf16 %v3561_v20, %v3561_v20  ;;  %v3562_v18 = vmax.f32 %v3462_v22, 0.0  ;;  %v4834_v47 = vadd.f32 %v4833_v1, %v4832_v12  ;;  %v4835_v32 = vpop.f32.mrb[182].mxu1  ;;  %v3469_v43 = vpop.f32.mrb[182].mxu0 }
 0x264   : > { %v4836_v45 = vpop.f32.mrb[183].mxu1  ;;  %v3471_v55 = vpop.f32.mrb[183].mxu0 }
 0x265   : > { %3722 = vst.msk [vmem:[%s6288_s22 + $0x20] sm:$0xf] %vm3713_vm1, %v4202_v51  ;;  %v4203_v19 = vpack.c.bf16 %v3562_v18, %v3562_v18  ;;  %v4837_v36 = vadd.f32 %v4836_v45, %v4835_v32  ;;  %v3306_v61 = vadd.f32 %v4834_v47, %v6218_v21 }
 0x267   : > { %3723 = vst.msk [vmem:[%s6288_s22 + $0x24] sm:$0xf] %vm3713_vm1, %v4203_v19  ;;  %v3467_v63 = vadd.f32 %v3466_v2, %v3306_v61  ;;  %v3309_v14 = vadd.f32 %v4837_v36, %v6220_v40 }
 0x269   : > { %v3563_v27 = vmax.f32 %v3467_v63, 0.0  ;;  %v3470_v26 = vadd.f32 %v3469_v43, %v3309_v14  ;;  %v4838_v60 = vpop.f32.mrb[184].mxu1  ;;  %v3474_v49 = vpop.f32.mrb[184].mxu0 }
 0x26a   : > { %v4839_v4 = vpop.f32.mrb[185].mxu1  ;;  %v3476_v48 = vpop.f32.mrb[185].mxu0 }
 0x26b   : > { %v4204_v53 = vpack.c.bf16 %v3563_v27, %v3563_v27  ;;  %v3564_v57 = vmax.f32 %v3470_v26, 0.0  ;;  %v4840_v7 = vadd.f32 %v4839_v4, %v4838_v60  ;;  %v4841_v56 = vpop.f32.mrb[186].mxu1  ;;  %v3477_v31 = vpop.f32.mrb[186].mxu0 }
 0x26c   : > { %v4842_v59 = vpop.f32.mrb[187].mxu1  ;;  %v3479_v21 = vpop.f32.mrb[187].mxu0 }
 0x26d   : > { %3724 = vst.msk [vmem:[%s6288_s22 + $0x28] sm:$0xf] %vm3713_vm1, %v4204_v53  ;;  %v4205_v17 = vpack.c.bf16 %v3564_v57, %v3564_v57  ;;  %v4843_v41 = vadd.f32 %v4842_v59, %v4841_v56  ;;  %v3314_v40 = vadd.f32 %v4840_v7, %v6224_v52 }
 0x26f   : > { %3725 = vst.msk [vmem:[%s6288_s22 + $0x2c] sm:$0xf] %vm3713_vm1, %v4205_v17  ;;  %v3475_v10 = vadd.f32 %v3474_v49, %v3314_v40  ;;  %v3317_v6 = vadd.f32 %v4843_v41, %v6226_v44 }
 0x271   : > { %v3565_v0 = vmax.f32 %v3475_v10, 0.0  ;;  %v3478_v28 = vadd.f32 %v3477_v31, %v3317_v6  ;;  %v4844_v50 = vpop.f32.mrb[188].mxu1  ;;  %v3482_v46 = vpop.f32.mrb[188].mxu0 }
 0x272   : > { %v4845_v16 = vpop.f32.mrb[189].mxu1  ;;  %v3484_v24 = vpop.f32.mrb[189].mxu0 }
 0x273   : > { %v4206_v8 = vpack.c.bf16 %v3565_v0, %v3565_v0  ;;  %v3566_v29 = vmax.f32 %v3478_v28, 0.0  ;;  %v4846_v20 = vadd.f32 %v4845_v16, %v4844_v50  ;;  %v4847_v22 = vpop.f32.mrb[190].mxu1  ;;  %v3485_v12 = vpop.f32.mrb[190].mxu0 }
 0x274   : > { %v4848_v2 = vpop.f32.mrb[191].mxu1  ;;  %v3487_v52 = vpop.f32.mrb[191].mxu0 }
 0x275   : > { %3726 = vst.msk [vmem:[%s6288_s22 + $0x30] sm:$0xf] %vm3713_vm1, %v4206_v8  ;;  %v4207_v1 = vpack.c.bf16 %v3566_v29, %v3566_v29  ;;  %v4849_v38 = vadd.f32 %v4848_v2, %v4847_v22  ;;  %v3322_v44 = vadd.f32 %v4846_v20, %v6230_v13 }
 0x277   : > { %3727 = vst.msk [vmem:[%s6288_s22 + $0x34] sm:$0xf] %vm3713_vm1, %v4207_v1  ;;  %v3483_v51 = vadd.f32 %v3482_v46, %v3322_v44  ;;  %v3325_v18 = vadd.f32 %v4849_v38, %v6232_v23 }
 0x279   : > { %v3567_v47 = vmax.f32 %v3483_v51, 0.0  ;;  %v3486_v32 = vadd.f32 %v3485_v12, %v3325_v18  ;;  %v4850_v43 = vpop.f32.mrb[192].mxu1  ;;  %v3490_v45 = vpop.f32.mrb[192].mxu0 }
 0x27a   : > { %v4851_v55 = vpop.f32.mrb[193].mxu1  ;;  %v3492_v19 = vpop.f32.mrb[193].mxu0 }
 0x27b   : > { %v4208_v36 = vpack.c.bf16 %v3567_v47, %v3567_v47  ;;  %v3568_v61 = vmax.f32 %v3486_v32, 0.0  ;;  %v4852_v63 = vadd.f32 %v4851_v55, %v4850_v43  ;;  %v4853_v14 = vpop.f32.mrb[194].mxu1  ;;  %v3493_v27 = vpop.f32.mrb[194].mxu0 }
 0x27c   : > { %v4854_v26 = vpop.f32.mrb[195].mxu1  ;;  %v3495_v13 = vpop.f32.mrb[195].mxu0 }
 0x27d   : > { %3728 = vst.msk [vmem:[%s6288_s22 + $0x38] sm:$0xf] %vm3713_vm1, %v4208_v36  ;;  %v4209_v60 = vpack.c.bf16 %v3568_v61, %v3568_v61  ;;  %v4855_v49 = vadd.f32 %v4854_v26, %v4853_v14  ;;  %v3330_v23 = vadd.f32 %v4852_v63, %v6236_v9 }
 0x27f   : > { %3729 = vst.msk [vmem:[%s6288_s22 + $0x3c] sm:$0xf] %vm3713_vm1, %v4209_v60  ;;  %v3491_v4 = vadd.f32 %v3490_v45, %v3330_v23  ;;  %v3333_v48 = vadd.f32 %v4855_v49, %v6238_v42 }
 0x281   : > { %v3569_v53 = vmax.f32 %v3491_v4, 0.0  ;;  %v3494_v57 = vadd.f32 %v3493_v27, %v3333_v48  ;;  %v4856_v7 = vpop.f32.mrb[196].mxu1  ;;  %v3498_v56 = vpop.f32.mrb[196].mxu0 }
 0x282   : > { %v4857_v31 = vpop.f32.mrb[197].mxu1  ;;  %v3500_v59 = vpop.f32.mrb[197].mxu0 }
 0x283   : > { %v4210_v21 = vpack.c.bf16 %v3569_v53, %v3569_v53  ;;  %v3570_v17 = vmax.f32 %v3494_v57, 0.0  ;;  %v4858_v41 = vadd.f32 %v4857_v31, %v4856_v7  ;;  %v4859_v40 = vpop.f32.mrb[198].mxu1  ;;  %v3501_v10 = vpop.f32.mrb[198].mxu0 }
 0x284   : > { %v4860_v6 = vpop.f32.mrb[199].mxu1  ;;  %v3503_v9 = vpop.f32.mrb[199].mxu0 }
 0x285   : > { %3730 = vst.msk [vmem:[%s6288_s22 + $0x40] sm:$0xf] %vm3713_vm1, %v4210_v21  ;;  %v4211_v0 = vpack.c.bf16 %v3570_v17, %v3570_v17  ;;  %v4861_v28 = vadd.f32 %v4860_v6, %v4859_v40  ;;  %v3338_v42 = vadd.f32 %v4858_v41, %v6242_v34 }
 0x287   : > { %3731 = vst.msk [vmem:[%s6288_s22 + $0x44] sm:$0xf] %vm3713_vm1, %v4211_v0  ;;  %v3499_v50 = vadd.f32 %v3498_v56, %v3338_v42  ;;  %v3341_v46 = vadd.f32 %v4861_v28, %v6244_v5 }
 0x289   : > { %v3571_v16 = vmax.f32 %v3499_v50, 0.0  ;;  %v3502_v24 = vadd.f32 %v3501_v10, %v3341_v46  ;;  %v4862_v8 = vpop.f32.mrb[200].mxu1  ;;  %v3506_v29 = vpop.f32.mrb[200].mxu0 }
 0x28a   : > { %v4863_v20 = vpop.f32.mrb[201].mxu1  ;;  %v3508_v22 = vpop.f32.mrb[201].mxu0 }
 0x28b   : > { %v4212_v12 = vpack.c.bf16 %v3571_v16, %v3571_v16  ;;  %v3572_v2 = vmax.f32 %v3502_v24, 0.0  ;;  %v4864_v52 = vadd.f32 %v4863_v20, %v4862_v8  ;;  %v4865_v1 = vpop.f32.mrb[202].mxu1  ;;  %v3509_v38 = vpop.f32.mrb[202].mxu0 }
 0x28c   : > { %v4866_v44 = vpop.f32.mrb[203].mxu1  ;;  %v3511_v34 = vpop.f32.mrb[203].mxu0 }
 0x28d   : > { %3732 = vst.msk [vmem:[%s6288_s22 + $0x48] sm:$0xf] %vm3713_vm1, %v4212_v12  ;;  %v4213_v51 = vpack.c.bf16 %v3572_v2, %v3572_v2  ;;  %v4867_v18 = vadd.f32 %v4866_v44, %v4865_v1  ;;  %v3346_v5 = vadd.f32 %v4864_v52, %v6248_v25 }
 0x28f   : > { %3733 = vst.msk [vmem:[%s6288_s22 + $0x4c] sm:$0xf] %vm3713_vm1, %v4213_v51  ;;  %v3507_v47 = vadd.f32 %v3506_v29, %v3346_v5  ;;  %v3349_v32 = vadd.f32 %v4867_v18, %v6250_v62 }
 0x291   : > { %v3573_v43 = vmax.f32 %v3507_v47, 0.0  ;;  %v3510_v45 = vadd.f32 %v3509_v38, %v3349_v32  ;;  %v4868_v55 = vpop.f32.mrb[204].mxu1  ;;  %v3514_v19 = vpop.f32.mrb[204].mxu0 }
 0x292   : > { %v4869_v36 = vpop.f32.mrb[205].mxu1  ;;  %v3516_v61 = vpop.f32.mrb[205].mxu0 }
 0x293   : > { %v4214_v63 = vpack.c.bf16 %v3573_v43, %v3573_v43  ;;  %v3574_v14 = vmax.f32 %v3510_v45, 0.0  ;;  %v4870_v27 = vadd.f32 %v4869_v36, %v4868_v55  ;;  %v4871_v26 = vpop.f32.mrb[206].mxu1  ;;  %v3517_v13 = vpop.f32.mrb[206].mxu0 }
 0x294   : > { %v4872_v60 = vpop.f32.mrb[207].mxu1  ;;  %v3519_v25 = vpop.f32.mrb[207].mxu0 }
 0x295   : > { %3734 = vst.msk [vmem:[%s6288_s22 + $0x50] sm:$0xf] %vm3713_vm1, %v4214_v63  ;;  %v4215_v49 = vpack.c.bf16 %v3574_v14, %v3574_v14  ;;  %v4873_v23 = vadd.f32 %v4872_v60, %v4871_v26  ;;  %v3354_v62 = vadd.f32 %v4870_v27, %v6254_v39 }
 0x297   : > { %3735 = vst.msk [vmem:[%s6288_s22 + $0x54] sm:$0xf] %vm3713_vm1, %v4215_v49  ;;  %v3515_v4 = vadd.f32 %v3514_v19, %v3354_v62  ;;  %v3357_v48 = vadd.f32 %v4873_v23, %v6256_v3 }
 0x299   : > { %v3575_v53 = vmax.f32 %v3515_v4, 0.0  ;;  %v3518_v57 = vadd.f32 %v3517_v13, %v3357_v48  ;;  %v4874_v7 = vpop.f32.mrb[208].mxu1  ;;  %v3522_v56 = vpop.f32.mrb[208].mxu0 }
 0x29a   : > { %v4875_v31 = vpop.f32.mrb[209].mxu1  ;;  %v3524_v59 = vpop.f32.mrb[209].mxu0 }
 0x29b   : > { %v4216_v21 = vpack.c.bf16 %v3575_v53, %v3575_v53  ;;  %v3576_v17 = vmax.f32 %v3518_v57, 0.0  ;;  %v4876_v41 = vadd.f32 %v4875_v31, %v4874_v7  ;;  %v4877_v40 = vpop.f32.mrb[210].mxu1  ;;  %v3525_v10 = vpop.f32.mrb[210].mxu0 }
 0x29c   : > { %v4878_v6 = vpop.f32.mrb[211].mxu1  ;;  %v3527_v39 = vpop.f32.mrb[211].mxu0 }
 0x29d   : > { %3736 = vst.msk [vmem:[%s6288_s22 + $0x58] sm:$0xf] %vm3713_vm1, %v4216_v21  ;;  %v4217_v9 = vpack.c.bf16 %v3576_v17, %v3576_v17  ;;  %v4879_v0 = vadd.f32 %v4878_v6, %v4877_v40  ;;  %v3362_v3 = vadd.f32 %v4876_v41, %v6260_v11 }
 0x29f   : > { %3737 = vst.msk [vmem:[%s6288_s22 + $0x5c] sm:$0xf] %vm3713_vm1, %v4217_v9  ;;  %v3523_v28 = vadd.f32 %v3522_v56, %v3362_v3  ;;  %v3365_v42 = vadd.f32 %v4879_v0, %v6262_v30 }
 0x2a1   : > { %v3577_v50 = vmax.f32 %v3523_v28, 0.0  ;;  %v3526_v46 = vadd.f32 %v3525_v10, %v3365_v42  ;;  %v4880_v16 = vpop.f32.mrb[212].mxu1  ;;  %v3530_v24 = vpop.f32.mrb[212].mxu0 }
 0x2a2   : > { %v4881_v8 = vpop.f32.mrb[213].mxu1  ;;  %v3532_v29 = vpop.f32.mrb[213].mxu0 }
 0x2a3   : > { %v4218_v20 = vpack.c.bf16 %v3577_v50, %v3577_v50  ;;  %v3578_v22 = vmax.f32 %v3526_v46, 0.0  ;;  %v4882_v12 = vadd.f32 %v4881_v8, %v4880_v16  ;;  %v4883_v2 = vpop.f32.mrb[214].mxu1  ;;  %v3533_v52 = vpop.f32.mrb[214].mxu0 }
 0x2a4   : > { %v4884_v1 = vpop.f32.mrb[215].mxu1  ;;  %v3535_v11 = vpop.f32.mrb[215].mxu0 }
 0x2a5   : > { %3738 = vst.msk [vmem:[%s6288_s22 + $0x60] sm:$0xf] %vm3713_vm1, %v4218_v20  ;;  %v4219_v38 = vpack.c.bf16 %v3578_v22, %v3578_v22  ;;  %v4885_v44 = vadd.f32 %v4884_v1, %v4883_v2  ;;  %v3370_v30 = vadd.f32 %v4882_v12, %v6266_v35 }
 0x2a7   : > { %3739 = vst.msk [vmem:[%s6288_s22 + $0x64] sm:$0xf] %vm3713_vm1, %v4219_v38  ;;  %v3531_v34 = vadd.f32 %v3530_v24, %v3370_v30  ;;  %v3373_v51 = vadd.f32 %v4885_v44, %v6268_v37 }
 0x2a9   : > { %v3579_v18 = vmax.f32 %v3531_v34, 0.0  ;;  %v3534_v5 = vadd.f32 %v3533_v52, %v3373_v51  ;;  %v4886_v47 = vpop.f32.mrb[216].mxu1  ;;  %v3538_v32 = vpop.f32.mrb[216].mxu0 }
 0x2aa   : > { %v4887_v43 = vpop.f32.mrb[217].mxu1  ;;  %v3540_v45 = vpop.f32.mrb[217].mxu0 }
 0x2ab   : > { %v4220_v55 = vpack.c.bf16 %v3579_v18, %v3579_v18  ;;  %v3580_v19 = vmax.f32 %v3534_v5, 0.0  ;;  %v4888_v36 = vadd.f32 %v4887_v43, %v4886_v47  ;;  %v4889_v61 = vpop.f32.mrb[218].mxu1  ;;  %v3541_v63 = vpop.f32.mrb[218].mxu0 }
 0x2ac   : > { %v4890_v14 = vpop.f32.mrb[219].mxu1  ;;  %v3543_v35 = vpop.f32.mrb[219].mxu0 }
 0x2ad   : > { %3740 = vst.msk [vmem:[%s6288_s22 + $0x68] sm:$0xf] %vm3713_vm1, %v4220_v55  ;;  %v4221_v27 = vpack.c.bf16 %v3580_v19, %v3580_v19  ;;  %v4891_v26 = vadd.f32 %v4890_v14, %v4889_v61  ;;  %v3378_v37 = vadd.f32 %v4888_v36, %v6272_v58 }
 0x2af   : > { %3741 = vst.msk [vmem:[%s6288_s22 + $0x6c] sm:$0xf] %vm3713_vm1, %v4221_v27  ;;  %v3539_v13 = vadd.f32 %v3538_v32, %v3378_v37  ;;  %v3381_v60 = vadd.f32 %v4891_v26, %v6274_v33 }
 0x2b1   : > { %v3581_v25 = vmax.f32 %v3539_v13, 0.0  ;;  %v3542_v49 = vadd.f32 %v3541_v63, %v3381_v60  ;;  %v4892_v23 = vpop.f32.mrb[220].mxu1  ;;  %v3546_v62 = vpop.f32.mrb[220].mxu0 }
 0x2b2   : > { %v4893_v4 = vpop.f32.mrb[221].mxu1  ;;  %v3548_v48 = vpop.f32.mrb[221].mxu0 }
 0x2b3   : > { %v4222_v53 = vpack.c.bf16 %v3581_v25, %v3581_v25  ;;  %v3582_v57 = vmax.f32 %v3542_v49, 0.0  ;;  %v4894_v7 = vadd.f32 %v4893_v4, %v4892_v23  ;;  %v4895_v56 = vpop.f32.mrb[222].mxu1  ;;  %v3549_v31 = vpop.f32.mrb[222].mxu0 }
 0x2b4   : > { %v4896_v58 = vpop.f32.mrb[223].mxu1  ;;  %v3551_v59 = vpop.f32.mrb[223].mxu0 }
 0x2b5   : > { %3742 = vst.msk [vmem:[%s6288_s22 + $0x70] sm:$0xf] %vm3713_vm1, %v4222_v53  ;;  %v4223_v21 = vpack.c.bf16 %v3582_v57, %v3582_v57  ;;  %v4897_v33 = vadd.f32 %v4896_v58, %v4895_v56  ;;  %v3386_v17 = vadd.f32 %v4894_v7, %v6278_v15 }
 0x2b7   : > { %3743 = vst.msk [vmem:[%s6288_s22 + $0x74] sm:$0xf] %vm3713_vm1, %v4223_v21  ;;  %v3547_v41 = vadd.f32 %v3546_v62, %v3386_v17  ;;  %v3389_v40 = vadd.f32 %v4897_v33, %v6280_v54 }
 0x2b9   : > { %v3583_v10 = vmax.f32 %v3547_v41, 0.0  ;;  %v3550_v6 = vadd.f32 %v3549_v31, %v3389_v40 }
 0x2bb   : > { %v4224_v39 = vpack.c.bf16 %v3583_v10, %v3583_v10  ;;  %v3584_v9 = vmax.f32 %v3550_v6, 0.0 }
 0x2bd   : > { %3744 = vst.msk [vmem:[%s6288_s22 + $0x78] sm:$0xf] %vm3713_vm1, %v4224_v39  ;;  %v4225_v0 = vpack.c.bf16 %v3584_v9, %v3584_v9 }
 0x2bf   : > { %3745 = vst.msk [vmem:[%s6288_s22 + $0x7c] sm:$0xf] %vm3713_vm1, %v4225_v0 }
 0x2c0 PF: > { %s13_s12 = sadd.s32 1, %s5374_s12  }
 0x2c1   : > { %p10_p4 = scmp.ge.s32.totalorder %s13_s12, 4  }
 0x2c3   :  { %12 = sbr.rel (!%p10_p4) target bundleno = 1 (0x1), region = 62 }

// kernel: expert_forward.8
= control target key start
LH: loop header
LB: loop body
LE: loop exit
PB: predicated region body
PF: predicated region fallthrough
CT: control target
= control target key end

     0   :  { %s1847_s12 = smov 0   ;;  %s2145_s0 = inlined_call_operand.vmem [shape: bf16[512,432], index: 0, kind: input, shape index: {}]   ;;  %s2146_s1 = inlined_call_operand.vmem [shape: bf16[432,16], index: 1, kind: input, shape index: {}]   ;;  %s2147_s2 = inlined_call_operand.vmem [shape: f32[1,16], index: 2, kind: input, shape index: {}]   ;;  %s2148_s3 = inlined_call_operand.vmem [shape: bf16[512,16], index: 3, kind: output, shape index: {}]  }
   0x1 LB: > { %s1389_s13 = sadd.s32 4294967295, %s1824_s12   ;;  %p1393_p0 = scmp.ge.s32.totalorder %s1824_s12, 1  ;;  %s1824_s12 = sphi %s1847_s12, %s13_s12  }
   0x2   : > { %p139_p1 = scmp.lt.s32.totalorder %s1824_s12, 3 }
   0x4   : > { %p140_p2 = pnand %p1393_p0, %p139_p1 }
   0x5   : > { %v1695_v0 = vld [vmem:[%s2146_s1 + $0x80] sm:$0xff] (!%p140_p2)   ;;  %v1826_v1 = vmov (!%p140_p2), 0   ;;  %v1698_v4 = vld [vmem:[%s2146_s1 + $0x88] sm:$0xff] (!%p140_p2)   ;;  %v1701_v7 = vld [vmem:[%s2146_s1 + $0x90] sm:$0xff] (!%p140_p2)   ;;  %s1394_s7 = sshll.u32 (!%p140_p2), %s1389_s13, 5  ;;  %vm769_vm0 = vcmask (!%p140_p2), 392192  }
   0x6   : > { %143 = sbr.rel (%p140_p2) target bundleno = 391 (0x187), region = 32  ;;  %979 = vmatprep.subr.bf16.mxu1 (!%p140_p2), %v1826_v1  ;;  %v1696_v2 = vld [vmem:[%s2146_s1 + $0x40] sm:$0xff] (!%p140_p2)   ;;  %v1699_v5 = vld [vmem:[%s2146_s1 + $0x48] sm:$0xff] (!%p140_p2)   ;;  %v1702_v8 = vld [vmem:[%s2146_s1 + $0x50] sm:$0xff] (!%p140_p2)   ;;  %p165_p3 = scmp.lt.s32.totalorder (!%p140_p2), %s1394_s7, 63  ;;  %vm1300_vm1 = vcmask (!%p140_p2), 125952  }
   0x7   : > { %980 = vmatpush1.bf16.msra.mxu1 (!%p140_p2), %v1695_v0  ;;  %v1697_v3 = vld [vmem:[%s2146_s1] sm:$0xff] (!%p140_p2)   ;;  %1574 = vmatprep.subr.bf16.mxu0 (!%p140_p2), %v1696_v2  ;;  %v1700_v6 = vld [vmem:[%s2146_s1 + $0x8] sm:$0xff] (!%p140_p2)   ;;  %v1703_v9 = vld [vmem:[%s2146_s1 + $0x10] sm:$0xff] (!%p140_p2)  }
   0x8   : > { %981 = vmatprep.subr.bf16.mxu1 (!%p140_p2), %v1826_v1  ;;  %1575 = vmatpush3.bf16.msra.mxu0 (!%p140_p2), %v1697_v3  ;;  %v1704_v10 = vld [vmem:[%s2146_s1 + $0x98] sm:$0xff] (!%p140_p2)   ;;  %v1708_v13 = vld [vmem:[%s2146_s1 + $0x60] sm:$0xff] (!%p140_p2)   ;;  %v1711_v16 = vld [vmem:[%s2146_s1 + $0x68] sm:$0xff] (!%p140_p2)  }
   0x9   : > { %1576 = vmatprep.subr.bf16.mxu0 (!%p140_p2), %v1699_v5  ;;  %v1705_v11 = vld [vmem:[%s2146_s1 + $0x58] sm:$0xff] (!%p140_p2)   ;;  %v1707_v14 = vld [vmem:[%s2146_s1 + $0xa0] sm:$0xff] (!%p140_p2)   ;;  %v1710_v17 = vld [vmem:[%s2146_s1 + $0xa8] sm:$0xff] (!%p140_p2)  }
   0xa   : > { %v1706_v12 = vld [vmem:[%s2146_s1 + $0x18] sm:$0xff] (!%p140_p2)   ;;  %v1709_v15 = vld [vmem:[%s2146_s1 + $0x20] sm:$0xff] (!%p140_p2)   ;;  %v1712_v18 = vld [vmem:[%s2146_s1 + $0x28] sm:$0xff] (!%p140_p2)  }
   0xb   : > { %982 = vmatpush1.bf16.msra.mxu1 (!%p140_p2), %v1698_v4  ;;  %v1714_v19 = vld [vmem:[%s2146_s1 + $0x70] sm:$0xff] (!%p140_p2)   ;;  %v1716_v22 = vld [vmem:[%s2146_s1 + $0xb8] sm:$0xff] (!%p140_p2)   ;;  %v1719_v26 = vld [vmem:[%s2146_s1 + $0xc0] sm:$0xff] (!%p140_p2)  }
   0xc   : > { %983 = vmatprep.subr.bf16.mxu1 (!%p140_p2), %v1826_v1  ;;  %1577 = vmatpush3.bf16.msra.mxu0 (!%p140_p2), %v1700_v6  ;;  %v1713_v20 = vld [vmem:[%s2146_s1 + $0xb0] sm:$0xff] (!%p140_p2)   ;;  %v1717_v23 = vld [vmem:[%s2146_s1 + $0x78] sm:$0xff] (!%p140_p2)   ;;  %v1723_v30 = vld [vmem:[%s2146_s1 + $0xc8] sm:$0xff] (!%p140_p2)  }
   0xd   : > { %1578 = vmatprep.subr.bf16.mxu0 %v1702_v8  ;;  %s2150_s7 = smov (!%p165_p3, %s1394_s7), 63  ;;  %v1715_v21 = vld [vmem:[%s2146_s1 + $0x30] sm:$0xff]   ;;  %v1718_v25 = vld [vmem:[%s2146_s1 + $0x38] sm:$0xff]  }
   0xe   : > { %s1541_s25 = sshll.u32 %s2150_s7, 4  ;;  %v1724_v31 = vld [vmem:[%s2146_s1 + $0xd0] sm:$0xff]   ;;  %s1398_s24 = sshll.u32 %s2150_s7, 2 }
   0xf   : > { %984 = vmatpush1.bf16.msra.mxu1 %v1701_v7  ;;  %s1931_s8 = scalar_lea.vmem %s2145_s0, %s1541_s25  ;;  %s2046_s27 = scalar_lea.vmem %s2148_s3, %s1398_s24 }
  0x10   : > { %985 = vmatprep.subr.bf16.mxu1 %v1826_v1  ;;  %1579 = vmatpush3.bf16.msra.mxu0 %v1703_v9  ;;  %v1722_v24 = vld [vmem:[%s1931_s8 + $0x4] ss:$16 sps:$4 sm:$0xff]   ;;  %v1729_v27 = vld [vmem:[%s1931_s8 + $0xc] ss:$16 sps:$4 sm:$0xff]   ;;  %v1720_v28 = vld [vmem:[%s1931_s8] ss:$16 sps:$4 sm:$0xff]  }
  0x11   : > { %1580 = vmatprep.subr.bf16.mxu0 %v1705_v11  ;;  %850 = vmatprep.mubr.bf16.mxu0 %v1722_v24  ;;  %v1725_v29 = vld [vmem:[%s1931_s8 + $0x24] ss:$16 sps:$4 sm:$0xff]   ;;  %v1730_v32 = vld [vmem:[%s1931_s8 + $0x20] ss:$16 sps:$4 sm:$0xff]   ;;  %v1727_v34 = vld [vmem:[%s1931_s8 + $0x8] ss:$16 sps:$4 sm:$0xff]  }
  0x12   : > { %1491 = vmatprep.mubr.msk.bf16.mxu1 %vm769_vm0, %v1729_v27  ;;  %v1731_v33 = vld [vmem:[%s1931_s8 + $0x44] ss:$16 sps:$4 sm:$0xff]   ;;  %v1733_v35 = vld [vmem:[%s1931_s8 + $0x2c] ss:$16 sps:$4 sm:$0xff]   ;;  %v1735_v36 = vld [vmem:[%s1931_s8 + $0x40] ss:$16 sps:$4 sm:$0xff]  }
  0x13   : > { %986 = vmatpush1.bf16.msra.mxu1 %v1704_v10  ;;  %v1737_v37 = vld [vmem:[%s1931_s8 + $0x64] ss:$16 sps:$4 sm:$0xff]   ;;  %v1736_v38 = vld [vmem:[%s1931_s8 + $0x28] ss:$16 sps:$4 sm:$0xff]   ;;  %v1739_v39 = vld [vmem:[%s1931_s8 + $0x4c] ss:$16 sps:$4 sm:$0xff]  }
  0x14   : > { %987 = vmatprep.subr.bf16.mxu1 %v1826_v1  ;;  %1581 = vmatpush3.bf16.msra.mxu0 %v1706_v12  ;;  %v1741_v40 = vld [vmem:[%s1931_s8 + $0x60] ss:$16 sps:$4 sm:$0xff]   ;;  %v1743_v41 = vld [vmem:[%s1931_s8 + $0x84] ss:$16 sps:$4 sm:$0xff]   ;;  %v1742_v42 = vld [vmem:[%s1931_s8 + $0x48] ss:$16 sps:$4 sm:$0xff]  }
  0x15   : > { %1582 = vmatprep.subr.bf16.mxu0 %v1708_v13  ;;  %v1745_v43 = vld [vmem:[%s1931_s8 + $0x6c] ss:$16 sps:$4 sm:$0xff]   ;;  %v1747_v44 = vld [vmem:[%s1931_s8 + $0x80] ss:$16 sps:$4 sm:$0xff]   ;;  %v1749_v45 = vld [vmem:[%s1931_s8 + $0xa4] ss:$16 sps:$4 sm:$0xff]  }
  0x16   : > { %v1748_v46 = vld [vmem:[%s1931_s8 + $0x68] ss:$16 sps:$4 sm:$0xff]   ;;  %v1751_v47 = vld [vmem:[%s1931_s8 + $0x8c] ss:$16 sps:$4 sm:$0xff]   ;;  %v1753_v48 = vld [vmem:[%s1931_s8 + $0xa0] ss:$16 sps:$4 sm:$0xff]  }
  0x17   : > { %988 = vmatpush1.bf16.msra.mxu1 %v1707_v14  ;;  %v1755_v49 = vld [vmem:[%s1931_s8 + $0xc4] ss:$16 sps:$4 sm:$0xff]   ;;  %v1754_v50 = vld [vmem:[%s1931_s8 + $0x88] ss:$16 sps:$4 sm:$0xff]   ;;  %v1757_v51 = vld [vmem:[%s1931_s8 + $0xac] ss:$16 sps:$4 sm:$0xff]  }
  0x18   : > { %989 = vmatprep.subr.bf16.mxu1 %v1826_v1  ;;  %1583 = vmatpush3.bf16.msra.mxu0 %v1709_v15  ;;  %v1759_v52 = vld [vmem:[%s1931_s8 + $0xc0] ss:$16 sps:$4 sm:$0xff]   ;;  %v1761_v53 = vld [vmem:[%s1931_s8 + $0xe4] ss:$16 sps:$4 sm:$0xff]   ;;  %v1760_v54 = vld [vmem:[%s1931_s8 + $0xa8] ss:$16 sps:$4 sm:$0xff]  }
  0x19   : > { %1584 = vmatprep.subr.bf16.mxu0 %v1711_v16  ;;  %v1763_v55 = vld [vmem:[%s1931_s8 + $0xcc] ss:$16 sps:$4 sm:$0xff]   ;;  %v1765_v56 = vld [vmem:[%s1931_s8 + $0xe0] ss:$16 sps:$4 sm:$0xff]   ;;  %v1767_v57 = vld [vmem:[%s1931_s8 + $0x104] ss:$16 sps:$4 sm:$0xff]  }
  0x1a   : > { %v1766_v58 = vld [vmem:[%s1931_s8 + $0xc8] ss:$16 sps:$4 sm:$0xff]   ;;  %v1769_v59 = vld [vmem:[%s1931_s8 + $0xec] ss:$16 sps:$4 sm:$0xff]   ;;  %v1771_v60 = vld [vmem:[%s1931_s8 + $0x100] ss:$16 sps:$4 sm:$0xff]  }
  0x1b   : > { %990 = vmatpush1.bf16.msra.mxu1 %v1710_v17  ;;  %v1773_v61 = vld [vmem:[%s1931_s8 + $0x124] ss:$16 sps:$4 sm:$0xff]   ;;  %v1772_v62 = vld [vmem:[%s1931_s8 + $0xe8] ss:$16 sps:$4 sm:$0xff]   ;;  %v1775_v63 = vld [vmem:[%s1931_s8 + $0x10c] ss:$16 sps:$4 sm:$0xff]  }
  0x1c   : > { %991 = vmatprep.subr.bf16.mxu1 %v1826_v1  ;;  %1585 = vmatpush3.bf16.msra.mxu0 %v1712_v18  ;;  %v1777_v0 = vld [vmem:[%s1931_s8 + $0x120] ss:$16 sps:$4 sm:$0xff]   ;;  %v1778_v2 = vld [vmem:[%s1931_s8 + $0x108] ss:$16 sps:$4 sm:$0xff]   ;;  %v1781_v3 = vld [vmem:[%s1931_s8 + $0x12c] ss:$16 sps:$4 sm:$0xff]  }
  0x1d   : > { %1586 = vmatprep.subr.bf16.mxu0 %v1714_v19  ;;  %v1783_v4 = vld [vmem:[%s1931_s8 + $0x140] ss:$16 sps:$4 sm:$0xff]   ;;  %v1785_v5 = vld [vmem:[%s1931_s8 + $0x164] ss:$16 sps:$4 sm:$0xff]   ;;  %v1784_v6 = vld [vmem:[%s1931_s8 + $0x128] ss:$16 sps:$4 sm:$0xff]  }
  0x1e   : > { %v1787_v7 = vld [vmem:[%s1931_s8 + $0x14c] ss:$16 sps:$4 sm:$0xff]   ;;  %v1789_v8 = vld [vmem:[%s1931_s8 + $0x160] ss:$16 sps:$4 sm:$0xff]   ;;  %v1791_v9 = vld [vmem:[%s1931_s8 + $0x184] ss:$16 sps:$4 sm:$0xff]  }
  0x1f   : > { %992 = vmatpush1.bf16.msra.mxu1 %v1713_v20  ;;  %v1790_v10 = vld [vmem:[%s1931_s8 + $0x148] ss:$16 sps:$4 sm:$0xff]   ;;  %v1793_v11 = vld [vmem:[%s1931_s8 + $0x16c] ss:$16 sps:$4 sm:$0xff]   ;;  %v1795_v12 = vld [vmem:[%s1931_s8 + $0x180] ss:$16 sps:$4 sm:$0xff]  }
  0x20   : > { %993 = vmatprep.subr.bf16.mxu1 %v1826_v1  ;;  %1587 = vmatpush3.bf16.msra.mxu0 %v1715_v21  ;;  %v1797_v13 = vld [vmem:[%s1931_s8 + $0x1a4] ss:$16 sps:$4 sm:$0xff]   ;;  %v1796_v14 = vld [vmem:[%s1931_s8 + $0x168] ss:$16 sps:$4 sm:$0xff]   ;;  %v1799_v15 = vld [vmem:[%s1931_s8 + $0x18c] ss:$16 sps:$4 sm:$0xff]  }
  0x21   : > { %1588 = vmatprep.subr.bf16.mxu0 %v1717_v23  ;;  %v1801_v16 = vld [vmem:[%s1931_s8 + $0x1a0] ss:$16 sps:$4 sm:$0xff]   ;;  %v1803_v17 = vld [vmem:[%s1931_s8 + $0x1c4] ss:$16 sps:$4 sm:$0xff]   ;;  %v1802_v18 = vld [vmem:[%s1931_s8 + $0x188] ss:$16 sps:$4 sm:$0xff]  }
  0x22   : > { %v1805_v19 = vld [vmem:[%s1931_s8 + $0x1ac] ss:$16 sps:$4 sm:$0xff]   ;;  %v1807_v20 = vld [vmem:[%s1931_s8 + $0x1c0] ss:$16 sps:$4 sm:$0xff]   ;;  %v1809_v21 = vld [vmem:[%s1931_s8 + $0x1e4] ss:$16 sps:$4 sm:$0xff]  }
  0x23   : > { %994 = vmatpush1.bf16.msra.mxu1 %v1716_v22  ;;  %v1808_v22 = vld [vmem:[%s1931_s8 + $0x1a8] ss:$16 sps:$4 sm:$0xff]   ;;  %v1811_v23 = vld [vmem:[%s1931_s8 + $0x1cc] ss:$16 sps:$4 sm:$0xff]   ;;  %v1813_v24 = vld [vmem:[%s1931_s8 + $0x1e0] ss:$16 sps:$4 sm:$0xff]  }
  0x24   : > { %995 = vmatprep.subr.bf16.mxu1 %v1826_v1  ;;  %1589 = vmatpush3.bf16.msra.mxu0 %v1718_v25  ;;  %v1814_v25 = vld [vmem:[%s1931_s8 + $0x1c8] ss:$16 sps:$4 sm:$0xff]  }
  0x25   : > { %v1817_v27 = vld [vmem:[%s1931_s8 + $0x1e8] ss:$16 sps:$4 sm:$0xff]  }
  0x27   : > { %996 = vmatpush1.bf16.msra.mxu1 %v1719_v26  ;;  %851 = vmatmul.mubr.bf16.vlgmr.msra.gmra.mrb[0].mxu0 %v1720_v28  ;;  %v1815_v26 = vld [vmem:[%s1931_s8 + $0x1ec] ss:$16 sps:$4 sm:$0xff]  }
  0x28   : > { %997 = vmatprep.subr.bf16.mxu1 %v1826_v1  ;;  %858 = vmatprep.mubr.bf16.mxu0 %v1725_v29 }
  0x2b   : > { %998 = vmatpush1.bf16.msra.mxu1 %v1723_v30 }
  0x2c   : > { %999 = vmatprep.subr.bf16.mxu1 %v1826_v1  ;;  %v1779_v1 = vld [vmem:[%s1931_s8 + $0x144] ss:$16 sps:$4 sm:$0xff]  }
  0x2f   : > { %1000 = vmatpush1.bf16.msra.mxu1 %v1724_v31  ;;  %859 = vmatmul.mubr.bf16.gmra.mrb[4].mxu0 %v1730_v32 }
  0x30   : > { %866 = vmatprep.mubr.bf16.mxu0 %v1731_v33 }
  0x32   : > { %1012 = vmatmul.mubr.bf16.vlgmr.msra.gmra.mrb[0].mxu1 %v1727_v34  ;;  %v2038_v34 = vld [vmem:[%s2147_s2] ss:$0 sm:$0xff] }
  0x33   : > { %1492 = vmatprep.mubr.msk.bf16.mxu1 %vm769_vm0, %v1733_v35 }
  0x37   : > { %867 = vmatmul.mubr.bf16.gmra.mrb[8].mxu0 %v1735_v36 }
  0x38   : > { %874 = vmatprep.mubr.bf16.mxu0 %v1737_v37 }
  0x3a   : > { %1020 = vmatmul.mubr.bf16.gmra.mrb[4].mxu1 %v1736_v38 }
  0x3b   : > { %1493 = vmatprep.mubr.msk.bf16.mxu1 %vm769_vm0, %v1739_v39 }
  0x3f   : > { %875 = vmatmul.mubr.bf16.gmra.mrb[12].mxu0 %v1741_v40 }
  0x40   : > { %882 = vmatprep.mubr.bf16.mxu0 %v1743_v41 }
  0x42   : > { %1028 = vmatmul.mubr.bf16.gmra.mrb[8].mxu1 %v1742_v42 }
  0x43   : > { %1494 = vmatprep.mubr.msk.bf16.mxu1 %vm769_vm0, %v1745_v43 }
  0x47   : > { %883 = vmatmul.mubr.bf16.gmra.mrb[16].mxu0 %v1747_v44 }
  0x48   : > { %890 = vmatprep.mubr.bf16.mxu0 %v1749_v45 }
  0x4a   : > { %1036 = vmatmul.mubr.bf16.gmra.mrb[12].mxu1 %v1748_v46 }
  0x4b   : > { %1495 = vmatprep.mubr.msk.bf16.mxu1 %vm769_vm0, %v1751_v47 }
  0x4f   : > { %891 = vmatmul.mubr.bf16.gmra.mrb[20].mxu0 %v1753_v48 }
  0x50   : > { %898 = vmatprep.mubr.bf16.mxu0 %v1755_v49 }
  0x52   : > { %1044 = vmatmul.mubr.bf16.gmra.mrb[16].mxu1 %v1754_v50 }
  0x53   : > { %1496 = vmatprep.mubr.msk.bf16.mxu1 %vm769_vm0, %v1757_v51 }
  0x57   : > { %899 = vmatmul.mubr.bf16.gmra.mrb[24].mxu0 %v1759_v52 }
  0x58   : > { %906 = vmatprep.mubr.bf16.mxu0 %v1761_v53 }
  0x5a   : > { %1052 = vmatmul.mubr.bf16.gmra.mrb[20].mxu1 %v1760_v54 }
  0x5b   : > { %1497 = vmatprep.mubr.msk.bf16.mxu1 %vm769_vm0, %v1763_v55 }
  0x5f   : > { %907 = vmatmul.mubr.bf16.gmra.mrb[28].mxu0 %v1765_v56 }
  0x60   : > { %914 = vmatprep.mubr.bf16.mxu0 %v1767_v57 }
  0x62   : > { %1060 = vmatmul.mubr.bf16.gmra.mrb[24].mxu1 %v1766_v58 }
  0x63   : > { %1498 = vmatprep.mubr.msk.bf16.mxu1 %vm769_vm0, %v1769_v59 }
  0x67   : > { %915 = vmatmul.mubr.bf16.gmra.mrb[32].mxu0 %v1771_v60 }
  0x68   : > { %922 = vmatprep.mubr.bf16.mxu0 %v1773_v61 }
  0x6a   : > { %1068 = vmatmul.mubr.bf16.gmra.mrb[28].mxu1 %v1772_v62 }
  0x6b   : > { %1499 = vmatprep.mubr.msk.bf16.mxu1 %vm769_vm0, %v1775_v63 }
  0x6f   : > { %923 = vmatmul.mubr.bf16.gmra.mrb[36].mxu0 %v1777_v0 }
  0x70   : > { %930 = vmatprep.mubr.bf16.mxu0 %v1779_v1 }
  0x72   : > { %1076 = vmatmul.mubr.bf16.gmra.mrb[32].mxu1 %v1778_v2 }
  0x73   : > { %1500 = vmatprep.mubr.msk.bf16.mxu1 %vm769_vm0, %v1781_v3 }
  0x77   : > { %931 = vmatmul.mubr.bf16.gmra.mrb[40].mxu0 %v1783_v4 }
  0x78   : > { %938 = vmatprep.mubr.bf16.mxu0 %v1785_v5 }
  0x7a   : > { %1084 = vmatmul.mubr.bf16.gmra.mrb[36].mxu1 %v1784_v6 }
  0x7b   : > { %1501 = vmatprep.mubr.msk.bf16.mxu1 %vm769_vm0, %v1787_v7 }
  0x7f   : > { %939 = vmatmul.mubr.bf16.gmra.mrb[44].mxu0 %v1789_v8 }
  0x80   : > { %946 = vmatprep.mubr.bf16.mxu0 %v1791_v9 }
  0x82   : > { %1092 = vmatmul.mubr.bf16.gmra.mrb[40].mxu1 %v1790_v10 }
  0x83   : > { %1502 = vmatprep.mubr.msk.bf16.mxu1 %vm769_vm0, %v1793_v11 }
  0x87   : > { %947 = vmatmul.mubr.bf16.gmra.mrb[48].mxu0 %v1795_v12 }
  0x88   : > { %954 = vmatprep.mubr.bf16.mxu0 %v1797_v13 }
  0x8a   : > { %1100 = vmatmul.mubr.bf16.gmra.mrb[44].mxu1 %v1796_v14 }
  0x8b   : > { %1503 = vmatprep.mubr.msk.bf16.mxu1 %vm769_vm0, %v1799_v15 }
  0x8f   : > { %955 = vmatmul.mubr.bf16.gmra.mrb[52].mxu0 %v1801_v16 }
  0x90   : > { %962 = vmatprep.mubr.bf16.mxu0 %v1803_v17 }
  0x92   : > { %1108 = vmatmul.mubr.bf16.gmra.mrb[48].mxu1 %v1802_v18 }
  0x93   : > { %1504 = vmatprep.mubr.msk.bf16.mxu1 %vm769_vm0, %v1805_v19 }
  0x97   : > { %963 = vmatmul.mubr.bf16.gmra.mrb[56].mxu0 %v1807_v20 }
  0x98   : > { %970 = vmatprep.mubr.bf16.mxu0 %v1809_v21 }
  0x9a   : > { %1116 = vmatmul.mubr.bf16.gmra.mrb[52].mxu1 %v1808_v22 }
  0x9b   : > { %1505 = vmatprep.mubr.msk.bf16.mxu1 %vm769_vm0, %v1811_v23 }
  0x9f   : > { %971 = vmatmul.mubr.bf16.gmra.mrb[60].mxu0 %v1813_v24 }
  0xa2   : > { %1124 = vmatmul.mubr.bf16.gmra.mrb[56].mxu1 %v1814_v25 }
  0xa3   : > { %1506 = vmatprep.mubr.msk.bf16.mxu1 %vm769_vm0, %v1815_v26 }
  0xaa   : > { %1132 = vmatmul.mubr.bf16.gmra.mrb[60].mxu1 %v1817_v27 }
  0xfa   : > { %v1590_v28 = vpop.f32.mrb[0].mxu0 }
  0xfb   : > { %v1591_v29 = vpop.f32.mrb[1].mxu0 }
  0xfc   : > { %v1592_v30 = vadd.f32 %v1591_v29, %v1590_v28  ;;  %v1593_v31 = vpop.f32.mrb[2].mxu0 }
  0xfd   : > { %v1594_v32 = vpop.f32.mrb[3].mxu0 }
  0xfe   : > { %v1595_v33 = vadd.f32 %v1594_v32, %v1593_v31  ;;  %v853_v35 = vadd.f32 %v1592_v30, %v2038_v34 }
 0x100   : > { %v856_v43 = vadd.f32 %v1595_v33, %v2038_v34 }
 0x102   : > { %v1596_v36 = vpop.f32.mrb[4].mxu0 }
 0x103   : > { %v1597_v37 = vpop.f32.mrb[5].mxu0 }
 0x104   : > { %v1598_v39 = vadd.f32 %v1597_v37, %v1596_v36  ;;  %v1599_v40 = vpop.f32.mrb[6].mxu0 }
 0x105   : > { %v1013_v38 = vpop.f32.mrb[0].mxu1  ;;  %v1600_v44 = vpop.f32.mrb[7].mxu0 }
 0x106   : > { %v1014_v41 = vadd.f32 %v1013_v38, %v853_v35  ;;  %v1015_v42 = vpop.f32.mrb[1].mxu1  ;;  %v1601_v46 = vadd.f32 %v1600_v44, %v1599_v40  ;;  %v861_v52 = vadd.f32 %v1598_v39, %v2038_v34 }
 0x107   : > { %v1016_v45 = vpop.f32.mrb[2].mxu1 }
 0x108   : > { %v1140_v47 = vmax.f32 %v1014_v41, 0.0  ;;  %v1017_v48 = vadd.f32 %v1016_v45, %v856_v43  ;;  %v1018_v49 = vpop.f32.mrb[3].mxu1  ;;  %v864_v61 = vadd.f32 %v1601_v46, %v2038_v34 }
 0x10a   : > { %v1542_v50 = vpack.c.bf16 %v1140_v47, %v1140_v47  ;;  %v1141_v51 = vmax.f32 %v1017_v48, 0.0  ;;  %v1602_v53 = vpop.f32.mrb[8].mxu0 }
 0x10b   : > { %v1603_v55 = vpop.f32.mrb[9].mxu0 }
 0x10c   : > { %1301 = vst.msk [vmem:[%s2046_s27] sm:$0xf] %vm1300_vm1, %v1542_v50  ;;  %v1543_v54 = vpack.c.bf16 %v1141_v51, %v1141_v51  ;;  %v1604_v57 = vadd.f32 %v1603_v55, %v1602_v53  ;;  %v1605_v58 = vpop.f32.mrb[10].mxu0 }
 0x10d   : > { %v1021_v56 = vpop.f32.mrb[4].mxu1  ;;  %v1606_v62 = vpop.f32.mrb[11].mxu0 }
 0x10e   : > { %1302 = vst.msk [vmem:[%s2046_s27 + $0x4] sm:$0xf] %vm1300_vm1, %v1543_v54  ;;  %v1022_v59 = vadd.f32 %v1021_v56, %v861_v52  ;;  %v1023_v60 = vpop.f32.mrb[5].mxu1  ;;  %v1607_v0 = vadd.f32 %v1606_v62, %v1605_v58  ;;  %v869_v6 = vadd.f32 %v1604_v57, %v2038_v34 }
 0x10f   : > { %v1024_v63 = vpop.f32.mrb[6].mxu1 }
 0x110   : > { %v1142_v1 = vmax.f32 %v1022_v59, 0.0  ;;  %v1025_v2 = vadd.f32 %v1024_v63, %v864_v61  ;;  %v1026_v3 = vpop.f32.mrb[7].mxu1  ;;  %v872_v15 = vadd.f32 %v1607_v0, %v2038_v34 }
 0x112   : > { %v1544_v4 = vpack.c.bf16 %v1142_v1, %v1142_v1  ;;  %v1143_v5 = vmax.f32 %v1025_v2, 0.0  ;;  %v1608_v7 = vpop.f32.mrb[12].mxu0 }
 0x113   : > { %v1609_v9 = vpop.f32.mrb[13].mxu0 }
 0x114   : > { %1303 = vst.msk [vmem:[%s2046_s27 + $0x8] sm:$0xf] %vm1300_vm1, %v1544_v4  ;;  %v1545_v8 = vpack.c.bf16 %v1143_v5, %v1143_v5  ;;  %v1610_v11 = vadd.f32 %v1609_v9, %v1608_v7  ;;  %v1611_v12 = vpop.f32.mrb[14].mxu0 }
 0x115   : > { %v1029_v10 = vpop.f32.mrb[8].mxu1  ;;  %v1612_v16 = vpop.f32.mrb[15].mxu0 }
 0x116   : > { %1304 = vst.msk [vmem:[%s2046_s27 + $0xc] sm:$0xf] %vm1300_vm1, %v1545_v8  ;;  %v1030_v13 = vadd.f32 %v1029_v10, %v869_v6  ;;  %v1031_v14 = vpop.f32.mrb[9].mxu1  ;;  %v1613_v18 = vadd.f32 %v1612_v16, %v1611_v12  ;;  %v877_v24 = vadd.f32 %v1610_v11, %v2038_v34 }
 0x117   : > { %v1032_v17 = vpop.f32.mrb[10].mxu1 }
 0x118   : > { %v1144_v19 = vmax.f32 %v1030_v13, 0.0  ;;  %v1033_v20 = vadd.f32 %v1032_v17, %v872_v15  ;;  %v1034_v21 = vpop.f32.mrb[11].mxu1  ;;  %v880_v33 = vadd.f32 %v1613_v18, %v2038_v34 }
 0x11a   : > { %v1546_v22 = vpack.c.bf16 %v1144_v19, %v1144_v19  ;;  %v1145_v23 = vmax.f32 %v1033_v20, 0.0  ;;  %v1614_v25 = vpop.f32.mrb[16].mxu0 }
 0x11b   : > { %v1615_v27 = vpop.f32.mrb[17].mxu0 }
 0x11c   : > { %1305 = vst.msk [vmem:[%s2046_s27 + $0x10] sm:$0xf] %vm1300_vm1, %v1546_v22  ;;  %v1547_v26 = vpack.c.bf16 %v1145_v23, %v1145_v23  ;;  %v1616_v29 = vadd.f32 %v1615_v27, %v1614_v25  ;;  %v1617_v30 = vpop.f32.mrb[18].mxu0 }
 0x11d   : > { %v1037_v28 = vpop.f32.mrb[12].mxu1  ;;  %v1618_v35 = vpop.f32.mrb[19].mxu0 }
 0x11e   : > { %1306 = vst.msk [vmem:[%s2046_s27 + $0x14] sm:$0xf] %vm1300_vm1, %v1547_v26  ;;  %v1038_v31 = vadd.f32 %v1037_v28, %v877_v24  ;;  %v1039_v32 = vpop.f32.mrb[13].mxu1  ;;  %v1619_v37 = vadd.f32 %v1618_v35, %v1617_v30  ;;  %v885_v43 = vadd.f32 %v1616_v29, %v2038_v34 }
 0x11f   : > { %v1040_v36 = vpop.f32.mrb[14].mxu1 }
 0x120   : > { %v1146_v38 = vmax.f32 %v1038_v31, 0.0  ;;  %v1041_v39 = vadd.f32 %v1040_v36, %v880_v33  ;;  %v1042_v40 = vpop.f32.mrb[15].mxu1  ;;  %v888_v52 = vadd.f32 %v1619_v37, %v2038_v34 }
 0x122   : > { %v1548_v41 = vpack.c.bf16 %v1146_v38, %v1146_v38  ;;  %v1147_v42 = vmax.f32 %v1041_v39, 0.0  ;;  %v1620_v44 = vpop.f32.mrb[20].mxu0 }
 0x123   : > { %v1621_v46 = vpop.f32.mrb[21].mxu0 }
 0x124   : > { %1307 = vst.msk [vmem:[%s2046_s27 + $0x18] sm:$0xf] %vm1300_vm1, %v1548_v41  ;;  %v1549_v45 = vpack.c.bf16 %v1147_v42, %v1147_v42  ;;  %v1622_v48 = vadd.f32 %v1621_v46, %v1620_v44  ;;  %v1623_v49 = vpop.f32.mrb[22].mxu0 }
 0x125   : > { %v1045_v47 = vpop.f32.mrb[16].mxu1  ;;  %v1624_v53 = vpop.f32.mrb[23].mxu0 }
 0x126   : > { %1308 = vst.msk [vmem:[%s2046_s27 + $0x1c] sm:$0xf] %vm1300_vm1, %v1549_v45  ;;  %v1046_v50 = vadd.f32 %v1045_v47, %v885_v43  ;;  %v1047_v51 = vpop.f32.mrb[17].mxu1  ;;  %v1625_v55 = vadd.f32 %v1624_v53, %v1623_v49  ;;  %v893_v61 = vadd.f32 %v1622_v48, %v2038_v34 }
 0x127   : > { %v1048_v54 = vpop.f32.mrb[18].mxu1 }
 0x128   : > { %v1148_v56 = vmax.f32 %v1046_v50, 0.0  ;;  %v1049_v57 = vadd.f32 %v1048_v54, %v888_v52  ;;  %v1050_v58 = vpop.f32.mrb[19].mxu1  ;;  %v896_v6 = vadd.f32 %v1625_v55, %v2038_v34 }
 0x12a   : > { %v1550_v59 = vpack.c.bf16 %v1148_v56, %v1148_v56  ;;  %v1149_v60 = vmax.f32 %v1049_v57, 0.0  ;;  %v1626_v62 = vpop.f32.mrb[24].mxu0 }
 0x12b   : > { %v1627_v0 = vpop.f32.mrb[25].mxu0 }
 0x12c   : > { %1309 = vst.msk [vmem:[%s2046_s27 + $0x20] sm:$0xf] %vm1300_vm1, %v1550_v59  ;;  %v1551_v63 = vpack.c.bf16 %v1149_v60, %v1149_v60  ;;  %v1628_v2 = vadd.f32 %v1627_v0, %v1626_v62  ;;  %v1629_v3 = vpop.f32.mrb[26].mxu0 }
 0x12d   : > { %v1053_v1 = vpop.f32.mrb[20].mxu1  ;;  %v1630_v7 = vpop.f32.mrb[27].mxu0 }
 0x12e   : > { %1310 = vst.msk [vmem:[%s2046_s27 + $0x24] sm:$0xf] %vm1300_vm1, %v1551_v63  ;;  %v1054_v4 = vadd.f32 %v1053_v1, %v893_v61  ;;  %v1055_v5 = vpop.f32.mrb[21].mxu1  ;;  %v1631_v9 = vadd.f32 %v1630_v7, %v1629_v3  ;;  %v901_v15 = vadd.f32 %v1628_v2, %v2038_v34 }
 0x12f   : > { %v1056_v8 = vpop.f32.mrb[22].mxu1 }
 0x130   : > { %v1150_v10 = vmax.f32 %v1054_v4, 0.0  ;;  %v1057_v11 = vadd.f32 %v1056_v8, %v896_v6  ;;  %v1058_v12 = vpop.f32.mrb[23].mxu1  ;;  %v904_v24 = vadd.f32 %v1631_v9, %v2038_v34 }
 0x132   : > { %v1552_v13 = vpack.c.bf16 %v1150_v10, %v1150_v10  ;;  %v1151_v14 = vmax.f32 %v1057_v11, 0.0  ;;  %v1632_v16 = vpop.f32.mrb[28].mxu0 }
 0x133   : > { %v1633_v18 = vpop.f32.mrb[29].mxu0 }
 0x134   : > { %1311 = vst.msk [vmem:[%s2046_s27 + $0x28] sm:$0xf] %vm1300_vm1, %v1552_v13  ;;  %v1553_v17 = vpack.c.bf16 %v1151_v14, %v1151_v14  ;;  %v1634_v20 = vadd.f32 %v1633_v18, %v1632_v16  ;;  %v1635_v21 = vpop.f32.mrb[30].mxu0 }
 0x135   : > { %v1061_v19 = vpop.f32.mrb[24].mxu1  ;;  %v1636_v25 = vpop.f32.mrb[31].mxu0 }
 0x136   : > { %1312 = vst.msk [vmem:[%s2046_s27 + $0x2c] sm:$0xf] %vm1300_vm1, %v1553_v17  ;;  %v1062_v22 = vadd.f32 %v1061_v19, %v901_v15  ;;  %v1063_v23 = vpop.f32.mrb[25].mxu1  ;;  %v1637_v27 = vadd.f32 %v1636_v25, %v1635_v21  ;;  %v909_v33 = vadd.f32 %v1634_v20, %v2038_v34 }
 0x137   : > { %v1064_v26 = vpop.f32.mrb[26].mxu1 }
 0x138   : > { %v1152_v28 = vmax.f32 %v1062_v22, 0.0  ;;  %v1065_v29 = vadd.f32 %v1064_v26, %v904_v24  ;;  %v1066_v30 = vpop.f32.mrb[27].mxu1  ;;  %v912_v43 = vadd.f32 %v1637_v27, %v2038_v34 }
 0x13a   : > { %v1554_v31 = vpack.c.bf16 %v1152_v28, %v1152_v28  ;;  %v1153_v32 = vmax.f32 %v1065_v29, 0.0  ;;  %v1638_v35 = vpop.f32.mrb[32].mxu0 }
 0x13b   : > { %v1639_v37 = vpop.f32.mrb[33].mxu0 }
 0x13c   : > { %1313 = vst.msk [vmem:[%s2046_s27 + $0x30] sm:$0xf] %vm1300_vm1, %v1554_v31  ;;  %v1555_v36 = vpack.c.bf16 %v1153_v32, %v1153_v32  ;;  %v1640_v39 = vadd.f32 %v1639_v37, %v1638_v35  ;;  %v1641_v40 = vpop.f32.mrb[34].mxu0 }
 0x13d   : > { %v1069_v38 = vpop.f32.mrb[28].mxu1  ;;  %v1642_v44 = vpop.f32.mrb[35].mxu0 }
 0x13e   : > { %1314 = vst.msk [vmem:[%s2046_s27 + $0x34] sm:$0xf] %vm1300_vm1, %v1555_v36  ;;  %v1070_v41 = vadd.f32 %v1069_v38, %v909_v33  ;;  %v1071_v42 = vpop.f32.mrb[29].mxu1  ;;  %v1643_v46 = vadd.f32 %v1642_v44, %v1641_v40  ;;  %v917_v52 = vadd.f32 %v1640_v39, %v2038_v34 }
 0x13f   : > { %v1072_v45 = vpop.f32.mrb[30].mxu1 }
 0x140   : > { %v1154_v47 = vmax.f32 %v1070_v41, 0.0  ;;  %v1073_v48 = vadd.f32 %v1072_v45, %v912_v43  ;;  %v1074_v49 = vpop.f32.mrb[31].mxu1  ;;  %v920_v61 = vadd.f32 %v1643_v46, %v2038_v34 }
 0x142   : > { %v1556_v50 = vpack.c.bf16 %v1154_v47, %v1154_v47  ;;  %v1155_v51 = vmax.f32 %v1073_v48, 0.0  ;;  %v1644_v53 = vpop.f32.mrb[36].mxu0 }
 0x143   : > { %v1645_v55 = vpop.f32.mrb[37].mxu0 }
 0x144   : > { %1315 = vst.msk [vmem:[%s2046_s27 + $0x38] sm:$0xf] %vm1300_vm1, %v1556_v50  ;;  %v1557_v54 = vpack.c.bf16 %v1155_v51, %v1155_v51  ;;  %v1646_v57 = vadd.f32 %v1645_v55, %v1644_v53  ;;  %v1647_v58 = vpop.f32.mrb[38].mxu0 }
 0x145   : > { %v1077_v56 = vpop.f32.mrb[32].mxu1  ;;  %v1648_v62 = vpop.f32.mrb[39].mxu0 }
 0x146   : > { %1316 = vst.msk [vmem:[%s2046_s27 + $0x3c] sm:$0xf] %vm1300_vm1, %v1557_v54  ;;  %v1078_v59 = vadd.f32 %v1077_v56, %v917_v52  ;;  %v1079_v60 = vpop.f32.mrb[33].mxu1  ;;  %v1649_v0 = vadd.f32 %v1648_v62, %v1647_v58  ;;  %v925_v6 = vadd.f32 %v1646_v57, %v2038_v34 }
 0x147   : > { %v1080_v63 = vpop.f32.mrb[34].mxu1 }
 0x148   : > { %v1156_v1 = vmax.f32 %v1078_v59, 0.0  ;;  %v1081_v2 = vadd.f32 %v1080_v63, %v920_v61  ;;  %v1082_v3 = vpop.f32.mrb[35].mxu1  ;;  %v928_v15 = vadd.f32 %v1649_v0, %v2038_v34 }
 0x14a   : > { %v1558_v4 = vpack.c.bf16 %v1156_v1, %v1156_v1  ;;  %v1157_v5 = vmax.f32 %v1081_v2, 0.0  ;;  %v1650_v7 = vpop.f32.mrb[40].mxu0 }
 0x14b   : > { %v1651_v9 = vpop.f32.mrb[41].mxu0 }
 0x14c   : > { %1317 = vst.msk [vmem:[%s2046_s27 + $0x40] sm:$0xf] %vm1300_vm1, %v1558_v4  ;;  %v1559_v8 = vpack.c.bf16 %v1157_v5, %v1157_v5  ;;  %v1652_v11 = vadd.f32 %v1651_v9, %v1650_v7  ;;  %v1653_v12 = vpop.f32.mrb[42].mxu0 }
 0x14d   : > { %v1085_v10 = vpop.f32.mrb[36].mxu1  ;;  %v1654_v16 = vpop.f32.mrb[43].mxu0 }
 0x14e   : > { %1318 = vst.msk [vmem:[%s2046_s27 + $0x44] sm:$0xf] %vm1300_vm1, %v1559_v8  ;;  %v1086_v13 = vadd.f32 %v1085_v10, %v925_v6  ;;  %v1087_v14 = vpop.f32.mrb[37].mxu1  ;;  %v1655_v18 = vadd.f32 %v1654_v16, %v1653_v12  ;;  %v933_v24 = vadd.f32 %v1652_v11, %v2038_v34 }
 0x14f   : > { %v1088_v17 = vpop.f32.mrb[38].mxu1 }
 0x150   : > { %v1158_v19 = vmax.f32 %v1086_v13, 0.0  ;;  %v1089_v20 = vadd.f32 %v1088_v17, %v928_v15  ;;  %v1090_v21 = vpop.f32.mrb[39].mxu1  ;;  %v936_v33 = vadd.f32 %v1655_v18, %v2038_v34 }
 0x152   : > { %v1560_v22 = vpack.c.bf16 %v1158_v19, %v1158_v19  ;;  %v1159_v23 = vmax.f32 %v1089_v20, 0.0  ;;  %v1656_v25 = vpop.f32.mrb[44].mxu0 }
 0x153   : > { %v1657_v27 = vpop.f32.mrb[45].mxu0 }
 0x154   : > { %1319 = vst.msk [vmem:[%s2046_s27 + $0x48] sm:$0xf] %vm1300_vm1, %v1560_v22  ;;  %v1561_v26 = vpack.c.bf16 %v1159_v23, %v1159_v23  ;;  %v1658_v29 = vadd.f32 %v1657_v27, %v1656_v25  ;;  %v1659_v30 = vpop.f32.mrb[46].mxu0 }
 0x155   : > { %v1093_v28 = vpop.f32.mrb[40].mxu1  ;;  %v1660_v35 = vpop.f32.mrb[47].mxu0 }
 0x156   : > { %1320 = vst.msk [vmem:[%s2046_s27 + $0x4c] sm:$0xf] %vm1300_vm1, %v1561_v26  ;;  %v1094_v31 = vadd.f32 %v1093_v28, %v933_v24  ;;  %v1095_v32 = vpop.f32.mrb[41].mxu1  ;;  %v1661_v37 = vadd.f32 %v1660_v35, %v1659_v30  ;;  %v941_v43 = vadd.f32 %v1658_v29, %v2038_v34 }
 0x157   : > { %v1096_v36 = vpop.f32.mrb[42].mxu1 }
 0x158   : > { %v1160_v38 = vmax.f32 %v1094_v31, 0.0  ;;  %v1097_v39 = vadd.f32 %v1096_v36, %v936_v33  ;;  %v1098_v40 = vpop.f32.mrb[43].mxu1  ;;  %v944_v52 = vadd.f32 %v1661_v37, %v2038_v34 }
 0x15a   : > { %v1562_v41 = vpack.c.bf16 %v1160_v38, %v1160_v38  ;;  %v1161_v42 = vmax.f32 %v1097_v39, 0.0  ;;  %v1662_v44 = vpop.f32.mrb[48].mxu0 }
 0x15b   : > { %v1663_v46 = vpop.f32.mrb[49].mxu0 }
 0x15c   : > { %1321 = vst.msk [vmem:[%s2046_s27 + $0x50] sm:$0xf] %vm1300_vm1, %v1562_v41  ;;  %v1563_v45 = vpack.c.bf16 %v1161_v42, %v1161_v42  ;;  %v1664_v48 = vadd.f32 %v1663_v46, %v1662_v44  ;;  %v1665_v49 = vpop.f32.mrb[50].mxu0 }
 0x15d   : > { %v1101_v47 = vpop.f32.mrb[44].mxu1  ;;  %v1666_v53 = vpop.f32.mrb[51].mxu0 }
 0x15e   : > { %1322 = vst.msk [vmem:[%s2046_s27 + $0x54] sm:$0xf] %vm1300_vm1, %v1563_v45  ;;  %v1102_v50 = vadd.f32 %v1101_v47, %v941_v43  ;;  %v1103_v51 = vpop.f32.mrb[45].mxu1  ;;  %v1667_v55 = vadd.f32 %v1666_v53, %v1665_v49  ;;  %v949_v61 = vadd.f32 %v1664_v48, %v2038_v34 }
 0x15f   : > { %v1104_v54 = vpop.f32.mrb[46].mxu1 }
 0x160   : > { %v1162_v56 = vmax.f32 %v1102_v50, 0.0  ;;  %v1105_v57 = vadd.f32 %v1104_v54, %v944_v52  ;;  %v1106_v58 = vpop.f32.mrb[47].mxu1  ;;  %v952_v6 = vadd.f32 %v1667_v55, %v2038_v34 }
 0x162   : > { %v1564_v59 = vpack.c.bf16 %v1162_v56, %v1162_v56  ;;  %v1163_v60 = vmax.f32 %v1105_v57, 0.0  ;;  %v1668_v62 = vpop.f32.mrb[52].mxu0 }
 0x163   : > { %v1669_v0 = vpop.f32.mrb[53].mxu0 }
 0x164   : > { %1323 = vst.msk [vmem:[%s2046_s27 + $0x58] sm:$0xf] %vm1300_vm1, %v1564_v59  ;;  %v1565_v63 = vpack.c.bf16 %v1163_v60, %v1163_v60  ;;  %v1670_v2 = vadd.f32 %v1669_v0, %v1668_v62  ;;  %v1671_v3 = vpop.f32.mrb[54].mxu0 }
 0x165   : > { %v1109_v1 = vpop.f32.mrb[48].mxu1  ;;  %v1672_v7 = vpop.f32.mrb[55].mxu0 }
 0x166   : > { %1324 = vst.msk [vmem:[%s2046_s27 + $0x5c] sm:$0xf] %vm1300_vm1, %v1565_v63  ;;  %v1110_v4 = vadd.f32 %v1109_v1, %v949_v61  ;;  %v1111_v5 = vpop.f32.mrb[49].mxu1  ;;  %v1673_v9 = vadd.f32 %v1672_v7, %v1671_v3  ;;  %v957_v15 = vadd.f32 %v1670_v2, %v2038_v34 }
 0x167   : > { %v1112_v8 = vpop.f32.mrb[50].mxu1 }
 0x168   : > { %v1164_v10 = vmax.f32 %v1110_v4, 0.0  ;;  %v1113_v11 = vadd.f32 %v1112_v8, %v952_v6  ;;  %v1114_v12 = vpop.f32.mrb[51].mxu1  ;;  %v960_v24 = vadd.f32 %v1673_v9, %v2038_v34 }
 0x16a   : > { %v1566_v13 = vpack.c.bf16 %v1164_v10, %v1164_v10  ;;  %v1165_v14 = vmax.f32 %v1113_v11, 0.0  ;;  %v1674_v16 = vpop.f32.mrb[56].mxu0 }
 0x16b   : > { %v1675_v18 = vpop.f32.mrb[57].mxu0 }
 0x16c   : > { %1325 = vst.msk [vmem:[%s2046_s27 + $0x60] sm:$0xf] %vm1300_vm1, %v1566_v13  ;;  %v1567_v17 = vpack.c.bf16 %v1165_v14, %v1165_v14  ;;  %v1676_v20 = vadd.f32 %v1675_v18, %v1674_v16  ;;  %v1677_v21 = vpop.f32.mrb[58].mxu0 }
 0x16d   : > { %v1117_v19 = vpop.f32.mrb[52].mxu1  ;;  %v1678_v25 = vpop.f32.mrb[59].mxu0 }
 0x16e   : > { %1326 = vst.msk [vmem:[%s2046_s27 + $0x64] sm:$0xf] %vm1300_vm1, %v1567_v17  ;;  %v1118_v22 = vadd.f32 %v1117_v19, %v957_v15  ;;  %v1119_v23 = vpop.f32.mrb[53].mxu1  ;;  %v1679_v27 = vadd.f32 %v1678_v25, %v1677_v21  ;;  %v965_v33 = vadd.f32 %v1676_v20, %v2038_v34 }
 0x16f   : > { %v1120_v26 = vpop.f32.mrb[54].mxu1 }
 0x170   : > { %v1166_v28 = vmax.f32 %v1118_v22, 0.0  ;;  %v1121_v29 = vadd.f32 %v1120_v26, %v960_v24  ;;  %v1122_v30 = vpop.f32.mrb[55].mxu1  ;;  %v968_v43 = vadd.f32 %v1679_v27, %v2038_v34 }
 0x172   : > { %v1568_v31 = vpack.c.bf16 %v1166_v28, %v1166_v28  ;;  %v1167_v32 = vmax.f32 %v1121_v29, 0.0  ;;  %v1680_v35 = vpop.f32.mrb[60].mxu0 }
 0x173   : > { %v1681_v37 = vpop.f32.mrb[61].mxu0 }
 0x174   : > { %1327 = vst.msk [vmem:[%s2046_s27 + $0x68] sm:$0xf] %vm1300_vm1, %v1568_v31  ;;  %v1569_v36 = vpack.c.bf16 %v1167_v32, %v1167_v32  ;;  %v1682_v39 = vadd.f32 %v1681_v37, %v1680_v35  ;;  %v1683_v40 = vpop.f32.mrb[62].mxu0 }
 0x175   : > { %v1125_v38 = vpop.f32.mrb[56].mxu1  ;;  %v1684_v44 = vpop.f32.mrb[63].mxu0 }
 0x176   : > { %1328 = vst.msk [vmem:[%s2046_s27 + $0x6c] sm:$0xf] %vm1300_vm1, %v1569_v36  ;;  %v1126_v41 = vadd.f32 %v1125_v38, %v965_v33  ;;  %v1127_v42 = vpop.f32.mrb[57].mxu1  ;;  %v1685_v46 = vadd.f32 %v1684_v44, %v1683_v40  ;;  %v973_v52 = vadd.f32 %v1682_v39, %v2038_v34 }
 0x177   : > { %v1128_v45 = vpop.f32.mrb[58].mxu1 }
 0x178   : > { %v1168_v47 = vmax.f32 %v1126_v41, 0.0  ;;  %v1129_v48 = vadd.f32 %v1128_v45, %v968_v43  ;;  %v1130_v49 = vpop.f32.mrb[59].mxu1  ;;  %v976_v57 = vadd.f32 %v1685_v46, %v2038_v34 }
 0x17a   : > { %v1570_v50 = vpack.c.bf16 %v1168_v47, %v1168_v47  ;;  %v1169_v51 = vmax.f32 %v1129_v48, 0.0 }
 0x17c   : > { %1329 = vst.msk [vmem:[%s2046_s27 + $0x70] sm:$0xf] %vm1300_vm1, %v1570_v50  ;;  %v1571_v53 = vpack.c.bf16 %v1169_v51, %v1169_v51 }
 0x17d   : > { %v1133_v54 = vpop.f32.mrb[60].mxu1 }
 0x17e   : > { %1330 = vst.msk [vmem:[%s2046_s27 + $0x74] sm:$0xf] %vm1300_vm1, %v1571_v53  ;;  %v1134_v55 = vadd.f32 %v1133_v54, %v973_v52  ;;  %v1135_v56 = vpop.f32.mrb[61].mxu1 }
 0x17f   : > { %v1136_v58 = vpop.f32.mrb[62].mxu1 }
 0x180   : > { %v1170_v59 = vmax.f32 %v1134_v55, 0.0  ;;  %v1137_v60 = vadd.f32 %v1136_v58, %v976_v57  ;;  %v1138_v61 = vpop.f32.mrb[63].mxu1 }
 0x182   : > { %v1572_v62 = vpack.c.bf16 %v1170_v59, %v1170_v59  ;;  %v1171_v63 = vmax.f32 %v1137_v60, 0.0 }
 0x184   : > { %1331 = vst.msk [vmem:[%s2046_s27 + $0x78] sm:$0xf] %vm1300_vm1, %v1572_v62  ;;  %v1573_v0 = vpack.c.bf16 %v1171_v63, %v1171_v63 }
 0x186   : > { %1332 = vst.msk [vmem:[%s2046_s27 + $0x7c] sm:$0xf] %vm1300_vm1, %v1573_v0 }
 0x187 PF: > { %s13_s12 = sadd.s32 1, %s1824_s12  }
 0x188   : > { %p10_p4 = scmp.ge.s32.totalorder %s13_s12, 4  }
 0x18a   :  { %12 = sbr.rel (!%p10_p4) target bundleno = 1 (0x1), region = 62 }

// kernel: expert_forward.9
= control target key start
LH: loop header
LB: loop body
LE: loop exit
PB: predicated region body
PF: predicated region fallthrough
CT: control target
= control target key end

     0   :  { %s2058_s15 = smov 0   ;;  %s2437_s0 = inlined_call_operand.vmem [shape: bf16[512,432], index: 0, kind: input, shape index: {}]   ;;  %s2438_s1 = inlined_call_operand.vmem [shape: bf16[432,16], index: 1, kind: input, shape index: {}]   ;;  %s2439_s2 = inlined_call_operand.vmem [shape: f32[1,16], index: 2, kind: input, shape index: {}]   ;;  %s2440_s3 = inlined_call_operand.vmem [shape: bf16[512,16], index: 3, kind: input, shape index: {}, may-alias: {3,4}]   ;;  %s2441_s4 = inlined_call_operand.vmem [shape: bf16[512,16], index: 4, kind: output, shape index: {}, may-alias: {3,4}]  }
   0x1 LB: > { %s1514_s16 = sadd.s32 4294967295, %s2030_s15   ;;  %p1518_p0 = scmp.ge.s32.totalorder %s2030_s15, 1  ;;  %s2030_s15 = sphi %s2058_s15, %s14_s15  }
   0x2   : > { %p175_p1 = scmp.lt.s32.totalorder %s2030_s15, 3 }
   0x4   : > { %p176_p2 = pnand %p1518_p0, %p175_p1 }
   0x5   : > { %v1901_v0 = vld [vmem:[%s2438_s1 + $0x80] sm:$0xff] (!%p176_p2)   ;;  %v2032_v1 = vmov (!%p176_p2), 0   ;;  %v1904_v4 = vld [vmem:[%s2438_s1 + $0x88] sm:$0xff] (!%p176_p2)   ;;  %v1907_v7 = vld [vmem:[%s2438_s1 + $0x90] sm:$0xff] (!%p176_p2)   ;;  %s1519_s11 = sshll.u32 (!%p176_p2), %s1514_s16, 5  ;;  %vm818_vm0 = vcmask (!%p176_p2), 392192  }
   0x6   : > { %179 = sbr.rel (%p176_p2) target bundleno = 391 (0x187), region = 36  ;;  %1028 = vmatprep.subr.bf16.mxu1 (!%p176_p2), %v2032_v1  ;;  %v1902_v2 = vld [vmem:[%s2438_s1 + $0x40] sm:$0xff] (!%p176_p2)   ;;  %v1905_v5 = vld [vmem:[%s2438_s1 + $0x48] sm:$0xff] (!%p176_p2)   ;;  %v1908_v8 = vld [vmem:[%s2438_s1 + $0x50] sm:$0xff] (!%p176_p2)   ;;  %p208_p3 = scmp.lt.s32.totalorder (!%p176_p2), %s1519_s11, 63  ;;  %vm1413_vm1 = vcmask (!%p176_p2), 125952  }
   0x7   : > { %1029 = vmatpush1.bf16.msra.mxu1 (!%p176_p2), %v1901_v0  ;;  %v1903_v3 = vld [vmem:[%s2438_s1] sm:$0xff] (!%p176_p2)   ;;  %1780 = vmatprep.subr.bf16.mxu0 (!%p176_p2), %v1902_v2  ;;  %v1906_v6 = vld [vmem:[%s2438_s1 + $0x8] sm:$0xff] (!%p176_p2)   ;;  %v1909_v9 = vld [vmem:[%s2438_s1 + $0x10] sm:$0xff] (!%p176_p2)  }
   0x8   : > { %1030 = vmatprep.subr.bf16.mxu1 (!%p176_p2), %v2032_v1  ;;  %1781 = vmatpush3.bf16.msra.mxu0 (!%p176_p2), %v1903_v3  ;;  %v1910_v10 = vld [vmem:[%s2438_s1 + $0x98] sm:$0xff] (!%p176_p2)   ;;  %v1914_v13 = vld [vmem:[%s2438_s1 + $0x60] sm:$0xff] (!%p176_p2)   ;;  %v1917_v16 = vld [vmem:[%s2438_s1 + $0x68] sm:$0xff] (!%p176_p2)  }
   0x9   : > { %1782 = vmatprep.subr.bf16.mxu0 (!%p176_p2), %v1905_v5  ;;  %v1911_v11 = vld [vmem:[%s2438_s1 + $0x58] sm:$0xff] (!%p176_p2)   ;;  %v1913_v14 = vld [vmem:[%s2438_s1 + $0xa0] sm:$0xff] (!%p176_p2)   ;;  %v1916_v17 = vld [vmem:[%s2438_s1 + $0xa8] sm:$0xff] (!%p176_p2)  }
   0xa   : > { %v1912_v12 = vld [vmem:[%s2438_s1 + $0x18] sm:$0xff] (!%p176_p2)   ;;  %v1915_v15 = vld [vmem:[%s2438_s1 + $0x20] sm:$0xff] (!%p176_p2)   ;;  %v1918_v18 = vld [vmem:[%s2438_s1 + $0x28] sm:$0xff] (!%p176_p2)  }
   0xb   : > { %1031 = vmatpush1.bf16.msra.mxu1 (!%p176_p2), %v1904_v4  ;;  %v1920_v19 = vld [vmem:[%s2438_s1 + $0x70] sm:$0xff] (!%p176_p2)   ;;  %v1922_v22 = vld [vmem:[%s2438_s1 + $0xb8] sm:$0xff] (!%p176_p2)   ;;  %v1925_v26 = vld [vmem:[%s2438_s1 + $0xc0] sm:$0xff] (!%p176_p2)  }
   0xc   : > { %1032 = vmatprep.subr.bf16.mxu1 (!%p176_p2), %v2032_v1  ;;  %1783 = vmatpush3.bf16.msra.mxu0 (!%p176_p2), %v1906_v6  ;;  %v1919_v20 = vld [vmem:[%s2438_s1 + $0xb0] sm:$0xff] (!%p176_p2)   ;;  %v1923_v23 = vld [vmem:[%s2438_s1 + $0x78] sm:$0xff] (!%p176_p2)   ;;  %v1929_v30 = vld [vmem:[%s2438_s1 + $0xc8] sm:$0xff] (!%p176_p2)  }
   0xd   : > { %1784 = vmatprep.subr.bf16.mxu0 %v1908_v8  ;;  %s2443_s11 = smov (!%p208_p3, %s1519_s11), 63  ;;  %v1921_v21 = vld [vmem:[%s2438_s1 + $0x30] sm:$0xff]   ;;  %v1924_v25 = vld [vmem:[%s2438_s1 + $0x38] sm:$0xff]  }
   0xe   : > { %s1668_s29 = sshll.u32 %s2443_s11, 4  ;;  %v1930_v31 = vld [vmem:[%s2438_s1 + $0xd0] sm:$0xff]   ;;  %s1523_s27 = sshll.u32 %s2443_s11, 2 }
   0xf   : > { %1033 = vmatpush1.bf16.msra.mxu1 %v1907_v7  ;;  %s2142_s13 = scalar_lea.vmem %s2437_s0, %s1668_s29  ;;  %s2252_s30 = scalar_lea.vmem %s2440_s3, %s1523_s27 }
  0x10   : > { %1034 = vmatprep.subr.bf16.mxu1 %v2032_v1  ;;  %1785 = vmatpush3.bf16.msra.mxu0 %v1909_v9  ;;  %v1928_v24 = vld [vmem:[%s2142_s13 + $0x4] ss:$16 sps:$4 sm:$0xff]   ;;  %v1935_v27 = vld [vmem:[%s2142_s13 + $0xc] ss:$16 sps:$4 sm:$0xff]   ;;  %v1926_v28 = vld [vmem:[%s2142_s13] ss:$16 sps:$4 sm:$0xff]   ;;  %s2301_s9 = scalar_lea.vmem %s2441_s4, %s1523_s27 }
  0x11   : > { %1786 = vmatprep.subr.bf16.mxu0 %v1911_v11  ;;  %899 = vmatprep.mubr.bf16.mxu0 %v1928_v24  ;;  %v1931_v29 = vld [vmem:[%s2142_s13 + $0x24] ss:$16 sps:$4 sm:$0xff]   ;;  %v1936_v32 = vld [vmem:[%s2142_s13 + $0x20] ss:$16 sps:$4 sm:$0xff]   ;;  %v1933_v34 = vld [vmem:[%s2142_s13 + $0x8] ss:$16 sps:$4 sm:$0xff]  }
  0x12   : > { %1618 = vmatprep.mubr.msk.bf16.mxu1 %vm818_vm0, %v1935_v27  ;;  %v1937_v33 = vld [vmem:[%s2142_s13 + $0x44] ss:$16 sps:$4 sm:$0xff]   ;;  %v1939_v35 = vld [vmem:[%s2142_s13 + $0x2c] ss:$16 sps:$4 sm:$0xff]   ;;  %v1941_v36 = vld [vmem:[%s2142_s13 + $0x40] ss:$16 sps:$4 sm:$0xff]  }
  0x13   : > { %1035 = vmatpush1.bf16.msra.mxu1 %v1910_v10  ;;  %v1943_v37 = vld [vmem:[%s2142_s13 + $0x64] ss:$16 sps:$4 sm:$0xff]   ;;  %v1942_v38 = vld [vmem:[%s2142_s13 + $0x28] ss:$16 sps:$4 sm:$0xff]   ;;  %v1945_v39 = vld [vmem:[%s2142_s13 + $0x4c] ss:$16 sps:$4 sm:$0xff]  }
  0x14   : > { %1036 = vmatprep.subr.bf16.mxu1 %v2032_v1  ;;  %1787 = vmatpush3.bf16.msra.mxu0 %v1912_v12  ;;  %v1947_v40 = vld [vmem:[%s2142_s13 + $0x60] ss:$16 sps:$4 sm:$0xff]   ;;  %v1949_v41 = vld [vmem:[%s2142_s13 + $0x84] ss:$16 sps:$4 sm:$0xff]   ;;  %v1948_v42 = vld [vmem:[%s2142_s13 + $0x48] ss:$16 sps:$4 sm:$0xff]  }
  0x15   : > { %1788 = vmatprep.subr.bf16.mxu0 %v1914_v13  ;;  %v1951_v43 = vld [vmem:[%s2142_s13 + $0x6c] ss:$16 sps:$4 sm:$0xff]   ;;  %v1953_v44 = vld [vmem:[%s2142_s13 + $0x80] ss:$16 sps:$4 sm:$0xff]   ;;  %v1955_v45 = vld [vmem:[%s2142_s13 + $0xa4] ss:$16 sps:$4 sm:$0xff]  }
  0x16   : > { %v1954_v46 = vld [vmem:[%s2142_s13 + $0x68] ss:$16 sps:$4 sm:$0xff]   ;;  %v1957_v47 = vld [vmem:[%s2142_s13 + $0x8c] ss:$16 sps:$4 sm:$0xff]   ;;  %v1959_v48 = vld [vmem:[%s2142_s13 + $0xa0] ss:$16 sps:$4 sm:$0xff]  }
  0x17   : > { %1037 = vmatpush1.bf16.msra.mxu1 %v1913_v14  ;;  %v1961_v49 = vld [vmem:[%s2142_s13 + $0xc4] ss:$16 sps:$4 sm:$0xff]   ;;  %v1960_v50 = vld [vmem:[%s2142_s13 + $0x88] ss:$16 sps:$4 sm:$0xff]   ;;  %v1963_v51 = vld [vmem:[%s2142_s13 + $0xac] ss:$16 sps:$4 sm:$0xff]  }
  0x18   : > { %1038 = vmatprep.subr.bf16.mxu1 %v2032_v1  ;;  %1789 = vmatpush3.bf16.msra.mxu0 %v1915_v15  ;;  %v1965_v52 = vld [vmem:[%s2142_s13 + $0xc0] ss:$16 sps:$4 sm:$0xff]   ;;  %v1967_v53 = vld [vmem:[%s2142_s13 + $0xe4] ss:$16 sps:$4 sm:$0xff]   ;;  %v1966_v54 = vld [vmem:[%s2142_s13 + $0xa8] ss:$16 sps:$4 sm:$0xff]  }
  0x19   : > { %1790 = vmatprep.subr.bf16.mxu0 %v1917_v16  ;;  %v1969_v55 = vld [vmem:[%s2142_s13 + $0xcc] ss:$16 sps:$4 sm:$0xff]   ;;  %v1971_v56 = vld [vmem:[%s2142_s13 + $0xe0] ss:$16 sps:$4 sm:$0xff]   ;;  %v1973_v57 = vld [vmem:[%s2142_s13 + $0x104] ss:$16 sps:$4 sm:$0xff]  }
  0x1a   : > { %v1972_v58 = vld [vmem:[%s2142_s13 + $0xc8] ss:$16 sps:$4 sm:$0xff]   ;;  %v1975_v59 = vld [vmem:[%s2142_s13 + $0xec] ss:$16 sps:$4 sm:$0xff]   ;;  %v1977_v60 = vld [vmem:[%s2142_s13 + $0x100] ss:$16 sps:$4 sm:$0xff]  }
  0x1b   : > { %1039 = vmatpush1.bf16.msra.mxu1 %v1916_v17  ;;  %v1979_v61 = vld [vmem:[%s2142_s13 + $0x124] ss:$16 sps:$4 sm:$0xff]   ;;  %v1978_v62 = vld [vmem:[%s2142_s13 + $0xe8] ss:$16 sps:$4 sm:$0xff]   ;;  %v1981_v63 = vld [vmem:[%s2142_s13 + $0x10c] ss:$16 sps:$4 sm:$0xff]  }
  0x1c   : > { %1040 = vmatprep.subr.bf16.mxu1 %v2032_v1  ;;  %1791 = vmatpush3.bf16.msra.mxu0 %v1918_v18  ;;  %v1983_v0 = vld [vmem:[%s2142_s13 + $0x120] ss:$16 sps:$4 sm:$0xff]   ;;  %v1984_v2 = vld [vmem:[%s2142_s13 + $0x108] ss:$16 sps:$4 sm:$0xff]   ;;  %v1987_v3 = vld [vmem:[%s2142_s13 + $0x12c] ss:$16 sps:$4 sm:$0xff]  }
  0x1d   : > { %1792 = vmatprep.subr.bf16.mxu0 %v1920_v19  ;;  %v1989_v4 = vld [vmem:[%s2142_s13 + $0x140] ss:$16 sps:$4 sm:$0xff]   ;;  %v1991_v5 = vld [vmem:[%s2142_s13 + $0x164] ss:$16 sps:$4 sm:$0xff]   ;;  %v1990_v6 = vld [vmem:[%s2142_s13 + $0x128] ss:$16 sps:$4 sm:$0xff]  }
  0x1e   : > { %v1993_v7 = vld [vmem:[%s2142_s13 + $0x14c] ss:$16 sps:$4 sm:$0xff]   ;;  %v1995_v8 = vld [vmem:[%s2142_s13 + $0x160] ss:$16 sps:$4 sm:$0xff]   ;;  %v1997_v9 = vld [vmem:[%s2142_s13 + $0x184] ss:$16 sps:$4 sm:$0xff]  }
  0x1f   : > { %1041 = vmatpush1.bf16.msra.mxu1 %v1919_v20  ;;  %v1996_v10 = vld [vmem:[%s2142_s13 + $0x148] ss:$16 sps:$4 sm:$0xff]   ;;  %v1999_v11 = vld [vmem:[%s2142_s13 + $0x16c] ss:$16 sps:$4 sm:$0xff]   ;;  %v2001_v12 = vld [vmem:[%s2142_s13 + $0x180] ss:$16 sps:$4 sm:$0xff]  }
  0x20   : > { %1042 = vmatprep.subr.bf16.mxu1 %v2032_v1  ;;  %1793 = vmatpush3.bf16.msra.mxu0 %v1921_v21  ;;  %v2003_v13 = vld [vmem:[%s2142_s13 + $0x1a4] ss:$16 sps:$4 sm:$0xff]   ;;  %v2002_v14 = vld [vmem:[%s2142_s13 + $0x168] ss:$16 sps:$4 sm:$0xff]   ;;  %v2005_v15 = vld [vmem:[%s2142_s13 + $0x18c] ss:$16 sps:$4 sm:$0xff]  }
  0x21   : > { %1794 = vmatprep.subr.bf16.mxu0 %v1923_v23  ;;  %v2007_v16 = vld [vmem:[%s2142_s13 + $0x1a0] ss:$16 sps:$4 sm:$0xff]   ;;  %v2009_v17 = vld [vmem:[%s2142_s13 + $0x1c4] ss:$16 sps:$4 sm:$0xff]   ;;  %v2008_v18 = vld [vmem:[%s2142_s13 + $0x188] ss:$16 sps:$4 sm:$0xff]  }
  0x22   : > { %v2011_v19 = vld [vmem:[%s2142_s13 + $0x1ac] ss:$16 sps:$4 sm:$0xff]   ;;  %v2013_v20 = vld [vmem:[%s2142_s13 + $0x1c0] ss:$16 sps:$4 sm:$0xff]   ;;  %v2015_v21 = vld [vmem:[%s2142_s13 + $0x1e4] ss:$16 sps:$4 sm:$0xff]  }
  0x23   : > { %1043 = vmatpush1.bf16.msra.mxu1 %v1922_v22  ;;  %v2014_v22 = vld [vmem:[%s2142_s13 + $0x1a8] ss:$16 sps:$4 sm:$0xff]   ;;  %v2017_v23 = vld [vmem:[%s2142_s13 + $0x1cc] ss:$16 sps:$4 sm:$0xff]   ;;  %v2019_v24 = vld [vmem:[%s2142_s13 + $0x1e0] ss:$16 sps:$4 sm:$0xff]  }
  0x24   : > { %1044 = vmatprep.subr.bf16.mxu1 %v2032_v1  ;;  %1795 = vmatpush3.bf16.msra.mxu0 %v1924_v25  ;;  %v2020_v25 = vld [vmem:[%s2142_s13 + $0x1c8] ss:$16 sps:$4 sm:$0xff]  }
  0x25   : > { %v2023_v27 = vld [vmem:[%s2142_s13 + $0x1e8] ss:$16 sps:$4 sm:$0xff]  }
  0x27   : > { %1045 = vmatpush1.bf16.msra.mxu1 %v1925_v26  ;;  %900 = vmatmul.mubr.bf16.vlgmr.msra.gmra.mrb[0].mxu0 %v1926_v28  ;;  %v2021_v26 = vld [vmem:[%s2142_s13 + $0x1ec] ss:$16 sps:$4 sm:$0xff]  }
  0x28   : > { %1046 = vmatprep.subr.bf16.mxu1 %v2032_v1  ;;  %907 = vmatprep.mubr.bf16.mxu0 %v1931_v29 }
  0x2b   : > { %1047 = vmatpush1.bf16.msra.mxu1 %v1929_v30 }
  0x2c   : > { %1048 = vmatprep.subr.bf16.mxu1 %v2032_v1  ;;  %v1985_v1 = vld [vmem:[%s2142_s13 + $0x144] ss:$16 sps:$4 sm:$0xff]  }
  0x2f   : > { %1049 = vmatpush1.bf16.msra.mxu1 %v1930_v31  ;;  %908 = vmatmul.mubr.bf16.gmra.mrb[4].mxu0 %v1936_v32 }
  0x30   : > { %915 = vmatprep.mubr.bf16.mxu0 %v1937_v33 }
  0x32   : > { %1061 = vmatmul.mubr.bf16.vlgmr.msra.gmra.mrb[0].mxu1 %v1933_v34  ;;  %v2257_v34 = vld [vmem:[%s2439_s2] ss:$0 sm:$0xff] }
  0x33   : > { %1619 = vmatprep.mubr.msk.bf16.mxu1 %vm818_vm0, %v1939_v35  ;;  %v1702_v35 = vld [vmem:[%s2252_s30] sm:$0xff]  }
  0x37   : > { %916 = vmatmul.mubr.bf16.gmra.mrb[8].mxu0 %v1941_v36 }
  0x38   : > { %923 = vmatprep.mubr.bf16.mxu0 %v1943_v37 }
  0x3a   : > { %1069 = vmatmul.mubr.bf16.gmra.mrb[4].mxu1 %v1942_v38  ;;  %v1703_v38 = vunpack.c.l.bf16 %v1702_v35 }
  0x3b   : > { %1620 = vmatprep.mubr.msk.bf16.mxu1 %vm818_vm0, %v1945_v39 }
  0x3f   : > { %924 = vmatmul.mubr.bf16.gmra.mrb[12].mxu0 %v1947_v40 }
  0x40   : > { %931 = vmatprep.mubr.bf16.mxu0 %v1949_v41 }
  0x42   : > { %1077 = vmatmul.mubr.bf16.gmra.mrb[8].mxu1 %v1948_v42 }
  0x43   : > { %1621 = vmatprep.mubr.msk.bf16.mxu1 %vm818_vm0, %v1951_v43 }
  0x47   : > { %932 = vmatmul.mubr.bf16.gmra.mrb[16].mxu0 %v1953_v44 }
  0x48   : > { %939 = vmatprep.mubr.bf16.mxu0 %v1955_v45 }
  0x4a   : > { %1085 = vmatmul.mubr.bf16.gmra.mrb[12].mxu1 %v1954_v46  ;;  %v1704_v46 = vunpack.c.h.bf16 %v1702_v35 }
  0x4b   : > { %1622 = vmatprep.mubr.msk.bf16.mxu1 %vm818_vm0, %v1957_v47 }
  0x4f   : > { %940 = vmatmul.mubr.bf16.gmra.mrb[20].mxu0 %v1959_v48  ;;  %v1765_v48 = vld [vmem:[%s2252_s30 + $0x8] sm:$0xff]  }
  0x50   : > { %947 = vmatprep.mubr.bf16.mxu0 %v1961_v49  ;;  %v2264_v49 = vld [vmem:[%s2252_s30 + $0x10] sm:$0xff]  }
  0x52   : > { %1093 = vmatmul.mubr.bf16.gmra.mrb[16].mxu1 %v1960_v50  ;;  %v2267_v50 = vld [vmem:[%s2252_s30 + $0x18] sm:$0xff]  }
  0x53   : > { %1623 = vmatprep.mubr.msk.bf16.mxu1 %vm818_vm0, %v1963_v51  ;;  %v2270_v51 = vld [vmem:[%s2252_s30 + $0x20] sm:$0xff]  }
  0x57   : > { %948 = vmatmul.mubr.bf16.gmra.mrb[24].mxu0 %v1965_v52  ;;  %v2273_v52 = vld [vmem:[%s2252_s30 + $0x28] sm:$0xff]  }
  0x58   : > { %955 = vmatprep.mubr.bf16.mxu0 %v1967_v53  ;;  %v2276_v53 = vld [vmem:[%s2252_s30 + $0x30] sm:$0xff]  }
  0x5a   : > { %1101 = vmatmul.mubr.bf16.gmra.mrb[20].mxu1 %v1966_v54  ;;  %v2279_v54 = vld [vmem:[%s2252_s30 + $0x38] sm:$0xff]  }
  0x5b   : > { %1624 = vmatprep.mubr.msk.bf16.mxu1 %vm818_vm0, %v1969_v55  ;;  %v2282_v55 = vld [vmem:[%s2252_s30 + $0x40] sm:$0xff]  }
  0x5f   : > { %956 = vmatmul.mubr.bf16.gmra.mrb[28].mxu0 %v1971_v56  ;;  %v2285_v56 = vld [vmem:[%s2252_s30 + $0x48] sm:$0xff]  }
  0x60   : > { %963 = vmatprep.mubr.bf16.mxu0 %v1973_v57 }
  0x62   : > { %1109 = vmatmul.mubr.bf16.gmra.mrb[24].mxu1 %v1972_v58 }
  0x63   : > { %1625 = vmatprep.mubr.msk.bf16.mxu1 %vm818_vm0, %v1975_v59  ;;  %v2288_v59 = vld [vmem:[%s2252_s30 + $0x50] sm:$0xff]  }
  0x67   : > { %964 = vmatmul.mubr.bf16.gmra.mrb[32].mxu0 %v1977_v60  ;;  %v2291_v60 = vld [vmem:[%s2252_s30 + $0x58] sm:$0xff]  }
  0x68   : > { %971 = vmatprep.mubr.bf16.mxu0 %v1979_v61  ;;  %v2294_v61 = vld [vmem:[%s2252_s30 + $0x60] sm:$0xff]  }
  0x6a   : > { %1117 = vmatmul.mubr.bf16.gmra.mrb[28].mxu1 %v1978_v62 }
  0x6b   : > { %1626 = vmatprep.mubr.msk.bf16.mxu1 %vm818_vm0, %v1981_v63 }
  0x6f   : > { %972 = vmatmul.mubr.bf16.gmra.mrb[36].mxu0 %v1983_v0 }
  0x70   : > { %979 = vmatprep.mubr.bf16.mxu0 %v1985_v1  ;;  %v2304_v1 = vld [vmem:[%s2252_s30 + $0x68] sm:$0xff]  }
  0x72   : > { %1125 = vmatmul.mubr.bf16.gmra.mrb[32].mxu1 %v1984_v2  ;;  %v2307_v2 = vld [vmem:[%s2252_s30 + $0x70] sm:$0xff]  }
  0x73   : > { %1627 = vmatprep.mubr.msk.bf16.mxu1 %vm818_vm0, %v1987_v3  ;;  %v2310_v3 = vld [vmem:[%s2252_s30 + $0x78] sm:$0xff]  }
  0x77   : > { %980 = vmatmul.mubr.bf16.gmra.mrb[40].mxu0 %v1989_v4 }
  0x78   : > { %987 = vmatprep.mubr.bf16.mxu0 %v1991_v5 }
  0x7a   : > { %1133 = vmatmul.mubr.bf16.gmra.mrb[36].mxu1 %v1990_v6 }
  0x7b   : > { %1628 = vmatprep.mubr.msk.bf16.mxu1 %vm818_vm0, %v1993_v7 }
  0x7f   : > { %988 = vmatmul.mubr.bf16.gmra.mrb[44].mxu0 %v1995_v8 }
  0x80   : > { %995 = vmatprep.mubr.bf16.mxu0 %v1997_v9  ;;  %v1707_v9 = vunpack.c.l.bf16 %v1765_v48 }
  0x82   : > { %1141 = vmatmul.mubr.bf16.gmra.mrb[40].mxu1 %v1996_v10 }
  0x83   : > { %1629 = vmatprep.mubr.msk.bf16.mxu1 %vm818_vm0, %v1999_v11 }
  0x87   : > { %996 = vmatmul.mubr.bf16.gmra.mrb[48].mxu0 %v2001_v12 }
  0x88   : > { %1003 = vmatprep.mubr.bf16.mxu0 %v2003_v13 }
  0x8a   : > { %1149 = vmatmul.mubr.bf16.gmra.mrb[44].mxu1 %v2002_v14 }
  0x8b   : > { %1630 = vmatprep.mubr.msk.bf16.mxu1 %vm818_vm0, %v2005_v15 }
  0x8f   : > { %1004 = vmatmul.mubr.bf16.gmra.mrb[52].mxu0 %v2007_v16 }
  0x90   : > { %1011 = vmatprep.mubr.bf16.mxu0 %v2009_v17  ;;  %v1708_v17 = vunpack.c.h.bf16 %v1765_v48 }
  0x92   : > { %1157 = vmatmul.mubr.bf16.gmra.mrb[48].mxu1 %v2008_v18 }
  0x93   : > { %1631 = vmatprep.mubr.msk.bf16.mxu1 %vm818_vm0, %v2011_v19 }
  0x97   : > { %1012 = vmatmul.mubr.bf16.gmra.mrb[56].mxu0 %v2013_v20 }
  0x98   : > { %1019 = vmatprep.mubr.bf16.mxu0 %v2015_v21 }
  0x9a   : > { %1165 = vmatmul.mubr.bf16.gmra.mrb[52].mxu1 %v2014_v22 }
  0x9b   : > { %1632 = vmatprep.mubr.msk.bf16.mxu1 %vm818_vm0, %v2017_v23 }
  0x9f   : > { %1020 = vmatmul.mubr.bf16.gmra.mrb[60].mxu0 %v2019_v24 }
  0xa2   : > { %1173 = vmatmul.mubr.bf16.gmra.mrb[56].mxu1 %v2020_v25 }
  0xa3   : > { %1633 = vmatprep.mubr.msk.bf16.mxu1 %vm818_vm0, %v2021_v26 }
  0xaa   : > { %1181 = vmatmul.mubr.bf16.gmra.mrb[60].mxu1 %v2023_v27 }
  0xfa   : > { %v1796_v28 = vpop.f32.mrb[0].mxu0 }
  0xfb   : > { %v1797_v29 = vpop.f32.mrb[1].mxu0 }
  0xfc   : > { %v1798_v30 = vadd.f32 %v1797_v29, %v1796_v28  ;;  %v1799_v31 = vpop.f32.mrb[2].mxu0  ;;  %v1711_v29 = vunpack.c.l.bf16 %v2264_v49 }
  0xfd   : > { %v1800_v32 = vpop.f32.mrb[3].mxu0 }
  0xfe   : > { %v1801_v33 = vadd.f32 %v1800_v32, %v1799_v31  ;;  %v902_v36 = vadd.f32 %v1798_v30, %v2257_v34 }
 0x100   : > { %v905_v45 = vadd.f32 %v1801_v33, %v2257_v34 }
 0x102   : > { %v1802_v37 = vpop.f32.mrb[4].mxu0 }
 0x103   : > { %v1803_v39 = vpop.f32.mrb[5].mxu0 }
 0x104   : > { %v1804_v41 = vadd.f32 %v1803_v39, %v1802_v37  ;;  %v1805_v42 = vpop.f32.mrb[6].mxu0 }
 0x105   : > { %v1062_v40 = vpop.f32.mrb[0].mxu1  ;;  %v1806_v47 = vpop.f32.mrb[7].mxu0 }
 0x106   : > { %v1063_v43 = vadd.f32 %v1062_v40, %v902_v36  ;;  %v1064_v44 = vpop.f32.mrb[1].mxu1  ;;  %v1807_v58 = vadd.f32 %v1806_v47, %v1805_v42  ;;  %v910_v6 = vadd.f32 %v1804_v41, %v2257_v34 }
 0x107   : > { %v1065_v57 = vpop.f32.mrb[2].mxu1 }
 0x108   : > { %v1253_v62 = vadd.f32 %v1703_v38, %v1063_v43  ;;  %v1066_v63 = vadd.f32 %v1065_v57, %v905_v45  ;;  %v1067_v0 = vpop.f32.mrb[3].mxu1  ;;  %v913_v16 = vadd.f32 %v1807_v58, %v2257_v34  ;;  %v1712_v38 = vunpack.c.h.bf16 %v2264_v49 }
 0x109   : > { %v1715_v58 = vunpack.c.l.bf16 %v2267_v50 }
 0x10a   : > { %v1669_v4 = vpack.c.bf16 %v1253_v62, %v1253_v62  ;;  %v1254_v5 = vadd.f32 %v1704_v46, %v1066_v63  ;;  %v1808_v7 = vpop.f32.mrb[8].mxu0 }
 0x10b   : > { %v1809_v10 = vpop.f32.mrb[9].mxu0 }
 0x10c   : > { %1414 = vst.msk [vmem:[%s2301_s9] sm:$0xf] %vm1413_vm1, %v1669_v4  ;;  %v1670_v8 = vpack.c.bf16 %v1254_v5, %v1254_v5  ;;  %v1810_v12 = vadd.f32 %v1809_v10, %v1808_v7  ;;  %v1811_v13 = vpop.f32.mrb[10].mxu0  ;;  %v1716_v7 = vunpack.c.h.bf16 %v2267_v50 }
 0x10d   : > { %v1070_v11 = vpop.f32.mrb[4].mxu1  ;;  %v1812_v18 = vpop.f32.mrb[11].mxu0 }
 0x10e   : > { %1415 = vst.msk [vmem:[%s2301_s9 + $0x4] sm:$0xf] %vm1413_vm1, %v1670_v8  ;;  %v1071_v14 = vadd.f32 %v1070_v11, %v910_v6  ;;  %v1072_v15 = vpop.f32.mrb[5].mxu1  ;;  %v1813_v20 = vadd.f32 %v1812_v18, %v1811_v13  ;;  %v918_v26 = vadd.f32 %v1810_v12, %v2257_v34 }
 0x10f   : > { %v1073_v19 = vpop.f32.mrb[6].mxu1 }
 0x110   : > { %v1255_v21 = vadd.f32 %v1707_v9, %v1071_v14  ;;  %v1074_v22 = vadd.f32 %v1073_v19, %v913_v16  ;;  %v1075_v23 = vpop.f32.mrb[7].mxu1  ;;  %v921_v37 = vadd.f32 %v1813_v20, %v2257_v34  ;;  %v1719_v19 = vunpack.c.l.bf16 %v2270_v51 }
 0x112   : > { %v1671_v24 = vpack.c.bf16 %v1255_v21, %v1255_v21  ;;  %v1256_v25 = vadd.f32 %v1708_v17, %v1074_v22  ;;  %v1814_v27 = vpop.f32.mrb[12].mxu0 }
 0x113   : > { %v1815_v30 = vpop.f32.mrb[13].mxu0 }
 0x114   : > { %1416 = vst.msk [vmem:[%s2301_s9 + $0x8] sm:$0xf] %vm1413_vm1, %v1671_v24  ;;  %v1672_v28 = vpack.c.bf16 %v1256_v25, %v1256_v25  ;;  %v1816_v32 = vadd.f32 %v1815_v30, %v1814_v27  ;;  %v1817_v33 = vpop.f32.mrb[14].mxu0 }
 0x115   : > { %v1078_v31 = vpop.f32.mrb[8].mxu1  ;;  %v1818_v39 = vpop.f32.mrb[15].mxu0 }
 0x116   : > { %1417 = vst.msk [vmem:[%s2301_s9 + $0xc] sm:$0xf] %vm1413_vm1, %v1672_v28  ;;  %v1079_v35 = vadd.f32 %v1078_v31, %v918_v26  ;;  %v1080_v36 = vpop.f32.mrb[9].mxu1  ;;  %v1819_v41 = vadd.f32 %v1818_v39, %v1817_v33  ;;  %v926_v47 = vadd.f32 %v1816_v32, %v2257_v34  ;;  %v1720_v26 = vunpack.c.h.bf16 %v2270_v51 }
 0x117   : > { %v1081_v40 = vpop.f32.mrb[10].mxu1  ;;  %v1723_v39 = vunpack.c.l.bf16 %v2273_v52 }
 0x118   : > { %v1257_v42 = vadd.f32 %v1711_v29, %v1079_v35  ;;  %v1082_v43 = vadd.f32 %v1081_v40, %v921_v37  ;;  %v1083_v44 = vpop.f32.mrb[11].mxu1  ;;  %v929_v6 = vadd.f32 %v1819_v41, %v2257_v34 }
 0x11a   : > { %v1673_v45 = vpack.c.bf16 %v1257_v42, %v1257_v42  ;;  %v1258_v46 = vadd.f32 %v1712_v38, %v1082_v43  ;;  %v1820_v48 = vpop.f32.mrb[16].mxu0 }
 0x11b   : > { %v1821_v62 = vpop.f32.mrb[17].mxu0 }
 0x11c   : > { %1418 = vst.msk [vmem:[%s2301_s9 + $0x10] sm:$0xf] %vm1413_vm1, %v1673_v45  ;;  %v1674_v57 = vpack.c.bf16 %v1258_v46, %v1258_v46  ;;  %v1822_v49 = vadd.f32 %v1821_v62, %v1820_v48  ;;  %v1823_v0 = vpop.f32.mrb[18].mxu0  ;;  %v1724_v46 = vunpack.c.h.bf16 %v2273_v52 }
 0x11d   : > { %v1086_v63 = vpop.f32.mrb[12].mxu1  ;;  %v1824_v8 = vpop.f32.mrb[19].mxu0 }
 0x11e   : > { %1419 = vst.msk [vmem:[%s2301_s9 + $0x14] sm:$0xf] %vm1413_vm1, %v1674_v57  ;;  %v1087_v4 = vadd.f32 %v1086_v63, %v926_v47  ;;  %v1088_v5 = vpop.f32.mrb[13].mxu1  ;;  %v1825_v10 = vadd.f32 %v1824_v8, %v1823_v0  ;;  %v934_v16 = vadd.f32 %v1822_v49, %v2257_v34 }
 0x11f   : > { %v1089_v9 = vpop.f32.mrb[14].mxu1 }
 0x120   : > { %v1259_v11 = vadd.f32 %v1715_v58, %v1087_v4  ;;  %v1090_v12 = vadd.f32 %v1089_v9, %v929_v6  ;;  %v1091_v13 = vpop.f32.mrb[15].mxu1  ;;  %v937_v25 = vadd.f32 %v1825_v10, %v2257_v34 }
 0x122   : > { %v1675_v14 = vpack.c.bf16 %v1259_v11, %v1259_v11  ;;  %v1260_v15 = vadd.f32 %v1716_v7, %v1090_v12  ;;  %v1826_v17 = vpop.f32.mrb[20].mxu0  ;;  %v1727_v7 = vunpack.c.l.bf16 %v2276_v53 }
 0x123   : > { %v1827_v20 = vpop.f32.mrb[21].mxu0 }
 0x124   : > { %1420 = vst.msk [vmem:[%s2301_s9 + $0x18] sm:$0xf] %vm1413_vm1, %v1675_v14  ;;  %v1676_v18 = vpack.c.bf16 %v1260_v15, %v1260_v15  ;;  %v1828_v50 = vadd.f32 %v1827_v20, %v1826_v17  ;;  %v1829_v22 = vpop.f32.mrb[22].mxu0  ;;  %v1728_v14 = vunpack.c.h.bf16 %v2276_v53 }
 0x125   : > { %v1094_v21 = vpop.f32.mrb[16].mxu1  ;;  %v1830_v27 = vpop.f32.mrb[23].mxu0 }
 0x126   : > { %1421 = vst.msk [vmem:[%s2301_s9 + $0x1c] sm:$0xf] %vm1413_vm1, %v1676_v18  ;;  %v1095_v23 = vadd.f32 %v1094_v21, %v934_v16  ;;  %v1096_v24 = vpop.f32.mrb[17].mxu1  ;;  %v1831_v29 = vadd.f32 %v1830_v27, %v1829_v22  ;;  %v942_v36 = vadd.f32 %v1828_v50, %v2257_v34 }
 0x127   : > { %v1097_v28 = vpop.f32.mrb[18].mxu1 }
 0x128   : > { %v1261_v30 = vadd.f32 %v1719_v19, %v1095_v23  ;;  %v1098_v31 = vadd.f32 %v1097_v28, %v937_v25  ;;  %v1099_v32 = vpop.f32.mrb[19].mxu1  ;;  %v945_v45 = vadd.f32 %v1831_v29, %v2257_v34  ;;  %v1731_v25 = vunpack.c.l.bf16 %v2279_v54 }
 0x129   : > { %v1732_v32 = vunpack.c.h.bf16 %v2279_v54 }
 0x12a   : > { %v1677_v33 = vpack.c.bf16 %v1261_v30, %v1261_v30  ;;  %v1262_v35 = vadd.f32 %v1720_v26, %v1098_v31  ;;  %v1832_v37 = vpop.f32.mrb[24].mxu0 }
 0x12b   : > { %v1833_v40 = vpop.f32.mrb[25].mxu0 }
 0x12c   : > { %1422 = vst.msk [vmem:[%s2301_s9 + $0x20] sm:$0xf] %vm1413_vm1, %v1677_v33  ;;  %v1678_v38 = vpack.c.bf16 %v1262_v35, %v1262_v35  ;;  %v1834_v51 = vadd.f32 %v1833_v40, %v1832_v37  ;;  %v1835_v42 = vpop.f32.mrb[26].mxu0 }
 0x12d   : > { %v1102_v41 = vpop.f32.mrb[20].mxu1  ;;  %v1836_v47 = vpop.f32.mrb[27].mxu0 }
 0x12e   : > { %1423 = vst.msk [vmem:[%s2301_s9 + $0x24] sm:$0xf] %vm1413_vm1, %v1678_v38  ;;  %v1103_v43 = vadd.f32 %v1102_v41, %v942_v36  ;;  %v1104_v44 = vpop.f32.mrb[21].mxu1  ;;  %v1837_v57 = vadd.f32 %v1836_v47, %v1835_v42  ;;  %v950_v4 = vadd.f32 %v1834_v51, %v2257_v34 }
 0x12f   : > { %v1105_v48 = vpop.f32.mrb[22].mxu1  ;;  %v1735_v44 = vunpack.c.l.bf16 %v2282_v55 }
 0x130   : > { %v1263_v58 = vadd.f32 %v1723_v39, %v1103_v43  ;;  %v1106_v62 = vadd.f32 %v1105_v48, %v945_v45  ;;  %v1107_v63 = vpop.f32.mrb[23].mxu1  ;;  %v953_v13 = vadd.f32 %v1837_v57, %v2257_v34 }
 0x132   : > { %v1679_v49 = vpack.c.bf16 %v1263_v58, %v1263_v58  ;;  %v1264_v0 = vadd.f32 %v1724_v46, %v1106_v62  ;;  %v1838_v5 = vpop.f32.mrb[28].mxu0  ;;  %v1736_v62 = vunpack.c.h.bf16 %v2282_v55 }
 0x133   : > { %v1839_v8 = vpop.f32.mrb[29].mxu0 }
 0x134   : > { %1424 = vst.msk [vmem:[%s2301_s9 + $0x28] sm:$0xf] %vm1413_vm1, %v1679_v49  ;;  %v1680_v6 = vpack.c.bf16 %v1264_v0, %v1264_v0  ;;  %v1840_v52 = vadd.f32 %v1839_v8, %v1838_v5  ;;  %v1841_v10 = vpop.f32.mrb[30].mxu0 }
 0x135   : > { %v1110_v9 = vpop.f32.mrb[24].mxu1  ;;  %v1842_v15 = vpop.f32.mrb[31].mxu0 }
 0x136   : > { %1425 = vst.msk [vmem:[%s2301_s9 + $0x2c] sm:$0xf] %vm1413_vm1, %v1680_v6  ;;  %v1111_v11 = vadd.f32 %v1110_v9, %v950_v4  ;;  %v1112_v12 = vpop.f32.mrb[25].mxu1  ;;  %v1843_v17 = vadd.f32 %v1842_v15, %v1841_v10  ;;  %v958_v22 = vadd.f32 %v1840_v52, %v2257_v34 }
 0x137   : > { %v1113_v16 = vpop.f32.mrb[26].mxu1 }
 0x138   : > { %v1265_v18 = vadd.f32 %v1727_v7, %v1111_v11  ;;  %v1114_v19 = vadd.f32 %v1113_v16, %v953_v13  ;;  %v1115_v20 = vpop.f32.mrb[27].mxu1  ;;  %v961_v31 = vadd.f32 %v1843_v17, %v2257_v34  ;;  %v1739_v11 = vunpack.c.l.bf16 %v2285_v56 }
 0x13a   : > { %v1681_v21 = vpack.c.bf16 %v1265_v18, %v1265_v18  ;;  %v1266_v50 = vadd.f32 %v1728_v14, %v1114_v19  ;;  %v1844_v23 = vpop.f32.mrb[32].mxu0  ;;  %v1740_v18 = vunpack.c.h.bf16 %v2285_v56 }
 0x13b   : > { %v1845_v26 = vpop.f32.mrb[33].mxu0 }
 0x13c   : > { %1426 = vst.msk [vmem:[%s2301_s9 + $0x30] sm:$0xf] %vm1413_vm1, %v1681_v21  ;;  %v1682_v24 = vpack.c.bf16 %v1266_v50, %v1266_v50  ;;  %v1846_v53 = vadd.f32 %v1845_v26, %v1844_v23  ;;  %v1847_v28 = vpop.f32.mrb[34].mxu0 }
 0x13d   : > { %v1118_v27 = vpop.f32.mrb[28].mxu1  ;;  %v1848_v33 = vpop.f32.mrb[35].mxu0 }
 0x13e   : > { %1427 = vst.msk [vmem:[%s2301_s9 + $0x34] sm:$0xf] %vm1413_vm1, %v1682_v24  ;;  %v1119_v29 = vadd.f32 %v1118_v27, %v958_v22  ;;  %v1120_v30 = vpop.f32.mrb[29].mxu1  ;;  %v1849_v36 = vadd.f32 %v1848_v33, %v1847_v28  ;;  %v966_v51 = vadd.f32 %v1846_v53, %v2257_v34  ;;  %v1743_v28 = vunpack.c.l.bf16 %v2288_v59 }
 0x13f   : > { %v1121_v35 = vpop.f32.mrb[30].mxu1 }
 0x140   : > { %v1267_v37 = vadd.f32 %v1731_v25, %v1119_v29  ;;  %v1122_v38 = vadd.f32 %v1121_v35, %v961_v31  ;;  %v1123_v39 = vpop.f32.mrb[31].mxu1  ;;  %v969_v58 = vadd.f32 %v1849_v36, %v2257_v34  ;;  %v1744_v36 = vunpack.c.h.bf16 %v2288_v59 }
 0x142   : > { %v1683_v40 = vpack.c.bf16 %v1267_v37, %v1267_v37  ;;  %v1268_v41 = vadd.f32 %v1732_v32, %v1122_v38  ;;  %v1850_v42 = vpop.f32.mrb[36].mxu0 }
 0x143   : > { %v1851_v45 = vpop.f32.mrb[37].mxu0 }
 0x144   : > { %1428 = vst.msk [vmem:[%s2301_s9 + $0x38] sm:$0xf] %vm1413_vm1, %v1683_v40  ;;  %v1684_v43 = vpack.c.bf16 %v1268_v41, %v1268_v41  ;;  %v1852_v54 = vadd.f32 %v1851_v45, %v1850_v42  ;;  %v1853_v47 = vpop.f32.mrb[38].mxu0 }
 0x145   : > { %v1126_v46 = vpop.f32.mrb[32].mxu1  ;;  %v1854_v63 = vpop.f32.mrb[39].mxu0 }
 0x146   : > { %1429 = vst.msk [vmem:[%s2301_s9 + $0x3c] sm:$0xf] %vm1413_vm1, %v1684_v43  ;;  %v1127_v48 = vadd.f32 %v1126_v46, %v966_v51  ;;  %v1128_v57 = vpop.f32.mrb[33].mxu1  ;;  %v1855_v0 = vadd.f32 %v1854_v63, %v1853_v47  ;;  %v974_v9 = vadd.f32 %v1852_v54, %v2257_v34  ;;  %v1747_v54 = vunpack.c.l.bf16 %v2291_v60 }
 0x147   : > { %v1129_v49 = vpop.f32.mrb[34].mxu1 }
 0x148   : > { %v1269_v4 = vadd.f32 %v1735_v44, %v1127_v48  ;;  %v1130_v5 = vadd.f32 %v1129_v49, %v969_v58  ;;  %v1131_v6 = vpop.f32.mrb[35].mxu1  ;;  %v977_v17 = vadd.f32 %v1855_v0, %v2257_v34  ;;  %v1748_v49 = vunpack.c.h.bf16 %v2291_v60 }
 0x14a   : > { %v1685_v7 = vpack.c.bf16 %v1269_v4, %v1269_v4  ;;  %v1270_v8 = vadd.f32 %v1736_v62, %v1130_v5  ;;  %v1856_v52 = vpop.f32.mrb[40].mxu0 }
 0x14b   : > { %v1857_v12 = vpop.f32.mrb[41].mxu0 }
 0x14c   : > { %1430 = vst.msk [vmem:[%s2301_s9 + $0x40] sm:$0xf] %vm1413_vm1, %v1685_v7  ;;  %v1686_v10 = vpack.c.bf16 %v1270_v8, %v1270_v8  ;;  %v1858_v55 = vadd.f32 %v1857_v12, %v1856_v52  ;;  %v1859_v14 = vpop.f32.mrb[42].mxu0 }
 0x14d   : > { %v1134_v13 = vpop.f32.mrb[36].mxu1  ;;  %v1860_v19 = vpop.f32.mrb[43].mxu0 }
 0x14e   : > { %1431 = vst.msk [vmem:[%s2301_s9 + $0x44] sm:$0xf] %vm1413_vm1, %v1686_v10  ;;  %v1135_v15 = vadd.f32 %v1134_v13, %v974_v9  ;;  %v1136_v16 = vpop.f32.mrb[37].mxu1  ;;  %v1861_v21 = vadd.f32 %v1860_v19, %v1859_v14  ;;  %v982_v26 = vadd.f32 %v1858_v55, %v2257_v34  ;;  %v1751_v13 = vunpack.c.l.bf16 %v2294_v61 }
 0x14f   : > { %v1137_v20 = vpop.f32.mrb[38].mxu1  ;;  %v1752_v19 = vunpack.c.h.bf16 %v2294_v61 }
 0x150   : > { %v1271_v50 = vadd.f32 %v1739_v11, %v1135_v15  ;;  %v1138_v22 = vadd.f32 %v1137_v20, %v977_v17  ;;  %v1139_v23 = vpop.f32.mrb[39].mxu1  ;;  %v985_v35 = vadd.f32 %v1861_v21, %v2257_v34 }
 0x152   : > { %v1687_v24 = vpack.c.bf16 %v1271_v50, %v1271_v50  ;;  %v1272_v25 = vadd.f32 %v1740_v18, %v1138_v22  ;;  %v1862_v27 = vpop.f32.mrb[44].mxu0 }
 0x153   : > { %v1863_v29 = vpop.f32.mrb[45].mxu0 }
 0x154   : > { %1432 = vst.msk [vmem:[%s2301_s9 + $0x48] sm:$0xf] %vm1413_vm1, %v1687_v24  ;;  %v1688_v53 = vpack.c.bf16 %v1272_v25, %v1272_v25  ;;  %v1864_v56 = vadd.f32 %v1863_v29, %v1862_v27  ;;  %v1865_v31 = vpop.f32.mrb[46].mxu0  ;;  %v1755_v29 = vunpack.c.l.bf16 %v2304_v1 }
 0x155   : > { %v1142_v30 = vpop.f32.mrb[40].mxu1  ;;  %v1866_v37 = vpop.f32.mrb[47].mxu0 }
 0x156   : > { %1433 = vst.msk [vmem:[%s2301_s9 + $0x4c] sm:$0xf] %vm1413_vm1, %v1688_v53  ;;  %v1143_v32 = vadd.f32 %v1142_v30, %v982_v26  ;;  %v1144_v33 = vpop.f32.mrb[41].mxu1  ;;  %v1867_v39 = vadd.f32 %v1866_v37, %v1865_v31  ;;  %v990_v44 = vadd.f32 %v1864_v56, %v2257_v34 }
 0x157   : > { %v1145_v38 = vpop.f32.mrb[42].mxu1 }
 0x158   : > { %v1273_v40 = vadd.f32 %v1743_v28, %v1143_v32  ;;  %v1146_v41 = vadd.f32 %v1145_v38, %v985_v35  ;;  %v1147_v51 = vpop.f32.mrb[43].mxu1  ;;  %v993_v63 = vadd.f32 %v1867_v39, %v2257_v34 }
 0x15a   : > { %v1689_v42 = vpack.c.bf16 %v1273_v40, %v1273_v40  ;;  %v1274_v43 = vadd.f32 %v1744_v36, %v1146_v41  ;;  %v1868_v45 = vpop.f32.mrb[48].mxu0  ;;  %v1756_v36 = vunpack.c.h.bf16 %v2304_v1 }
 0x15b   : > { %v1869_v47 = vpop.f32.mrb[49].mxu0 }
 0x15c   : > { %1434 = vst.msk [vmem:[%s2301_s9 + $0x50] sm:$0xf] %vm1413_vm1, %v1689_v42  ;;  %v1690_v46 = vpack.c.bf16 %v1274_v43, %v1274_v43  ;;  %v1870_v59 = vadd.f32 %v1869_v47, %v1868_v45  ;;  %v1871_v57 = vpop.f32.mrb[50].mxu0 }
 0x15d   : > { %v1150_v48 = vpop.f32.mrb[44].mxu1  ;;  %v1872_v0 = vpop.f32.mrb[51].mxu0 }
 0x15e   : > { %1435 = vst.msk [vmem:[%s2301_s9 + $0x54] sm:$0xf] %vm1413_vm1, %v1690_v46  ;;  %v1151_v58 = vadd.f32 %v1150_v48, %v990_v44  ;;  %v1152_v62 = vpop.f32.mrb[45].mxu1  ;;  %v1873_v5 = vadd.f32 %v1872_v0, %v1871_v57  ;;  %v998_v10 = vadd.f32 %v1870_v59, %v2257_v34 }
 0x15f   : > { %v1153_v4 = vpop.f32.mrb[46].mxu1 }
 0x160   : > { %v1275_v6 = vadd.f32 %v1747_v54, %v1151_v58  ;;  %v1154_v7 = vadd.f32 %v1153_v4, %v993_v63  ;;  %v1155_v8 = vpop.f32.mrb[47].mxu1  ;;  %v1001_v18 = vadd.f32 %v1873_v5, %v2257_v34  ;;  %v1759_v54 = vunpack.c.l.bf16 %v2307_v2 }
 0x161   : > { %v1760_v63 = vunpack.c.h.bf16 %v2307_v2 }
 0x162   : > { %v1691_v9 = vpack.c.bf16 %v1275_v6, %v1275_v6  ;;  %v1276_v52 = vadd.f32 %v1748_v49, %v1154_v7  ;;  %v1874_v11 = vpop.f32.mrb[52].mxu0 }
 0x163   : > { %v1875_v55 = vpop.f32.mrb[53].mxu0 }
 0x164   : > { %1436 = vst.msk [vmem:[%s2301_s9 + $0x58] sm:$0xf] %vm1413_vm1, %v1691_v9  ;;  %v1692_v12 = vpack.c.bf16 %v1276_v52, %v1276_v52  ;;  %v1876_v60 = vadd.f32 %v1875_v55, %v1874_v11  ;;  %v1877_v15 = vpop.f32.mrb[54].mxu0  ;;  %v1763_v11 = vunpack.c.l.bf16 %v2310_v3 }
 0x165   : > { %v1158_v14 = vpop.f32.mrb[48].mxu1  ;;  %v1878_v20 = vpop.f32.mrb[55].mxu0 }
 0x166   : > { %1437 = vst.msk [vmem:[%s2301_s9 + $0x5c] sm:$0xf] %vm1413_vm1, %v1692_v12  ;;  %v1159_v16 = vadd.f32 %v1158_v14, %v998_v10  ;;  %v1160_v17 = vpop.f32.mrb[49].mxu1  ;;  %v1879_v50 = vadd.f32 %v1878_v20, %v1877_v15  ;;  %v1006_v27 = vadd.f32 %v1876_v60, %v2257_v34  ;;  %v1764_v14 = vunpack.c.h.bf16 %v2310_v3 }
 0x167   : > { %v1161_v21 = vpop.f32.mrb[50].mxu1 }
 0x168   : > { %v1277_v22 = vadd.f32 %v1751_v13, %v1159_v16  ;;  %v1162_v23 = vadd.f32 %v1161_v21, %v1001_v18  ;;  %v1163_v24 = vpop.f32.mrb[51].mxu1  ;;  %v1009_v35 = vadd.f32 %v1879_v50, %v2257_v34 }
 0x16a   : > { %v1693_v25 = vpack.c.bf16 %v1277_v22, %v1277_v22  ;;  %v1278_v26 = vadd.f32 %v1752_v19, %v1162_v23  ;;  %v1880_v53 = vpop.f32.mrb[56].mxu0 }
 0x16b   : > { %v1881_v30 = vpop.f32.mrb[57].mxu0 }
 0x16c   : > { %1438 = vst.msk [vmem:[%s2301_s9 + $0x60] sm:$0xf] %vm1413_vm1, %v1693_v25  ;;  %v1694_v28 = vpack.c.bf16 %v1278_v26, %v1278_v26  ;;  %v1882_v61 = vadd.f32 %v1881_v30, %v1880_v53  ;;  %v1883_v31 = vpop.f32.mrb[58].mxu0 }
 0x16d   : > { %v1166_v56 = vpop.f32.mrb[52].mxu1  ;;  %v1884_v37 = vpop.f32.mrb[59].mxu0 }
 0x16e   : > { %1439 = vst.msk [vmem:[%s2301_s9 + $0x64] sm:$0xf] %vm1413_vm1, %v1694_v28  ;;  %v1167_v32 = vadd.f32 %v1166_v56, %v1006_v27  ;;  %v1168_v33 = vpop.f32.mrb[53].mxu1  ;;  %v1885_v39 = vadd.f32 %v1884_v37, %v1883_v31  ;;  %v1014_v44 = vadd.f32 %v1882_v61, %v2257_v34 }
 0x16f   : > { %v1169_v38 = vpop.f32.mrb[54].mxu1 }
 0x170   : > { %v1279_v40 = vadd.f32 %v1755_v29, %v1167_v32  ;;  %v1170_v41 = vadd.f32 %v1169_v38, %v1009_v35  ;;  %v1171_v51 = vpop.f32.mrb[55].mxu1  ;;  %v1017_v62 = vadd.f32 %v1885_v39, %v2257_v34 }
 0x172   : > { %v1695_v42 = vpack.c.bf16 %v1279_v40, %v1279_v40  ;;  %v1280_v43 = vadd.f32 %v1756_v36, %v1170_v41  ;;  %v1886_v45 = vpop.f32.mrb[60].mxu0 }
 0x173   : > { %v1887_v47 = vpop.f32.mrb[61].mxu0 }
 0x174   : > { %1440 = vst.msk [vmem:[%s2301_s9 + $0x68] sm:$0xf] %vm1413_vm1, %v1695_v42  ;;  %v1696_v46 = vpack.c.bf16 %v1280_v43, %v1280_v43  ;;  %v1888_v1 = vadd.f32 %v1887_v47, %v1886_v45  ;;  %v1889_v59 = vpop.f32.mrb[62].mxu0 }
 0x175   : > { %v1174_v48 = vpop.f32.mrb[56].mxu1  ;;  %v1890_v49 = vpop.f32.mrb[63].mxu0 }
 0x176   : > { %1441 = vst.msk [vmem:[%s2301_s9 + $0x6c] sm:$0xf] %vm1413_vm1, %v1696_v46  ;;  %v1175_v57 = vadd.f32 %v1174_v48, %v1014_v44  ;;  %v1176_v58 = vpop.f32.mrb[57].mxu1  ;;  %v1891_v4 = vadd.f32 %v1890_v49, %v1889_v59  ;;  %v1022_v52 = vadd.f32 %v1888_v1, %v2257_v34 }
 0x177   : > { %v1177_v0 = vpop.f32.mrb[58].mxu1 }
 0x178   : > { %v1281_v5 = vadd.f32 %v1759_v54, %v1175_v57  ;;  %v1178_v6 = vadd.f32 %v1177_v0, %v1017_v62  ;;  %v1179_v7 = vpop.f32.mrb[59].mxu1  ;;  %v1025_v55 = vadd.f32 %v1891_v4, %v2257_v34 }
 0x17a   : > { %v1697_v8 = vpack.c.bf16 %v1281_v5, %v1281_v5  ;;  %v1282_v9 = vadd.f32 %v1760_v63, %v1178_v6 }
 0x17c   : > { %1442 = vst.msk [vmem:[%s2301_s9 + $0x70] sm:$0xf] %vm1413_vm1, %v1697_v8  ;;  %v1698_v10 = vpack.c.bf16 %v1282_v9, %v1282_v9 }
 0x17d   : > { %v1182_v12 = vpop.f32.mrb[60].mxu1 }
 0x17e   : > { %1443 = vst.msk [vmem:[%s2301_s9 + $0x74] sm:$0xf] %vm1413_vm1, %v1698_v10  ;;  %v1183_v2 = vadd.f32 %v1182_v12, %v1022_v52  ;;  %v1184_v13 = vpop.f32.mrb[61].mxu1 }
 0x17f   : > { %v1185_v60 = vpop.f32.mrb[62].mxu1 }
 0x180   : > { %v1283_v15 = vadd.f32 %v1763_v11, %v1183_v2  ;;  %v1186_v16 = vadd.f32 %v1185_v60, %v1025_v55  ;;  %v1187_v17 = vpop.f32.mrb[63].mxu1 }
 0x182   : > { %v1699_v18 = vpack.c.bf16 %v1283_v15, %v1283_v15  ;;  %v1284_v19 = vadd.f32 %v1764_v14, %v1186_v16 }
 0x184   : > { %1444 = vst.msk [vmem:[%s2301_s9 + $0x78] sm:$0xf] %vm1413_vm1, %v1699_v18  ;;  %v1700_v20 = vpack.c.bf16 %v1284_v19, %v1284_v19 }
 0x186   : > { %1445 = vst.msk [vmem:[%s2301_s9 + $0x7c] sm:$0xf] %vm1413_vm1, %v1700_v20 }
 0x187 PF: > { %s14_s15 = sadd.s32 1, %s2030_s15  }
 0x188   : > { %p11_p4 = scmp.ge.s32.totalorder %s14_s15, 4  }
 0x18a   :  { %13 = sbr.rel (!%p11_p4) target bundleno = 1 (0x1), region = 69 }

// kernel: expert_forward.11
= control target key start
LH: loop header
LB: loop body
LE: loop exit
PB: predicated region body
PF: predicated region fallthrough
CT: control target
= control target key end

     0   :  { %s2443_s15 = smov 0   ;;  %s2828_s0 = inlined_call_operand.vmem [shape: bf16[512,432], index: 0, kind: input, shape index: {}]   ;;  %s2829_s1 = inlined_call_operand.vmem [shape: bf16[432,16], index: 1, kind: input, shape index: {}]   ;;  %s2830_s2 = inlined_call_operand.vmem [shape: f32[1,16], index: 2, kind: input, shape index: {}]   ;;  %s2831_s3 = inlined_call_operand.vmem [shape: bf16[512,16], index: 3, kind: input, shape index: {}, may-alias: {3,4}]   ;;  %s2832_s4 = inlined_call_operand.vmem [shape: bf16[512,16], index: 4, kind: output, shape index: {}, may-alias: {3,4}]  }
   0x1 LB: > { %s1738_s16 = sadd.s32 4294967295, %s2415_s15   ;;  %p1742_p0 = scmp.ge.s32.totalorder %s2415_s15, 1  ;;  %s2415_s15 = sphi %s2443_s15, %s14_s15  }
   0x2   : > { %p175_p1 = scmp.lt.s32.totalorder %s2415_s15, 3 }
   0x4   : > { %p176_p2 = pnand %p1742_p0, %p175_p1 }
   0x5   : > { %v2157_v0 = vld [vmem:[%s2829_s1 + $0x80] sm:$0xff] (!%p176_p2)   ;;  %v2417_v1 = vmov (!%p176_p2), 0   ;;  %v2160_v4 = vld [vmem:[%s2829_s1 + $0x88] sm:$0xff] (!%p176_p2)   ;;  %v2163_v7 = vld [vmem:[%s2829_s1 + $0x90] sm:$0xff] (!%p176_p2)   ;;  %s1743_s11 = sshll.u32 (!%p176_p2), %s1738_s16, 5  ;;  %vm818_vm0 = vcmask (!%p176_p2), 392192  }
   0x6   : > { %179 = sbr.rel (%p176_p2) target bundleno = 419 (0x1a3), region = 36  ;;  %1028 = vmatprep.subr.bf16.mxu1 (!%p176_p2), %v2417_v1  ;;  %v2158_v2 = vld [vmem:[%s2829_s1 + $0x40] sm:$0xff] (!%p176_p2)   ;;  %v2161_v5 = vld [vmem:[%s2829_s1 + $0x48] sm:$0xff] (!%p176_p2)   ;;  %v2164_v8 = vld [vmem:[%s2829_s1 + $0x50] sm:$0xff] (!%p176_p2)   ;;  %p208_p3 = scmp.lt.s32.totalorder (!%p176_p2), %s1743_s11, 63  ;;  %vm1637_vm1 = vcmask (!%p176_p2), 125952  }
   0x7   : > { %1029 = vmatpush1.bf16.msra.mxu1 (!%p176_p2), %v2157_v0  ;;  %v2159_v3 = vld [vmem:[%s2829_s1] sm:$0xff] (!%p176_p2)   ;;  %2036 = vmatprep.subr.bf16.mxu0 (!%p176_p2), %v2158_v2  ;;  %v2162_v6 = vld [vmem:[%s2829_s1 + $0x8] sm:$0xff] (!%p176_p2)   ;;  %v2165_v9 = vld [vmem:[%s2829_s1 + $0x10] sm:$0xff] (!%p176_p2)  }
   0x8   : > { %1030 = vmatprep.subr.bf16.mxu1 (!%p176_p2), %v2417_v1  ;;  %2037 = vmatpush3.bf16.msra.mxu0 (!%p176_p2), %v2159_v3  ;;  %v2166_v10 = vld [vmem:[%s2829_s1 + $0x98] sm:$0xff] (!%p176_p2)   ;;  %v2170_v13 = vld [vmem:[%s2829_s1 + $0x60] sm:$0xff] (!%p176_p2)   ;;  %v2173_v16 = vld [vmem:[%s2829_s1 + $0x68] sm:$0xff] (!%p176_p2)  }
   0x9   : > { %2038 = vmatprep.subr.bf16.mxu0 (!%p176_p2), %v2161_v5  ;;  %v2167_v11 = vld [vmem:[%s2829_s1 + $0x58] sm:$0xff] (!%p176_p2)   ;;  %v2169_v14 = vld [vmem:[%s2829_s1 + $0xa0] sm:$0xff] (!%p176_p2)   ;;  %v2172_v17 = vld [vmem:[%s2829_s1 + $0xa8] sm:$0xff] (!%p176_p2)  }
   0xa   : > { %v2168_v12 = vld [vmem:[%s2829_s1 + $0x18] sm:$0xff] (!%p176_p2)   ;;  %v2171_v15 = vld [vmem:[%s2829_s1 + $0x20] sm:$0xff] (!%p176_p2)   ;;  %v2174_v18 = vld [vmem:[%s2829_s1 + $0x28] sm:$0xff] (!%p176_p2)  }
   0xb   : > { %1031 = vmatpush1.bf16.msra.mxu1 (!%p176_p2), %v2160_v4  ;;  %v2176_v19 = vld [vmem:[%s2829_s1 + $0x70] sm:$0xff] (!%p176_p2)   ;;  %v2178_v22 = vld [vmem:[%s2829_s1 + $0xb8] sm:$0xff] (!%p176_p2)   ;;  %v2181_v26 = vld [vmem:[%s2829_s1 + $0xc0] sm:$0xff] (!%p176_p2)  }
   0xc   : > { %1032 = vmatprep.subr.bf16.mxu1 (!%p176_p2), %v2417_v1  ;;  %2039 = vmatpush3.bf16.msra.mxu0 (!%p176_p2), %v2162_v6  ;;  %v2175_v20 = vld [vmem:[%s2829_s1 + $0xb0] sm:$0xff] (!%p176_p2)   ;;  %v2179_v23 = vld [vmem:[%s2829_s1 + $0x78] sm:$0xff] (!%p176_p2)   ;;  %v2185_v30 = vld [vmem:[%s2829_s1 + $0xc8] sm:$0xff] (!%p176_p2)  }
   0xd   : > { %2040 = vmatprep.subr.bf16.mxu0 %v2164_v8  ;;  %s2834_s11 = smov (!%p208_p3, %s1743_s11), 63  ;;  %v2177_v21 = vld [vmem:[%s2829_s1 + $0x30] sm:$0xff]   ;;  %v2180_v25 = vld [vmem:[%s2829_s1 + $0x38] sm:$0xff]  }
   0xe   : > { %s1924_s29 = sshll.u32 %s2834_s11, 4  ;;  %v2186_v31 = vld [vmem:[%s2829_s1 + $0xd0] sm:$0xff]  }
   0xf   : > { %1033 = vmatpush1.bf16.msra.mxu1 %v2163_v7  ;;  %s2527_s13 = scalar_lea.vmem %s2828_s0, %s1924_s29  ;;  %s1747_s29 = sshll.u32 %s2834_s11, 2 }
  0x10   : > { %1034 = vmatprep.subr.bf16.mxu1 %v2417_v1  ;;  %2041 = vmatpush3.bf16.msra.mxu0 %v2165_v9  ;;  %v2184_v24 = vld [vmem:[%s2527_s13 + $0x4] ss:$16 sps:$4 sm:$0xff]   ;;  %v2191_v27 = vld [vmem:[%s2527_s13 + $0xc] ss:$16 sps:$4 sm:$0xff]   ;;  %v2182_v28 = vld [vmem:[%s2527_s13] ss:$16 sps:$4 sm:$0xff]   ;;  %s2648_s6 = scalar_lea.vmem %s2831_s3, %s1747_s29  ;;  %s2698_s9 = scalar_lea.vmem %s2832_s4, %s1747_s29 }
  0x11   : > { %2042 = vmatprep.subr.bf16.mxu0 %v2167_v11  ;;  %899 = vmatprep.mubr.bf16.mxu0 %v2184_v24  ;;  %v2187_v29 = vld [vmem:[%s2527_s13 + $0x24] ss:$16 sps:$4 sm:$0xff]   ;;  %v2192_v32 = vld [vmem:[%s2527_s13 + $0x20] ss:$16 sps:$4 sm:$0xff]   ;;  %v2189_v34 = vld [vmem:[%s2527_s13 + $0x8] ss:$16 sps:$4 sm:$0xff]  }
  0x12   : > { %1842 = vmatprep.mubr.msk.bf16.mxu1 %vm818_vm0, %v2191_v27  ;;  %v2193_v33 = vld [vmem:[%s2527_s13 + $0x44] ss:$16 sps:$4 sm:$0xff]   ;;  %v2195_v35 = vld [vmem:[%s2527_s13 + $0x2c] ss:$16 sps:$4 sm:$0xff]   ;;  %v2197_v36 = vld [vmem:[%s2527_s13 + $0x40] ss:$16 sps:$4 sm:$0xff]  }
  0x13   : > { %1035 = vmatpush1.bf16.msra.mxu1 %v2166_v10  ;;  %v2199_v37 = vld [vmem:[%s2527_s13 + $0x64] ss:$16 sps:$4 sm:$0xff]   ;;  %v2198_v38 = vld [vmem:[%s2527_s13 + $0x28] ss:$16 sps:$4 sm:$0xff]   ;;  %v2201_v39 = vld [vmem:[%s2527_s13 + $0x4c] ss:$16 sps:$4 sm:$0xff]  }
  0x14   : > { %1036 = vmatprep.subr.bf16.mxu1 %v2417_v1  ;;  %2043 = vmatpush3.bf16.msra.mxu0 %v2168_v12  ;;  %v2203_v40 = vld [vmem:[%s2527_s13 + $0x60] ss:$16 sps:$4 sm:$0xff]   ;;  %v2205_v41 = vld [vmem:[%s2527_s13 + $0x84] ss:$16 sps:$4 sm:$0xff]   ;;  %v2204_v42 = vld [vmem:[%s2527_s13 + $0x48] ss:$16 sps:$4 sm:$0xff]  }
  0x15   : > { %2044 = vmatprep.subr.bf16.mxu0 %v2170_v13  ;;  %v2207_v43 = vld [vmem:[%s2527_s13 + $0x6c] ss:$16 sps:$4 sm:$0xff]   ;;  %v2209_v44 = vld [vmem:[%s2527_s13 + $0x80] ss:$16 sps:$4 sm:$0xff]   ;;  %v2211_v45 = vld [vmem:[%s2527_s13 + $0xa4] ss:$16 sps:$4 sm:$0xff]  }
  0x16   : > { %v2210_v46 = vld [vmem:[%s2527_s13 + $0x68] ss:$16 sps:$4 sm:$0xff]   ;;  %v2213_v47 = vld [vmem:[%s2527_s13 + $0x8c] ss:$16 sps:$4 sm:$0xff]   ;;  %v2215_v48 = vld [vmem:[%s2527_s13 + $0xa0] ss:$16 sps:$4 sm:$0xff]  }
  0x17   : > { %1037 = vmatpush1.bf16.msra.mxu1 %v2169_v14  ;;  %v2217_v49 = vld [vmem:[%s2527_s13 + $0xc4] ss:$16 sps:$4 sm:$0xff]   ;;  %v2216_v50 = vld [vmem:[%s2527_s13 + $0x88] ss:$16 sps:$4 sm:$0xff]   ;;  %v2219_v51 = vld [vmem:[%s2527_s13 + $0xac] ss:$16 sps:$4 sm:$0xff]  }
  0x18   : > { %1038 = vmatprep.subr.bf16.mxu1 %v2417_v1  ;;  %2045 = vmatpush3.bf16.msra.mxu0 %v2171_v15  ;;  %v2221_v52 = vld [vmem:[%s2527_s13 + $0xc0] ss:$16 sps:$4 sm:$0xff]   ;;  %v2223_v53 = vld [vmem:[%s2527_s13 + $0xe4] ss:$16 sps:$4 sm:$0xff]   ;;  %v2222_v54 = vld [vmem:[%s2527_s13 + $0xa8] ss:$16 sps:$4 sm:$0xff]  }
  0x19   : > { %2046 = vmatprep.subr.bf16.mxu0 %v2173_v16  ;;  %v2225_v55 = vld [vmem:[%s2527_s13 + $0xcc] ss:$16 sps:$4 sm:$0xff]   ;;  %v2227_v56 = vld [vmem:[%s2527_s13 + $0xe0] ss:$16 sps:$4 sm:$0xff]   ;;  %v2229_v57 = vld [vmem:[%s2527_s13 + $0x104] ss:$16 sps:$4 sm:$0xff]  }
  0x1a   : > { %v2228_v58 = vld [vmem:[%s2527_s13 + $0xc8] ss:$16 sps:$4 sm:$0xff]   ;;  %v2231_v59 = vld [vmem:[%s2527_s13 + $0xec] ss:$16 sps:$4 sm:$0xff]   ;;  %v2233_v60 = vld [vmem:[%s2527_s13 + $0x100] ss:$16 sps:$4 sm:$0xff]  }
  0x1b   : > { %1039 = vmatpush1.bf16.msra.mxu1 %v2172_v17  ;;  %v2235_v61 = vld [vmem:[%s2527_s13 + $0x124] ss:$16 sps:$4 sm:$0xff]   ;;  %v2234_v62 = vld [vmem:[%s2527_s13 + $0xe8] ss:$16 sps:$4 sm:$0xff]   ;;  %v2237_v63 = vld [vmem:[%s2527_s13 + $0x10c] ss:$16 sps:$4 sm:$0xff]  }
  0x1c   : > { %1040 = vmatprep.subr.bf16.mxu1 %v2417_v1  ;;  %2047 = vmatpush3.bf16.msra.mxu0 %v2174_v18  ;;  %v2239_v0 = vld [vmem:[%s2527_s13 + $0x120] ss:$16 sps:$4 sm:$0xff]   ;;  %v2240_v2 = vld [vmem:[%s2527_s13 + $0x108] ss:$16 sps:$4 sm:$0xff]   ;;  %v2243_v3 = vld [vmem:[%s2527_s13 + $0x12c] ss:$16 sps:$4 sm:$0xff]  }
  0x1d   : > { %2048 = vmatprep.subr.bf16.mxu0 %v2176_v19  ;;  %v2245_v4 = vld [vmem:[%s2527_s13 + $0x140] ss:$16 sps:$4 sm:$0xff]   ;;  %v2247_v5 = vld [vmem:[%s2527_s13 + $0x164] ss:$16 sps:$4 sm:$0xff]   ;;  %v2246_v6 = vld [vmem:[%s2527_s13 + $0x128] ss:$16 sps:$4 sm:$0xff]  }
  0x1e   : > { %v2249_v7 = vld [vmem:[%s2527_s13 + $0x14c] ss:$16 sps:$4 sm:$0xff]   ;;  %v2251_v8 = vld [vmem:[%s2527_s13 + $0x160] ss:$16 sps:$4 sm:$0xff]   ;;  %v2253_v9 = vld [vmem:[%s2527_s13 + $0x184] ss:$16 sps:$4 sm:$0xff]  }
  0x1f   : > { %1041 = vmatpush1.bf16.msra.mxu1 %v2175_v20  ;;  %v2252_v10 = vld [vmem:[%s2527_s13 + $0x148] ss:$16 sps:$4 sm:$0xff]   ;;  %v2255_v11 = vld [vmem:[%s2527_s13 + $0x16c] ss:$16 sps:$4 sm:$0xff]   ;;  %v2257_v12 = vld [vmem:[%s2527_s13 + $0x180] ss:$16 sps:$4 sm:$0xff]  }
  0x20   : > { %1042 = vmatprep.subr.bf16.mxu1 %v2417_v1  ;;  %2049 = vmatpush3.bf16.msra.mxu0 %v2177_v21  ;;  %v2259_v13 = vld [vmem:[%s2527_s13 + $0x1a4] ss:$16 sps:$4 sm:$0xff]   ;;  %v2258_v14 = vld [vmem:[%s2527_s13 + $0x168] ss:$16 sps:$4 sm:$0xff]   ;;  %v2261_v15 = vld [vmem:[%s2527_s13 + $0x18c] ss:$16 sps:$4 sm:$0xff]  }
  0x21   : > { %2050 = vmatprep.subr.bf16.mxu0 %v2179_v23  ;;  %v2263_v16 = vld [vmem:[%s2527_s13 + $0x1a0] ss:$16 sps:$4 sm:$0xff]   ;;  %v2265_v17 = vld [vmem:[%s2527_s13 + $0x1c4] ss:$16 sps:$4 sm:$0xff]   ;;  %v2264_v18 = vld [vmem:[%s2527_s13 + $0x188] ss:$16 sps:$4 sm:$0xff]  }
  0x22   : > { %v2267_v19 = vld [vmem:[%s2527_s13 + $0x1ac] ss:$16 sps:$4 sm:$0xff]   ;;  %v2269_v20 = vld [vmem:[%s2527_s13 + $0x1c0] ss:$16 sps:$4 sm:$0xff]   ;;  %v2271_v21 = vld [vmem:[%s2527_s13 + $0x1e4] ss:$16 sps:$4 sm:$0xff]  }
  0x23   : > { %1043 = vmatpush1.bf16.msra.mxu1 %v2178_v22  ;;  %v2270_v22 = vld [vmem:[%s2527_s13 + $0x1a8] ss:$16 sps:$4 sm:$0xff]   ;;  %v2273_v23 = vld [vmem:[%s2527_s13 + $0x1cc] ss:$16 sps:$4 sm:$0xff]   ;;  %v2275_v24 = vld [vmem:[%s2527_s13 + $0x1e0] ss:$16 sps:$4 sm:$0xff]  }
  0x24   : > { %1044 = vmatprep.subr.bf16.mxu1 %v2417_v1  ;;  %2051 = vmatpush3.bf16.msra.mxu0 %v2180_v25  ;;  %v2276_v25 = vld [vmem:[%s2527_s13 + $0x1c8] ss:$16 sps:$4 sm:$0xff]  }
  0x25   : > { %v2279_v27 = vld [vmem:[%s2527_s13 + $0x1e8] ss:$16 sps:$4 sm:$0xff]  }
  0x27   : > { %1045 = vmatpush1.bf16.msra.mxu1 %v2181_v26  ;;  %900 = vmatmul.mubr.bf16.vlgmr.msra.gmra.mrb[0].mxu0 %v2182_v28  ;;  %v2277_v26 = vld [vmem:[%s2527_s13 + $0x1ec] ss:$16 sps:$4 sm:$0xff]  }
  0x28   : > { %1046 = vmatprep.subr.bf16.mxu1 %v2417_v1  ;;  %907 = vmatprep.mubr.bf16.mxu0 %v2187_v29 }
  0x2b   : > { %1047 = vmatpush1.bf16.msra.mxu1 %v2185_v30 }
  0x2c   : > { %1048 = vmatprep.subr.bf16.mxu1 %v2417_v1  ;;  %v2241_v1 = vld [vmem:[%s2527_s13 + $0x144] ss:$16 sps:$4 sm:$0xff]  }
  0x2f   : > { %1049 = vmatpush1.bf16.msra.mxu1 %v2186_v31  ;;  %908 = vmatmul.mubr.bf16.gmra.mrb[4].mxu0 %v2192_v32 }
  0x30   : > { %915 = vmatprep.mubr.bf16.mxu0 %v2193_v33 }
  0x32   : > { %1061 = vmatmul.mubr.bf16.vlgmr.msra.gmra.mrb[0].mxu1 %v2189_v34  ;;  %v2634_v34 = vld [vmem:[%s2830_s2] ss:$0 sm:$0xff] }
  0x33   : > { %1843 = vmatprep.mubr.msk.bf16.mxu1 %vm818_vm0, %v2195_v35 }
  0x37   : > { %916 = vmatmul.mubr.bf16.gmra.mrb[8].mxu0 %v2197_v36 }
  0x38   : > { %923 = vmatprep.mubr.bf16.mxu0 %v2199_v37 }
  0x3a   : > { %1069 = vmatmul.mubr.bf16.gmra.mrb[4].mxu1 %v2198_v38 }
  0x3b   : > { %1844 = vmatprep.mubr.msk.bf16.mxu1 %vm818_vm0, %v2201_v39 }
  0x3f   : > { %924 = vmatmul.mubr.bf16.gmra.mrb[12].mxu0 %v2203_v40 }
  0x40   : > { %931 = vmatprep.mubr.bf16.mxu0 %v2205_v41 }
  0x42   : > { %1077 = vmatmul.mubr.bf16.gmra.mrb[8].mxu1 %v2204_v42 }
  0x43   : > { %1845 = vmatprep.mubr.msk.bf16.mxu1 %vm818_vm0, %v2207_v43 }
  0x47   : > { %932 = vmatmul.mubr.bf16.gmra.mrb[16].mxu0 %v2209_v44 }
  0x48   : > { %939 = vmatprep.mubr.bf16.mxu0 %v2211_v45 }
  0x4a   : > { %1085 = vmatmul.mubr.bf16.gmra.mrb[12].mxu1 %v2210_v46 }
  0x4b   : > { %1846 = vmatprep.mubr.msk.bf16.mxu1 %vm818_vm0, %v2213_v47 }
  0x4f   : > { %940 = vmatmul.mubr.bf16.gmra.mrb[20].mxu0 %v2215_v48 }
  0x50   : > { %947 = vmatprep.mubr.bf16.mxu0 %v2217_v49 }
  0x52   : > { %1093 = vmatmul.mubr.bf16.gmra.mrb[16].mxu1 %v2216_v50 }
  0x53   : > { %1847 = vmatprep.mubr.msk.bf16.mxu1 %vm818_vm0, %v2219_v51 }
  0x57   : > { %948 = vmatmul.mubr.bf16.gmra.mrb[24].mxu0 %v2221_v52 }
  0x58   : > { %955 = vmatprep.mubr.bf16.mxu0 %v2223_v53 }
  0x5a   : > { %1101 = vmatmul.mubr.bf16.gmra.mrb[20].mxu1 %v2222_v54 }
  0x5b   : > { %1848 = vmatprep.mubr.msk.bf16.mxu1 %vm818_vm0, %v2225_v55 }
  0x5f   : > { %956 = vmatmul.mubr.bf16.gmra.mrb[28].mxu0 %v2227_v56 }
  0x60   : > { %963 = vmatprep.mubr.bf16.mxu0 %v2229_v57 }
  0x62   : > { %1109 = vmatmul.mubr.bf16.gmra.mrb[24].mxu1 %v2228_v58 }
  0x63   : > { %1849 = vmatprep.mubr.msk.bf16.mxu1 %vm818_vm0, %v2231_v59 }
  0x67   : > { %964 = vmatmul.mubr.bf16.gmra.mrb[32].mxu0 %v2233_v60 }
  0x68   : > { %971 = vmatprep.mubr.bf16.mxu0 %v2235_v61 }
  0x6a   : > { %1117 = vmatmul.mubr.bf16.gmra.mrb[28].mxu1 %v2234_v62 }
  0x6b   : > { %1850 = vmatprep.mubr.msk.bf16.mxu1 %vm818_vm0, %v2237_v63 }
  0x6f   : > { %972 = vmatmul.mubr.bf16.gmra.mrb[36].mxu0 %v2239_v0 }
  0x70   : > { %979 = vmatprep.mubr.bf16.mxu0 %v2241_v1 }
  0x72   : > { %1125 = vmatmul.mubr.bf16.gmra.mrb[32].mxu1 %v2240_v2 }
  0x73   : > { %1851 = vmatprep.mubr.msk.bf16.mxu1 %vm818_vm0, %v2243_v3 }
  0x77   : > { %980 = vmatmul.mubr.bf16.gmra.mrb[40].mxu0 %v2245_v4 }
  0x78   : > { %987 = vmatprep.mubr.bf16.mxu0 %v2247_v5 }
  0x7a   : > { %1133 = vmatmul.mubr.bf16.gmra.mrb[36].mxu1 %v2246_v6 }
  0x7b   : > { %1852 = vmatprep.mubr.msk.bf16.mxu1 %vm818_vm0, %v2249_v7 }
  0x7f   : > { %988 = vmatmul.mubr.bf16.gmra.mrb[44].mxu0 %v2251_v8 }
  0x80   : > { %995 = vmatprep.mubr.bf16.mxu0 %v2253_v9 }
  0x82   : > { %1141 = vmatmul.mubr.bf16.gmra.mrb[40].mxu1 %v2252_v10 }
  0x83   : > { %1853 = vmatprep.mubr.msk.bf16.mxu1 %vm818_vm0, %v2255_v11 }
  0x87   : > { %996 = vmatmul.mubr.bf16.gmra.mrb[48].mxu0 %v2257_v12 }
  0x88   : > { %1003 = vmatprep.mubr.bf16.mxu0 %v2259_v13 }
  0x8a   : > { %1149 = vmatmul.mubr.bf16.gmra.mrb[44].mxu1 %v2258_v14 }
  0x8b   : > { %1854 = vmatprep.mubr.msk.bf16.mxu1 %vm818_vm0, %v2261_v15 }
  0x8f   : > { %1004 = vmatmul.mubr.bf16.gmra.mrb[52].mxu0 %v2263_v16 }
  0x90   : > { %1011 = vmatprep.mubr.bf16.mxu0 %v2265_v17 }
  0x92   : > { %1157 = vmatmul.mubr.bf16.gmra.mrb[48].mxu1 %v2264_v18 }
  0x93   : > { %1855 = vmatprep.mubr.msk.bf16.mxu1 %vm818_vm0, %v2267_v19 }
  0x97   : > { %1012 = vmatmul.mubr.bf16.gmra.mrb[56].mxu0 %v2269_v20 }
  0x98   : > { %1019 = vmatprep.mubr.bf16.mxu0 %v2271_v21 }
  0x9a   : > { %1165 = vmatmul.mubr.bf16.gmra.mrb[52].mxu1 %v2270_v22 }
  0x9b   : > { %1856 = vmatprep.mubr.msk.bf16.mxu1 %vm818_vm0, %v2273_v23 }
  0x9f   : > { %1020 = vmatmul.mubr.bf16.gmra.mrb[60].mxu0 %v2275_v24  ;;  %v1958_v24 = vld [vmem:[%s2648_s6] sm:$0xff]  }
  0xa2   : > { %1173 = vmatmul.mubr.bf16.gmra.mrb[56].mxu1 %v2276_v25 }
  0xa3   : > { %1857 = vmatprep.mubr.msk.bf16.mxu1 %vm818_vm0, %v2277_v26 }
  0xaa   : > { %1181 = vmatmul.mubr.bf16.gmra.mrb[60].mxu1 %v2279_v27 }
  0xfa   : > { %v2052_v28 = vpop.f32.mrb[0].mxu0 }
  0xfb   : > { %v2053_v29 = vpop.f32.mrb[1].mxu0 }
  0xfc   : > { %v2054_v30 = vadd.f32 %v2053_v29, %v2052_v28  ;;  %v2055_v31 = vpop.f32.mrb[2].mxu0 }
  0xfd   : > { %v2056_v32 = vpop.f32.mrb[3].mxu0 }
  0xfe   : > { %v2057_v33 = vadd.f32 %v2056_v32, %v2055_v31  ;;  %v902_v35 = vadd.f32 %v2054_v30, %v2634_v34 }
 0x100   : > { %v905_v43 = vadd.f32 %v2057_v33, %v2634_v34  ;;  %v1959_v33 = vunpack.c.l.bf16 %v1958_v24 }
 0x102   : > { %v2058_v36 = vpop.f32.mrb[4].mxu0 }
 0x103   : > { %v2059_v37 = vpop.f32.mrb[5].mxu0 }
 0x104   : > { %v2060_v39 = vadd.f32 %v2059_v37, %v2058_v36  ;;  %v2061_v40 = vpop.f32.mrb[6].mxu0 }
 0x105   : > { %v1062_v38 = vpop.f32.mrb[0].mxu1  ;;  %v2062_v44 = vpop.f32.mrb[7].mxu0 }
 0x106   : > { %v1063_v41 = vadd.f32 %v1062_v38, %v902_v35  ;;  %v1064_v42 = vpop.f32.mrb[1].mxu1  ;;  %v2063_v46 = vadd.f32 %v2062_v44, %v2061_v40  ;;  %v910_v51 = vadd.f32 %v2060_v39, %v2634_v34 }
 0x107   : > { %v1065_v45 = vpop.f32.mrb[2].mxu1  ;;  %v1960_v42 = vunpack.c.h.bf16 %v1958_v24 }
 0x108   : > { %v1858_v47 = vmul.f32 -1.442695, %v1063_v41  ;;  %v1066_v48 = vadd.f32 %v1065_v45, %v905_v43  ;;  %v1067_v49 = vpop.f32.mrb[3].mxu1  ;;  %v913_v59 = vadd.f32 %v2063_v46, %v2634_v34 }
 0x10a   : > { %2280 = vpow2.f32 %v1858_v47  ;;  %v1859_v50 = vmul.f32 -1.442695, %v1066_v48  ;;  %v2064_v52 = vpop.f32.mrb[8].mxu0  ;;  %v2654_v47 = vld [vmem:[%s2648_s6 + $0x8] sm:$0xff]  }
 0x10b   : > { %v2065_v53 = vpop.f32.mrb[9].mxu0 }
 0x10c   : > { %2282 = vpow2.f32 %v1859_v50  ;;  %v2066_v55 = vadd.f32 %v2065_v53, %v2064_v52  ;;  %v2067_v56 = vpop.f32.mrb[10].mxu0  ;;  %v2658_v52 = vld [vmem:[%s2648_s6 + $0x10] sm:$0xff]   ;;  %v2661_v53 = vld [vmem:[%s2648_s6 + $0x18] sm:$0xff]  }
 0x10d   : > { %v1070_v54 = vpop.f32.mrb[4].mxu1  ;;  %v2068_v60 = vpop.f32.mrb[11].mxu0 }
 0x10e   : > { %v1071_v57 = vadd.f32 %v1070_v54, %v910_v51  ;;  %v1072_v58 = vpop.f32.mrb[5].mxu1  ;;  %v2069_v62 = vadd.f32 %v2068_v60, %v2067_v56  ;;  %v918_v3 = vadd.f32 %v2066_v55, %v2634_v34  ;;  %v2664_v54 = vld [vmem:[%s2648_s6 + $0x20] sm:$0xff]   ;;  %v2667_v55 = vld [vmem:[%s2648_s6 + $0x28] sm:$0xff]   ;;  %v2670_v56 = vld [vmem:[%s2648_s6 + $0x30] sm:$0xff]  }
 0x10f   : > { %v1073_v61 = vpop.f32.mrb[6].mxu1  ;;  %v2676_v58 = vld [vmem:[%s2648_s6 + $0x40] sm:$0xff]   ;;  %v2682_v60 = vld [vmem:[%s2648_s6 + $0x50] sm:$0xff]  }
 0x110   : > { %v1860_v63 = vmul.f32 -1.442695, %v1071_v57  ;;  %v1074_v0 = vadd.f32 %v1073_v61, %v913_v59  ;;  %v1075_v1 = vpop.f32.mrb[7].mxu1  ;;  %v921_v14 = vadd.f32 %v2069_v62, %v2634_v34  ;;  %v2673_v57 = vld [vmem:[%s2648_s6 + $0x38] sm:$0xff]   ;;  %v2679_v59 = vld [vmem:[%s2648_s6 + $0x48] sm:$0xff]  }
 0x111   : > { %v2691_v1 = vld [vmem:[%s2648_s6 + $0x68] sm:$0xff]  }
 0x112   : > { %2284 = vpow2.f32 %v1860_v63  ;;  %v1861_v2 = vmul.f32 -1.442695, %v1074_v0  ;;  %v2070_v4 = vpop.f32.mrb[12].mxu0  ;;  %v2685_v63 = vld [vmem:[%s2648_s6 + $0x58] sm:$0xff]   ;;  %v2688_v0 = vld [vmem:[%s2648_s6 + $0x60] sm:$0xff]  }
 0x113   : > { %v2071_v6 = vpop.f32.mrb[13].mxu0 }
 0x114   : > { %v2281_v5 = vpop.eup %2280  ;;  %2286 = vpow2.f32 %v1861_v2  ;;  %v2072_v9 = vadd.f32 %v2071_v6, %v2070_v4  ;;  %v2073_v10 = vpop.f32.mrb[14].mxu0  ;;  %v2704_v6 = vld [vmem:[%s2648_s6 + $0x78] sm:$0xff]  }
 0x115   : > { %v1349_v7 = vadd.f32 1.0, %v2281_v5  ;;  %v1078_v8 = vpop.f32.mrb[8].mxu1  ;;  %v2074_v15 = vpop.f32.mrb[15].mxu0  ;;  %v2701_v5 = vld [vmem:[%s2648_s6 + $0x70] sm:$0xff]  }
 0x116   : > { %v2283_v11 = vpop.eup %2282  ;;  %v1079_v12 = vadd.f32 %v1078_v8, %v918_v3  ;;  %v1080_v13 = vpop.f32.mrb[9].mxu1  ;;  %v2075_v18 = vadd.f32 %v2074_v15, %v2073_v10  ;;  %v926_v23 = vadd.f32 %v2072_v9, %v2634_v34 }
 0x117   : > { %2288 = vrcp.f32 %v1349_v7  ;;  %v1350_v16 = vadd.f32 1.0, %v2283_v11  ;;  %v1081_v17 = vpop.f32.mrb[10].mxu1  ;;  %v1963_v7 = vunpack.c.l.bf16 %v2654_v47 }
 0x118   : > { %v1862_v19 = vmul.f32 -1.442695, %v1079_v12  ;;  %v1082_v20 = vadd.f32 %v1081_v17, %v921_v14  ;;  %v1083_v21 = vpop.f32.mrb[11].mxu1  ;;  %v929_v37 = vadd.f32 %v2075_v18, %v2634_v34 }
 0x119   : > { %2290 = vrcp.f32 %v1350_v16 }
 0x11a   : > { %2292 = vpow2.f32 %v1862_v19  ;;  %v1863_v22 = vmul.f32 -1.442695, %v1082_v20  ;;  %v2076_v25 = vpop.f32.mrb[16].mxu0 }
 0x11b   : > { %v2077_v27 = vpop.f32.mrb[17].mxu0 }
 0x11c   : > { %v2285_v26 = vpop.eup %2284  ;;  %2294 = vpow2.f32 %v1863_v22  ;;  %v2078_v30 = vadd.f32 %v2077_v27, %v2076_v25  ;;  %v2079_v31 = vpop.f32.mrb[18].mxu0 }
 0x11d   : > { %v1351_v28 = vadd.f32 1.0, %v2285_v26  ;;  %v1086_v29 = vpop.f32.mrb[12].mxu1  ;;  %v2080_v38 = vpop.f32.mrb[19].mxu0 }
 0x11e   : > { %v2287_v32 = vpop.eup %2286  ;;  %v1087_v35 = vadd.f32 %v1086_v29, %v926_v23  ;;  %v1088_v36 = vpop.f32.mrb[13].mxu1  ;;  %v2081_v41 = vadd.f32 %v2080_v38, %v2079_v31  ;;  %v934_v50 = vadd.f32 %v2078_v30, %v2634_v34  ;;  %v1964_v23 = vunpack.c.h.bf16 %v2654_v47 }
 0x11f   : > { %2296 = vrcp.f32 %v1351_v28  ;;  %v1352_v39 = vadd.f32 1.0, %v2287_v32  ;;  %v1089_v40 = vpop.f32.mrb[14].mxu1  ;;  %v1967_v38 = vunpack.c.l.bf16 %v2658_v52 }
 0x120   : > { %v1864_v43 = vmul.f32 -1.442695, %v1087_v35  ;;  %v1090_v44 = vadd.f32 %v1089_v40, %v929_v37  ;;  %v1091_v45 = vpop.f32.mrb[15].mxu1  ;;  %v937_v17 = vadd.f32 %v2081_v41, %v2634_v34 }
 0x121   : > { %v2289_v46 = vpop.eup %2288  ;;  %2298 = vrcp.f32 %v1352_v39 }
 0x122   : > { %v1445_v48 = vmul.f32 %v2289_v46, %v1959_v33  ;;  %2300 = vpow2.f32 %v1864_v43  ;;  %v1865_v49 = vmul.f32 -1.442695, %v1090_v44  ;;  %v2082_v61 = vpop.f32.mrb[20].mxu0 }
 0x123   : > { %v2291_v51 = vpop.eup %2290  ;;  %v2083_v4 = vpop.f32.mrb[21].mxu0 }
 0x124   : > { %v2293_v62 = vpop.eup %2292  ;;  %v1477_v2 = vadd.f32 %v1959_v33, %v1445_v48  ;;  %v1446_v3 = vmul.f32 %v2291_v51, %v1960_v42  ;;  %2302 = vpow2.f32 %v1865_v49  ;;  %v2084_v10 = vadd.f32 %v2083_v4, %v2082_v61  ;;  %v2085_v11 = vpop.f32.mrb[22].mxu0 }
 0x125   : > { %v1353_v8 = vadd.f32 1.0, %v2293_v62  ;;  %v1094_v9 = vpop.f32.mrb[16].mxu1  ;;  %v2086_v18 = vpop.f32.mrb[23].mxu0 }
 0x126   : > { %v2295_v12 = vpop.eup %2294  ;;  %v1925_v13 = vpack.c.bf16 %v1477_v2, %v1477_v2  ;;  %v1478_v14 = vadd.f32 %v1960_v42, %v1446_v3  ;;  %v1095_v15 = vadd.f32 %v1094_v9, %v934_v50  ;;  %v1096_v16 = vpop.f32.mrb[17].mxu1  ;;  %v2087_v21 = vadd.f32 %v2086_v18, %v2085_v11 }
 0x127   : > { %2304 = vrcp.f32 %v1353_v8  ;;  %v1354_v19 = vadd.f32 1.0, %v2295_v12  ;;  %v1097_v20 = vpop.f32.mrb[18].mxu1  ;;  %v942_v30 = vadd.f32 %v2084_v10, %v2634_v34  ;;  %v1968_v2 = vunpack.c.h.bf16 %v2658_v52 }
 0x128   : > { %1638 = vst.msk [vmem:[%s2698_s9] sm:$0xf] %vm1637_vm1, %v1925_v13  ;;  %v1926_v22 = vpack.c.bf16 %v1478_v14, %v1478_v14  ;;  %v1866_v24 = vmul.f32 -1.442695, %v1095_v15  ;;  %v1098_v25 = vadd.f32 %v1097_v20, %v937_v17  ;;  %v1099_v26 = vpop.f32.mrb[19].mxu1  ;;  %v945_v48 = vadd.f32 %v2087_v21, %v2634_v34 }
 0x129   : > { %v2297_v27 = vpop.eup %2296  ;;  %2306 = vrcp.f32 %v1354_v19  ;;  %v1971_v52 = vunpack.c.l.bf16 %v2661_v53 }
 0x12a   : > { %1639 = vst.msk [vmem:[%s2698_s9 + $0x4] sm:$0xf] %vm1637_vm1, %v1926_v22  ;;  %v1447_v28 = vmul.f32 %v2297_v27, %v1963_v7  ;;  %2308 = vpow2.f32 %v1866_v24  ;;  %v1867_v29 = vmul.f32 -1.442695, %v1098_v25  ;;  %v2088_v32 = vpop.f32.mrb[24].mxu0 }
 0x12b   : > { %v2299_v31 = vpop.eup %2298  ;;  %v2089_v37 = vpop.f32.mrb[25].mxu0 }
 0x12c   : > { %v2301_v33 = vpop.eup %2300  ;;  %v1479_v35 = vadd.f32 %v1963_v7, %v1447_v28  ;;  %v1448_v36 = vmul.f32 %v2299_v31, %v1964_v23  ;;  %2310 = vpow2.f32 %v1867_v29  ;;  %v2090_v41 = vadd.f32 %v2089_v37, %v2088_v32  ;;  %v2091_v42 = vpop.f32.mrb[26].mxu0 }
 0x12d   : > { %v1355_v39 = vadd.f32 1.0, %v2301_v33  ;;  %v1102_v40 = vpop.f32.mrb[20].mxu1  ;;  %v2092_v49 = vpop.f32.mrb[27].mxu0  ;;  %v1972_v33 = vunpack.c.h.bf16 %v2661_v53  ;;  %v1975_v53 = vunpack.c.l.bf16 %v2664_v54 }
 0x12e   : > { %v2303_v43 = vpop.eup %2302  ;;  %v1927_v44 = vpack.c.bf16 %v1479_v35, %v1479_v35  ;;  %v1480_v45 = vadd.f32 %v1964_v23, %v1448_v36  ;;  %v1103_v46 = vadd.f32 %v1102_v40, %v942_v30  ;;  %v1104_v47 = vpop.f32.mrb[21].mxu1  ;;  %v2093_v61 = vadd.f32 %v2092_v49, %v2091_v42 }
 0x12f   : > { %2312 = vrcp.f32 %v1355_v39  ;;  %v1356_v50 = vadd.f32 1.0, %v2303_v43  ;;  %v1105_v51 = vpop.f32.mrb[22].mxu1  ;;  %v950_v11 = vadd.f32 %v2090_v41, %v2634_v34 }
 0x130   : > { %1640 = vst.msk [vmem:[%s2698_s9 + $0x8] sm:$0xf] %vm1637_vm1, %v1927_v44  ;;  %v1928_v62 = vpack.c.bf16 %v1480_v45, %v1480_v45  ;;  %v1868_v3 = vmul.f32 -1.442695, %v1103_v46  ;;  %v1106_v4 = vadd.f32 %v1105_v51, %v945_v48  ;;  %v1107_v7 = vpop.f32.mrb[23].mxu1  ;;  %v953_v27 = vadd.f32 %v2093_v61, %v2634_v34 }
 0x131   : > { %v2305_v8 = vpop.eup %2304  ;;  %2314 = vrcp.f32 %v1356_v50 }
 0x132   : > { %1641 = vst.msk [vmem:[%s2698_s9 + $0xc] sm:$0xf] %vm1637_vm1, %v1928_v62  ;;  %v1449_v9 = vmul.f32 %v2305_v8, %v1967_v38  ;;  %2316 = vpow2.f32 %v1868_v3  ;;  %v1869_v10 = vmul.f32 -1.442695, %v1106_v4  ;;  %v2094_v13 = vpop.f32.mrb[28].mxu0 }
 0x133   : > { %v2307_v12 = vpop.eup %2306  ;;  %v2095_v17 = vpop.f32.mrb[29].mxu0 }
 0x134   : > { %v2309_v14 = vpop.eup %2308  ;;  %v1481_v15 = vadd.f32 %v1967_v38, %v1449_v9  ;;  %v1450_v16 = vmul.f32 %v2307_v12, %v1968_v2  ;;  %2318 = vpow2.f32 %v1869_v10  ;;  %v2096_v20 = vadd.f32 %v2095_v17, %v2094_v13  ;;  %v2097_v21 = vpop.f32.mrb[30].mxu0 }
 0x135   : > { %v1357_v18 = vadd.f32 1.0, %v2309_v14  ;;  %v1110_v19 = vpop.f32.mrb[24].mxu1  ;;  %v2098_v28 = vpop.f32.mrb[31].mxu0  ;;  %v1976_v13 = vunpack.c.h.bf16 %v2664_v54  ;;  %v1979_v54 = vunpack.c.l.bf16 %v2667_v55 }
 0x136   : > { %v2311_v22 = vpop.eup %2310  ;;  %v1929_v23 = vpack.c.bf16 %v1481_v15, %v1481_v15  ;;  %v1482_v24 = vadd.f32 %v1968_v2, %v1450_v16  ;;  %v1111_v25 = vadd.f32 %v1110_v19, %v950_v11  ;;  %v1112_v26 = vpop.f32.mrb[25].mxu1  ;;  %v2099_v31 = vadd.f32 %v2098_v28, %v2097_v21 }
 0x137   : > { %2320 = vrcp.f32 %v1357_v18  ;;  %v1358_v29 = vadd.f32 1.0, %v2311_v22  ;;  %v1113_v30 = vpop.f32.mrb[26].mxu1  ;;  %v958_v41 = vadd.f32 %v2096_v20, %v2634_v34 }
 0x138   : > { %1642 = vst.msk [vmem:[%s2698_s9 + $0x10] sm:$0xf] %vm1637_vm1, %v1929_v23  ;;  %v1930_v32 = vpack.c.bf16 %v1482_v24, %v1482_v24  ;;  %v1870_v35 = vmul.f32 -1.442695, %v1111_v25  ;;  %v1114_v36 = vadd.f32 %v1113_v30, %v953_v27  ;;  %v1115_v37 = vpop.f32.mrb[27].mxu1  ;;  %v961_v7 = vadd.f32 %v2099_v31, %v2634_v34 }
 0x139   : > { %v2313_v38 = vpop.eup %2312  ;;  %2322 = vrcp.f32 %v1358_v29 }
 0x13a   : > { %1643 = vst.msk [vmem:[%s2698_s9 + $0x14] sm:$0xf] %vm1637_vm1, %v1930_v32  ;;  %v1451_v39 = vmul.f32 %v2313_v38, %v1971_v52  ;;  %2324 = vpow2.f32 %v1870_v35  ;;  %v1871_v40 = vmul.f32 -1.442695, %v1114_v36  ;;  %v2100_v43 = vpop.f32.mrb[32].mxu0 }
 0x13b   : > { %v2315_v42 = vpop.eup %2314  ;;  %v2101_v47 = vpop.f32.mrb[33].mxu0 }
 0x13c   : > { %v2317_v44 = vpop.eup %2316  ;;  %v1483_v45 = vadd.f32 %v1971_v52, %v1451_v39  ;;  %v1452_v46 = vmul.f32 %v2315_v42, %v1972_v33  ;;  %2326 = vpow2.f32 %v1871_v40  ;;  %v2102_v50 = vadd.f32 %v2101_v47, %v2100_v43  ;;  %v2103_v51 = vpop.f32.mrb[34].mxu0 }
 0x13d   : > { %v1359_v48 = vadd.f32 1.0, %v2317_v44  ;;  %v1118_v49 = vpop.f32.mrb[28].mxu1  ;;  %v2104_v8 = vpop.f32.mrb[35].mxu0  ;;  %v1980_v42 = vunpack.c.h.bf16 %v2667_v55  ;;  %v1983_v55 = vunpack.c.l.bf16 %v2670_v56 }
 0x13e   : > { %v2319_v61 = vpop.eup %2318  ;;  %v1931_v62 = vpack.c.bf16 %v1483_v45, %v1483_v45  ;;  %v1484_v2 = vadd.f32 %v1972_v33, %v1452_v46  ;;  %v1119_v3 = vadd.f32 %v1118_v49, %v958_v41  ;;  %v1120_v4 = vpop.f32.mrb[29].mxu1  ;;  %v2105_v11 = vadd.f32 %v2104_v8, %v2103_v51 }
 0x13f   : > { %2328 = vrcp.f32 %v1359_v48  ;;  %v1360_v9 = vadd.f32 1.0, %v2319_v61  ;;  %v1121_v10 = vpop.f32.mrb[30].mxu1  ;;  %v966_v19 = vadd.f32 %v2102_v50, %v2634_v34 }
 0x140   : > { %1644 = vst.msk [vmem:[%s2698_s9 + $0x18] sm:$0xf] %vm1637_vm1, %v1931_v62  ;;  %v1932_v12 = vpack.c.bf16 %v1484_v2, %v1484_v2  ;;  %v1872_v14 = vmul.f32 -1.442695, %v1119_v3  ;;  %v1122_v15 = vadd.f32 %v1121_v10, %v961_v7  ;;  %v1123_v16 = vpop.f32.mrb[31].mxu1  ;;  %v969_v36 = vadd.f32 %v2105_v11, %v2634_v34 }
 0x141   : > { %v2321_v17 = vpop.eup %2320  ;;  %2330 = vrcp.f32 %v1360_v9 }
 0x142   : > { %1645 = vst.msk [vmem:[%s2698_s9 + $0x1c] sm:$0xf] %vm1637_vm1, %v1932_v12  ;;  %v1453_v52 = vmul.f32 %v2321_v17, %v1975_v53  ;;  %2332 = vpow2.f32 %v1872_v14  ;;  %v1873_v18 = vmul.f32 -1.442695, %v1122_v15  ;;  %v2106_v21 = vpop.f32.mrb[36].mxu0 }
 0x143   : > { %v2323_v20 = vpop.eup %2322  ;;  %v2107_v25 = vpop.f32.mrb[37].mxu0 }
 0x144   : > { %v2325_v22 = vpop.eup %2324  ;;  %v1485_v23 = vadd.f32 %v1975_v53, %v1453_v52  ;;  %v1454_v24 = vmul.f32 %v2323_v20, %v1976_v13  ;;  %2334 = vpow2.f32 %v1873_v18  ;;  %v2108_v28 = vadd.f32 %v2107_v25, %v2106_v21  ;;  %v2109_v29 = vpop.f32.mrb[38].mxu0 }
 0x145   : > { %v1361_v26 = vadd.f32 1.0, %v2325_v22  ;;  %v1126_v27 = vpop.f32.mrb[32].mxu1  ;;  %v2110_v37 = vpop.f32.mrb[39].mxu0 }
 0x146   : > { %v2327_v30 = vpop.eup %2326  ;;  %v1933_v31 = vpack.c.bf16 %v1485_v23, %v1485_v23  ;;  %v1486_v32 = vadd.f32 %v1976_v13, %v1454_v24  ;;  %v1127_v33 = vadd.f32 %v1126_v27, %v966_v19  ;;  %v1128_v35 = vpop.f32.mrb[33].mxu1  ;;  %v2111_v40 = vadd.f32 %v2110_v37, %v2109_v29 }
 0x147   : > { %2336 = vrcp.f32 %v1361_v26  ;;  %v1362_v38 = vadd.f32 1.0, %v2327_v30  ;;  %v1129_v39 = vpop.f32.mrb[34].mxu1  ;;  %v974_v48 = vadd.f32 %v2108_v28, %v2634_v34  ;;  %v1984_v19 = vunpack.c.h.bf16 %v2670_v56 }
 0x148   : > { %1646 = vst.msk [vmem:[%s2698_s9 + $0x20] sm:$0xf] %vm1637_vm1, %v1933_v31  ;;  %v1934_v41 = vpack.c.bf16 %v1486_v32, %v1486_v32  ;;  %v1874_v43 = vmul.f32 -1.442695, %v1127_v33  ;;  %v1130_v44 = vadd.f32 %v1129_v39, %v969_v36  ;;  %v1131_v45 = vpop.f32.mrb[35].mxu1  ;;  %v977_v14 = vadd.f32 %v2111_v40, %v2634_v34 }
 0x149   : > { %v2329_v46 = vpop.eup %2328  ;;  %2338 = vrcp.f32 %v1362_v38  ;;  %v1987_v56 = vunpack.c.l.bf16 %v2673_v57 }
 0x14a   : > { %1647 = vst.msk [vmem:[%s2698_s9 + $0x24] sm:$0xf] %vm1637_vm1, %v1934_v41  ;;  %v1455_v47 = vmul.f32 %v2329_v46, %v1979_v54  ;;  %2340 = vpow2.f32 %v1874_v43  ;;  %v1875_v53 = vmul.f32 -1.442695, %v1130_v44  ;;  %v2112_v50 = vpop.f32.mrb[40].mxu0 }
 0x14b   : > { %v2331_v49 = vpop.eup %2330  ;;  %v2113_v2 = vpop.f32.mrb[41].mxu0 }
 0x14c   : > { %v2333_v51 = vpop.eup %2332  ;;  %v1487_v61 = vadd.f32 %v1979_v54, %v1455_v47  ;;  %v1456_v62 = vmul.f32 %v2331_v49, %v1980_v42  ;;  %2342 = vpow2.f32 %v1875_v53  ;;  %v2114_v7 = vadd.f32 %v2113_v2, %v2112_v50  ;;  %v2115_v8 = vpop.f32.mrb[42].mxu0 }
 0x14d   : > { %v1363_v3 = vadd.f32 1.0, %v2333_v51  ;;  %v1134_v4 = vpop.f32.mrb[36].mxu1  ;;  %v2116_v15 = vpop.f32.mrb[43].mxu0  ;;  %v1988_v53 = vunpack.c.h.bf16 %v2673_v57  ;;  %v1991_v57 = vunpack.c.l.bf16 %v2676_v58 }
 0x14e   : > { %v2335_v9 = vpop.eup %2334  ;;  %v1935_v10 = vpack.c.bf16 %v1487_v61, %v1487_v61  ;;  %v1488_v11 = vadd.f32 %v1980_v42, %v1456_v62  ;;  %v1135_v12 = vadd.f32 %v1134_v4, %v974_v48  ;;  %v1136_v13 = vpop.f32.mrb[37].mxu1  ;;  %v2117_v52 = vadd.f32 %v2116_v15, %v2115_v8 }
 0x14f   : > { %2344 = vrcp.f32 %v1363_v3  ;;  %v1364_v16 = vadd.f32 1.0, %v2335_v9  ;;  %v1137_v17 = vpop.f32.mrb[38].mxu1  ;;  %v982_v54 = vadd.f32 %v2114_v7, %v2634_v34 }
 0x150   : > { %1648 = vst.msk [vmem:[%s2698_s9 + $0x28] sm:$0xf] %vm1637_vm1, %v1935_v10  ;;  %v1936_v18 = vpack.c.bf16 %v1488_v11, %v1488_v11  ;;  %v1876_v20 = vmul.f32 -1.442695, %v1135_v12  ;;  %v1138_v21 = vadd.f32 %v1137_v17, %v977_v14  ;;  %v1139_v22 = vpop.f32.mrb[39].mxu1  ;;  %v985_v42 = vadd.f32 %v2117_v52, %v2634_v34 }
 0x151   : > { %v2337_v23 = vpop.eup %2336  ;;  %2346 = vrcp.f32 %v1364_v16 }
 0x152   : > { %1649 = vst.msk [vmem:[%s2698_s9 + $0x2c] sm:$0xf] %vm1637_vm1, %v1936_v18  ;;  %v1457_v24 = vmul.f32 %v2337_v23, %v1983_v55  ;;  %2348 = vpow2.f32 %v1876_v20  ;;  %v1877_v25 = vmul.f32 -1.442695, %v1138_v21  ;;  %v2118_v27 = vpop.f32.mrb[44].mxu0 }
 0x153   : > { %v2339_v26 = vpop.eup %2338  ;;  %v2119_v31 = vpop.f32.mrb[45].mxu0 }
 0x154   : > { %v2341_v28 = vpop.eup %2340  ;;  %v1489_v29 = vadd.f32 %v1983_v55, %v1457_v24  ;;  %v1458_v30 = vmul.f32 %v2339_v26, %v1984_v19  ;;  %2350 = vpow2.f32 %v1877_v25  ;;  %v2120_v35 = vadd.f32 %v2119_v31, %v2118_v27  ;;  %v2121_v36 = vpop.f32.mrb[46].mxu0 }
 0x155   : > { %v1365_v32 = vadd.f32 1.0, %v2341_v28  ;;  %v1142_v33 = vpop.f32.mrb[40].mxu1  ;;  %v2122_v43 = vpop.f32.mrb[47].mxu0  ;;  %v1992_v24 = vunpack.c.h.bf16 %v2676_v58  ;;  %v1995_v58 = vunpack.c.l.bf16 %v2679_v59 }
 0x156   : > { %v2343_v37 = vpop.eup %2342  ;;  %v1937_v38 = vpack.c.bf16 %v1489_v29, %v1489_v29  ;;  %v1490_v39 = vadd.f32 %v1984_v19, %v1458_v30  ;;  %v1143_v40 = vadd.f32 %v1142_v33, %v982_v54  ;;  %v1144_v41 = vpop.f32.mrb[41].mxu1  ;;  %v2123_v46 = vadd.f32 %v2122_v43, %v2121_v36 }
 0x157   : > { %2352 = vrcp.f32 %v1365_v32  ;;  %v1366_v44 = vadd.f32 1.0, %v2343_v37  ;;  %v1145_v45 = vpop.f32.mrb[42].mxu1  ;;  %v990_v2 = vadd.f32 %v2120_v35, %v2634_v34 }
 0x158   : > { %1650 = vst.msk [vmem:[%s2698_s9 + $0x30] sm:$0xf] %vm1637_vm1, %v1937_v38  ;;  %v1938_v47 = vpack.c.bf16 %v1490_v39, %v1490_v39  ;;  %v1878_v48 = vmul.f32 -1.442695, %v1143_v40  ;;  %v1146_v49 = vadd.f32 %v1145_v45, %v985_v42  ;;  %v1147_v50 = vpop.f32.mrb[43].mxu1  ;;  %v993_v18 = vadd.f32 %v2123_v46, %v2634_v34 }
 0x159   : > { %v2345_v51 = vpop.eup %2344  ;;  %2354 = vrcp.f32 %v1366_v44 }
 0x15a   : > { %1651 = vst.msk [vmem:[%s2698_s9 + $0x34] sm:$0xf] %vm1637_vm1, %v1938_v47  ;;  %v1459_v61 = vmul.f32 %v2345_v51, %v1987_v56  ;;  %2356 = vpow2.f32 %v1878_v48  ;;  %v1879_v62 = vmul.f32 -1.442695, %v1146_v49  ;;  %v2124_v3 = vpop.f32.mrb[48].mxu0  ;;  %v1996_v51 = vunpack.c.h.bf16 %v2679_v59 }
 0x15b   : > { %v2347_v55 = vpop.eup %2346  ;;  %v2125_v9 = vpop.f32.mrb[49].mxu0  ;;  %v1999_v59 = vunpack.c.l.bf16 %v2682_v60 }
 0x15c   : > { %v2349_v4 = vpop.eup %2348  ;;  %v1491_v7 = vadd.f32 %v1987_v56, %v1459_v61  ;;  %v1460_v8 = vmul.f32 %v2347_v55, %v1988_v53  ;;  %2358 = vpow2.f32 %v1879_v62  ;;  %v2126_v12 = vadd.f32 %v2125_v9, %v2124_v3  ;;  %v2127_v13 = vpop.f32.mrb[50].mxu0 }
 0x15d   : > { %v1367_v10 = vadd.f32 1.0, %v2349_v4  ;;  %v1150_v11 = vpop.f32.mrb[44].mxu1  ;;  %v2128_v19 = vpop.f32.mrb[51].mxu0 }
 0x15e   : > { %v2351_v14 = vpop.eup %2350  ;;  %v1939_v15 = vpack.c.bf16 %v1491_v7, %v1491_v7  ;;  %v1492_v16 = vadd.f32 %v1988_v53, %v1460_v8  ;;  %v1151_v17 = vadd.f32 %v1150_v11, %v990_v2  ;;  %v1152_v52 = vpop.f32.mrb[45].mxu1  ;;  %v2129_v22 = vadd.f32 %v2128_v19, %v2127_v13 }
 0x15f   : > { %2360 = vrcp.f32 %v1367_v10  ;;  %v1368_v20 = vadd.f32 1.0, %v2351_v14  ;;  %v1153_v21 = vpop.f32.mrb[46].mxu1  ;;  %v998_v30 = vadd.f32 %v2126_v12, %v2634_v34 }
 0x160   : > { %1652 = vst.msk [vmem:[%s2698_s9 + $0x38] sm:$0xf] %vm1637_vm1, %v1939_v15  ;;  %v1940_v23 = vpack.c.bf16 %v1492_v16, %v1492_v16  ;;  %v1880_v25 = vmul.f32 -1.442695, %v1151_v17  ;;  %v1154_v54 = vadd.f32 %v1153_v21, %v993_v18  ;;  %v1155_v26 = vpop.f32.mrb[47].mxu1  ;;  %v1001_v46 = vadd.f32 %v2129_v22, %v2634_v34 }
 0x161   : > { %v2353_v27 = vpop.eup %2352  ;;  %2362 = vrcp.f32 %v1368_v20  ;;  %v2000_v26 = vunpack.c.h.bf16 %v2682_v60  ;;  %v2003_v60 = vunpack.c.l.bf16 %v2685_v63 }
 0x162   : > { %1653 = vst.msk [vmem:[%s2698_s9 + $0x3c] sm:$0xf] %vm1637_vm1, %v1940_v23  ;;  %v1461_v28 = vmul.f32 %v2353_v27, %v1991_v57  ;;  %2364 = vpow2.f32 %v1880_v25  ;;  %v1881_v29 = vmul.f32 -1.442695, %v1154_v54  ;;  %v2130_v56 = vpop.f32.mrb[52].mxu0 }
 0x163   : > { %v2355_v31 = vpop.eup %2354  ;;  %v2131_v36 = vpop.f32.mrb[53].mxu0 }
 0x164   : > { %v2357_v32 = vpop.eup %2356  ;;  %v1493_v33 = vadd.f32 %v1991_v57, %v1461_v28  ;;  %v1462_v35 = vmul.f32 %v2355_v31, %v1992_v24  ;;  %2366 = vpow2.f32 %v1881_v29  ;;  %v2132_v39 = vadd.f32 %v2131_v36, %v2130_v56  ;;  %v2133_v40 = vpop.f32.mrb[54].mxu0 }
 0x165   : > { %v1369_v37 = vadd.f32 1.0, %v2357_v32  ;;  %v1158_v38 = vpop.f32.mrb[48].mxu1  ;;  %v2134_v47 = vpop.f32.mrb[55].mxu0 }
 0x166   : > { %v2359_v41 = vpop.eup %2358  ;;  %v1941_v42 = vpack.c.bf16 %v1493_v33, %v1493_v33  ;;  %v1494_v43 = vadd.f32 %v1992_v24, %v1462_v35  ;;  %v1159_v44 = vadd.f32 %v1158_v38, %v998_v30  ;;  %v1160_v45 = vpop.f32.mrb[49].mxu1  ;;  %v2135_v49 = vadd.f32 %v2134_v47, %v2133_v40 }
 0x167   : > { %2368 = vrcp.f32 %v1369_v37  ;;  %v1370_v53 = vadd.f32 1.0, %v2359_v41  ;;  %v1161_v48 = vpop.f32.mrb[50].mxu1  ;;  %v1006_v7 = vadd.f32 %v2132_v39, %v2634_v34 }
 0x168   : > { %1654 = vst.msk [vmem:[%s2698_s9 + $0x40] sm:$0xf] %vm1637_vm1, %v1941_v42  ;;  %v1942_v50 = vpack.c.bf16 %v1494_v43, %v1494_v43  ;;  %v1882_v61 = vmul.f32 -1.442695, %v1159_v44  ;;  %v1162_v62 = vadd.f32 %v1161_v48, %v1001_v46  ;;  %v1163_v2 = vpop.f32.mrb[51].mxu1  ;;  %v1009_v21 = vadd.f32 %v2135_v49, %v2634_v34 }
 0x169   : > { %v2361_v55 = vpop.eup %2360  ;;  %2370 = vrcp.f32 %v1370_v53 }
 0x16a   : > { %1655 = vst.msk [vmem:[%s2698_s9 + $0x44] sm:$0xf] %vm1637_vm1, %v1942_v50  ;;  %v1463_v3 = vmul.f32 %v2361_v55, %v1995_v58  ;;  %2372 = vpow2.f32 %v1882_v61  ;;  %v1883_v4 = vmul.f32 -1.442695, %v1162_v62  ;;  %v2136_v9 = vpop.f32.mrb[56].mxu0  ;;  %v2004_v62 = vunpack.c.h.bf16 %v2685_v63 }
 0x16b   : > { %v2363_v8 = vpop.eup %2362  ;;  %v2137_v12 = vpop.f32.mrb[57].mxu0  ;;  %v2007_v63 = vunpack.c.l.bf16 %v2688_v0 }
 0x16c   : > { %v2365_v57 = vpop.eup %2364  ;;  %v1495_v10 = vadd.f32 %v1995_v58, %v1463_v3  ;;  %v1464_v11 = vmul.f32 %v2363_v8, %v1996_v51  ;;  %2374 = vpow2.f32 %v1883_v4  ;;  %v2138_v15 = vadd.f32 %v2137_v12, %v2136_v9  ;;  %v2139_v16 = vpop.f32.mrb[58].mxu0 }
 0x16d   : > { %v1371_v13 = vadd.f32 1.0, %v2365_v57  ;;  %v1166_v14 = vpop.f32.mrb[52].mxu1  ;;  %v2140_v22 = vpop.f32.mrb[59].mxu0 }
 0x16e   : > { %v2367_v17 = vpop.eup %2366  ;;  %v1943_v52 = vpack.c.bf16 %v1495_v10, %v1495_v10  ;;  %v1496_v18 = vadd.f32 %v1996_v51, %v1464_v11  ;;  %v1167_v19 = vadd.f32 %v1166_v14, %v1006_v7  ;;  %v1168_v20 = vpop.f32.mrb[53].mxu1  ;;  %v2141_v25 = vadd.f32 %v2140_v22, %v2139_v16 }
 0x16f   : > { %2376 = vrcp.f32 %v1371_v13  ;;  %v1372_v23 = vadd.f32 1.0, %v2367_v17  ;;  %v1169_v24 = vpop.f32.mrb[54].mxu1  ;;  %v1014_v32 = vadd.f32 %v2138_v15, %v2634_v34  ;;  %v2008_v22 = vunpack.c.h.bf16 %v2688_v0 }
 0x170   : > { %1656 = vst.msk [vmem:[%s2698_s9 + $0x48] sm:$0xf] %vm1637_vm1, %v1943_v52  ;;  %v1944_v54 = vpack.c.bf16 %v1496_v18, %v1496_v18  ;;  %v1884_v27 = vmul.f32 -1.442695, %v1167_v19  ;;  %v1170_v28 = vadd.f32 %v1169_v24, %v1009_v21  ;;  %v1171_v29 = vpop.f32.mrb[55].mxu1  ;;  %v1017_v53 = vadd.f32 %v2141_v25, %v2634_v34 }
 0x171   : > { %v2369_v30 = vpop.eup %2368  ;;  %2378 = vrcp.f32 %v1372_v23 }
 0x172   : > { %1657 = vst.msk [vmem:[%s2698_s9 + $0x4c] sm:$0xf] %vm1637_vm1, %v1944_v54  ;;  %v1465_v31 = vmul.f32 %v2369_v30, %v1999_v59  ;;  %2380 = vpow2.f32 %v1884_v27  ;;  %v1885_v56 = vmul.f32 -1.442695, %v1170_v28  ;;  %v2142_v35 = vpop.f32.mrb[60].mxu0 }
 0x173   : > { %v2371_v33 = vpop.eup %2370  ;;  %v2143_v38 = vpop.f32.mrb[61].mxu0 }
 0x174   : > { %v2373_v36 = vpop.eup %2372  ;;  %v1497_v58 = vadd.f32 %v1999_v59, %v1465_v31  ;;  %v1466_v37 = vmul.f32 %v2371_v33, %v2000_v26  ;;  %2382 = vpow2.f32 %v1885_v56  ;;  %v2144_v41 = vadd.f32 %v2143_v38, %v2142_v35  ;;  %v2145_v42 = vpop.f32.mrb[62].mxu0 }
 0x175   : > { %v1373_v39 = vadd.f32 1.0, %v2373_v36  ;;  %v1174_v40 = vpop.f32.mrb[56].mxu1  ;;  %v2146_v48 = vpop.f32.mrb[63].mxu0  ;;  %v2011_v35 = vunpack.c.l.bf16 %v2691_v1 }
 0x176   : > { %v2375_v43 = vpop.eup %2374  ;;  %v1945_v44 = vpack.c.bf16 %v1497_v58, %v1497_v58  ;;  %v1498_v45 = vadd.f32 %v2000_v26, %v1466_v37  ;;  %v1175_v46 = vadd.f32 %v1174_v40, %v1014_v32  ;;  %v1176_v47 = vpop.f32.mrb[57].mxu1  ;;  %v2147_v51 = vadd.f32 %v2146_v48, %v2145_v42 }
 0x177   : > { %2384 = vrcp.f32 %v1373_v39  ;;  %v1374_v49 = vadd.f32 1.0, %v2375_v43  ;;  %v1177_v50 = vpop.f32.mrb[58].mxu1  ;;  %v1022_v9 = vadd.f32 %v2144_v41, %v2634_v34  ;;  %v2408_v34 = vld [vmem:[%s2830_s2] ss:$0 sm:$0xff]  ;;  %v2012_v37 = vunpack.c.h.bf16 %v2691_v1 }
 0x178   : > { %1658 = vst.msk [vmem:[%s2698_s9 + $0x50] sm:$0xf] %vm1637_vm1, %v1945_v44  ;;  %v1946_v61 = vpack.c.bf16 %v1498_v45, %v1498_v45  ;;  %v1886_v2 = vmul.f32 -1.442695, %v1175_v46  ;;  %v1178_v55 = vadd.f32 %v1177_v50, %v1017_v53  ;;  %v1179_v3 = vpop.f32.mrb[59].mxu1  ;;  %v1025_v18 = vadd.f32 %v2408_v34, %v2147_v51 }
 0x179   : > { %v2377_v4 = vpop.eup %2376  ;;  %2386 = vrcp.f32 %v1374_v49  ;;  %v2015_v47 = vunpack.c.l.bf16 %v2701_v5  ;;  %v2016_v48 = vunpack.c.h.bf16 %v2701_v5  ;;  %v2019_v3 = vunpack.c.l.bf16 %v2704_v6 }
 0x17a   : > { %1659 = vst.msk [vmem:[%s2698_s9 + $0x54] sm:$0xf] %vm1637_vm1, %v1946_v61  ;;  %v1467_v7 = vmul.f32 %v2377_v4, %v2003_v60  ;;  %2388 = vpow2.f32 %v1886_v2  ;;  %v1887_v8 = vmul.f32 -1.442695, %v1178_v55 }
 0x17b   : > { %v2379_v57 = vpop.eup %2378 }
 0x17c   : > { %v2381_v10 = vpop.eup %2380  ;;  %v1499_v11 = vadd.f32 %v2003_v60, %v1467_v7  ;;  %v1468_v12 = vmul.f32 %v2379_v57, %v2004_v62  ;;  %2390 = vpow2.f32 %v1887_v8  ;;  %v2020_v7 = vunpack.c.h.bf16 %v2704_v6 }
 0x17d   : > { %v1375_v59 = vadd.f32 1.0, %v2381_v10  ;;  %v1182_v13 = vpop.f32.mrb[60].mxu1 }
 0x17e   : > { %v2383_v14 = vpop.eup %2382  ;;  %v1947_v15 = vpack.c.bf16 %v1499_v11, %v1499_v11  ;;  %v1500_v16 = vadd.f32 %v2004_v62, %v1468_v12  ;;  %v1183_v17 = vadd.f32 %v1182_v13, %v1022_v9  ;;  %v1184_v52 = vpop.f32.mrb[61].mxu1 }
 0x17f   : > { %2392 = vrcp.f32 %v1375_v59  ;;  %v1376_v19 = vadd.f32 1.0, %v2383_v14  ;;  %v1185_v20 = vpop.f32.mrb[62].mxu1 }
 0x180   : > { %1660 = vst.msk [vmem:[%s2698_s9 + $0x58] sm:$0xf] %vm1637_vm1, %v1947_v15  ;;  %v1948_v21 = vpack.c.bf16 %v1500_v16, %v1500_v16  ;;  %v1888_v23 = vmul.f32 -1.442695, %v1183_v17  ;;  %v1186_v24 = vadd.f32 %v1185_v20, %v1025_v18  ;;  %v1187_v25 = vpop.f32.mrb[63].mxu1 }
 0x181   : > { %v2385_v54 = vpop.eup %2384  ;;  %2394 = vrcp.f32 %v1376_v19 }
 0x182   : > { %1661 = vst.msk [vmem:[%s2698_s9 + $0x5c] sm:$0xf] %vm1637_vm1, %v1948_v21  ;;  %v1469_v26 = vmul.f32 %v2385_v54, %v2007_v63  ;;  %2396 = vpow2.f32 %v1888_v23  ;;  %v1889_v27 = vmul.f32 -1.442695, %v1186_v24 }
 0x183   : > { %v2387_v28 = vpop.eup %2386 }
 0x184   : > { %v2389_v29 = vpop.eup %2388  ;;  %v1501_v30 = vadd.f32 %v2007_v63, %v1469_v26  ;;  %v1470_v31 = vmul.f32 %v2387_v28, %v2008_v22  ;;  %2398 = vpow2.f32 %v1889_v27 }
 0x185   : > { %v1377_v56 = vadd.f32 1.0, %v2389_v29 }
 0x186   : > { %v2391_v32 = vpop.eup %2390  ;;  %v1949_v0 = vpack.c.bf16 %v1501_v30, %v1501_v30  ;;  %v1502_v33 = vadd.f32 %v2008_v22, %v1470_v31 }
 0x187   : > { %2400 = vrcp.f32 %v1377_v56  ;;  %v1378_v36 = vadd.f32 1.0, %v2391_v32 }
 0x188   : > { %1662 = vst.msk [vmem:[%s2698_s9 + $0x60] sm:$0xf] %vm1637_vm1, %v1949_v0  ;;  %v1950_v58 = vpack.c.bf16 %v1502_v33, %v1502_v33 }
 0x189   : > { %v2393_v38 = vpop.eup %2392  ;;  %2402 = vrcp.f32 %v1378_v36 }
 0x18a   : > { %1663 = vst.msk [vmem:[%s2698_s9 + $0x64] sm:$0xf] %vm1637_vm1, %v1950_v58  ;;  %v1471_v60 = vmul.f32 %v2393_v38, %v2011_v35 }
 0x18b   : > { %v2395_v39 = vpop.eup %2394 }
 0x18c   : > { %v2397_v40 = vpop.eup %2396  ;;  %v1503_v41 = vadd.f32 %v2011_v35, %v1471_v60  ;;  %v1472_v42 = vmul.f32 %v2395_v39, %v2012_v37 }
 0x18d   : > { %v1379_v43 = vadd.f32 1.0, %v2397_v40 }
 0x18e   : > { %v2399_v44 = vpop.eup %2398  ;;  %v1951_v45 = vpack.c.bf16 %v1503_v41, %v1503_v41  ;;  %v1504_v46 = vadd.f32 %v2012_v37, %v1472_v42 }
 0x18f   : > { %2404 = vrcp.f32 %v1379_v43  ;;  %v1380_v1 = vadd.f32 1.0, %v2399_v44 }
 0x190   : > { %1664 = vst.msk [vmem:[%s2698_s9 + $0x68] sm:$0xf] %vm1637_vm1, %v1951_v45  ;;  %v1952_v53 = vpack.c.bf16 %v1504_v46, %v1504_v46 }
 0x191   : > { %v2401_v49 = vpop.eup %2400  ;;  %2406 = vrcp.f32 %v1380_v1 }
 0x192   : > { %1665 = vst.msk [vmem:[%s2698_s9 + $0x6c] sm:$0xf] %vm1637_vm1, %v1952_v53  ;;  %v1473_v50 = vmul.f32 %v2401_v49, %v2015_v47 }
 0x193   : > { %v2403_v51 = vpop.eup %2402 }
 0x194   : > { %v1505_v61 = vadd.f32 %v2015_v47, %v1473_v50  ;;  %v1474_v62 = vmul.f32 %v2403_v51, %v2016_v48 }
 0x196   : > { %v1953_v2 = vpack.c.bf16 %v1505_v61, %v1505_v61  ;;  %v1506_v55 = vadd.f32 %v2016_v48, %v1474_v62 }
 0x198   : > { %1666 = vst.msk [vmem:[%s2698_s9 + $0x70] sm:$0xf] %vm1637_vm1, %v1953_v2  ;;  %v1954_v4 = vpack.c.bf16 %v1506_v55, %v1506_v55 }
 0x199   : > { %v2405_v5 = vpop.eup %2404 }
 0x19a   : > { %1667 = vst.msk [vmem:[%s2698_s9 + $0x74] sm:$0xf] %vm1637_vm1, %v1954_v4  ;;  %v1475_v8 = vmul.f32 %v2405_v5, %v2019_v3 }
 0x19b   : > { %v2407_v9 = vpop.eup %2406 }
 0x19c   : > { %v1507_v57 = vadd.f32 %v2019_v3, %v1475_v8  ;;  %v1476_v10 = vmul.f32 %v2407_v9, %v2020_v7 }
 0x19e   : > { %v1955_v11 = vpack.c.bf16 %v1507_v57, %v1507_v57  ;;  %v1508_v12 = vadd.f32 %v2020_v7, %v1476_v10 }
 0x1a0   : > { %1668 = vst.msk [vmem:[%s2698_s9 + $0x78] sm:$0xf] %vm1637_vm1, %v1955_v11  ;;  %v1956_v63 = vpack.c.bf16 %v1508_v12, %v1508_v12 }
 0x1a2   : > { %1669 = vst.msk [vmem:[%s2698_s9 + $0x7c] sm:$0xf] %vm1637_vm1, %v1956_v63 }
 0x1a3 PF: > { %s14_s15 = sadd.s32 1, %s2415_s15  }
 0x1a4   : > { %p11_p4 = scmp.ge.s32.totalorder %s14_s15, 4  }
 0x1a6   :  { %13 = sbr.rel (!%p11_p4) target bundleno = 1 (0x1), region = 69 }

</bundles_post_ra>
